<compile_context>
chip_gen: v7x
topology: tpu7x:2x2x1
jax: 0.10.0
libtpu: 0.0.40
codegen_flags: <defaults>
</compile_context>

<pallas_src>
import functools

import jax
import jax.numpy as jnp
from jax import lax
from jax.experimental import pallas as pl
from jax.experimental.pallas import tpu as pltpu

EPS = 1e-5
CPAD = 128  # lane-dense channel padding for every conv output


def _vmem():
    return pl.BlockSpec(memory_space=pltpu.MemorySpace.VMEM)


def _smem():
    return pl.BlockSpec(memory_space=pltpu.MemorySpace.SMEM)


def _round_up(x, m):
    return (x + m - 1) // m * m


# ---------------------------------------------------------------------------
# Fused conv stage: single im2col matmul + BatchNorm (batch stats) + PReLU.
# Optionally writes the output directly in the trunk's padded megaplane layout.
# ---------------------------------------------------------------------------

def _conv_stage_kernel(p_ref, w_ref, g_ref, b_ref, alpha_ref, o_ref, *,
                       m_valid, use_prelu, plane_cfg):
    # One well-shaped MXU matmul: (Mpad, Kpad) x (Kpad, 128), f32 accumulation.
    acc = jnp.dot(p_ref[...], w_ref[...], preferred_element_type=jnp.float32)

    # Padded patch rows / K columns are zero, so they contribute nothing to the
    # sums; divide by the true element count.  (One-pass E[x^2]-E[x]^2 in f32.)
    cnt = jnp.float32(m_valid)
    s1 = jnp.sum(acc, axis=0, keepdims=True)
    s2 = jnp.sum(acc * acc, axis=0, keepdims=True)
    mean = s1 / cnt
    var = s2 / cnt - mean * mean
    scale = g_ref[...] * jax.lax.rsqrt(var + EPS)
    shift = b_ref[...] - mean * scale
    y = acc * scale + shift
    if use_prelu:
        alpha = alpha_ref[0]
        y = jnp.where(y > 0, y, alpha * y)

    if plane_cfg is None:
        o_ref[...] = y
    else:
        # Emit the zero-padded flat megaplane the residual trunk consumes.
        nb, ho, wo, hp, wp, guard = plane_cfg
        o_ref[...] = jnp.zeros_like(o_ref)          # halos/guards zeroed ONCE
        for n in range(nb):
            for h in range(ho):
                src = (n * ho + h) * wo
                dst = guard + n * hp * wp + (h + 1) * wp + 1
                o_ref[pl.ds(dst, wo), :] = y[src:src + wo, :]


def conv_bn_stage(x_nhwc, w, gamma, beta, alpha, *, ksize, stride, pad,
                  use_prelu, plane_cfg=None):
    """x: (N,H,W,Cin) f32; w: (k,k,Cin,Cout) f32.

    Returns (N,Ho,Wo,Cout) f32, or the (TOT,128) trunk megaplane when
    plane_cfg=(guard, Hp, Wp) is given.
    """
    nb, h, wd, cin = x_nhwc.shape
    cout = w.shape[-1]
    ho = (h + 2 * pad - ksize) // stride + 1
    wo = (wd + 2 * pad - ksize) // stride + 1

    # --- im2col glue (pure layout on tiny tensors; folds k*k taps into K) ---
    xp = jnp.pad(x_nhwc, ((0, 0), (pad, pad), (pad, pad), (0, 0)))
    cols = []
    for kh in range(ksize):
        for kw in range(ksize):
            cols.append(xp[:, kh:kh + ho * stride:stride,
                           kw:kw + wo * stride:stride, :])
    k_dim = ksize * ksize * cin
    patches = jnp.concatenate(cols, axis=-1).reshape(nb * ho * wo, k_dim)

    m_valid = nb * ho * wo
    m_pad = _round_up(m_valid, 8)
    k_pad = _round_up(k_dim, 128)
    patches = jnp.pad(patches, ((0, m_pad - m_valid),
                                (0, k_pad - k_dim))).astype(jnp.bfloat16)
    w_flat = jnp.pad(w.reshape(k_dim, cout),
                     ((0, k_pad - k_dim), (0, CPAD - cout))).astype(jnp.bfloat16)
    g = jnp.pad(gamma, (0, CPAD - cout), constant_values=1.0)
    g = g.reshape(1, CPAD).astype(jnp.float32)
    b = jnp.pad(beta, (0, CPAD - cout)).reshape(1, CPAD).astype(jnp.float32)
    a = alpha.reshape(1).astype(jnp.float32)

    if plane_cfg is None:
        out_rows = m_pad
        kcfg = None
    else:
        guard, hp, wp = plane_cfg
        out_rows = 2 * guard + nb * hp * wp
        kcfg = (nb, ho, wo, hp, wp, guard)

    kernel = functools.partial(_conv_stage_kernel, m_valid=m_valid,
                               use_prelu=use_prelu, plane_cfg=kcfg)
    out = pl.pallas_call(
        kernel,
        out_shape=jax.ShapeDtypeStruct((out_rows, CPAD), jnp.float32),
        in_specs=[_vmem()] * 4 + [_smem()],
        out_specs=_vmem(),
    )(patches, w_flat, g, b, a)

    if plane_cfg is None:
        return out[:m_valid].reshape(nb, ho, wo, CPAD)[..., :cout]
    return out


# ---------------------------------------------------------------------------
# Fully fused residual trunk: 5 x D_ResBlock (= 15 shared-weight ResBlocks,
# 30 conv+BN), all in one pallas_call.  Activations live in VMEM megaplanes:
# (2*guard + N*Hp*Wp, 128) f32, per-image planes zero-padded (pad=1) and laid
# out contiguously so each conv tap is ONE matmul over all images.
# ---------------------------------------------------------------------------

def _trunk_kernel(x_ref, w_ref, g_ref, b_ref, mask_ref, alpha_ref, o_ref,
                  cur_ref, mid_ref, din_ref, src16_ref, *,
                  guard, m_rows, wp, cnt, n_blocks, group):
    mask = mask_ref[...]                              # (M,1) valid-output mask
    gamma = g_ref[...]
    beta = b_ref[...]
    alpha = alpha_ref[0]
    cnt_f = jnp.float32(cnt)
    base = guard - wp - 1                             # tap (0,0) row offset

    cur_ref[...] = x_ref[...]                         # trunk input (zero halos)
    mid_ref[...] = jnp.zeros_like(mid_ref)            # zero guards/halos ONCE

    def conv_bn(src_ref):
        # One bf16 cast of the whole plane per conv (not per tap).
        src16_ref[...] = src_ref[...].astype(jnp.bfloat16)
        acc = None
        for t in range(9):                            # back-to-back acc += dot
            kh, kw = divmod(t, 3)
            part = jnp.dot(src16_ref[pl.ds(base + kh * wp + kw, m_rows), :],
                           w_ref[t], preferred_element_type=jnp.float32)
            acc = part if acc is None else acc + part
        am = acc * mask                               # mask halo/seam rows
        s1 = jnp.sum(am, axis=0, keepdims=True)
        s2 = jnp.sum(am * acc, axis=0, keepdims=True)
        mean = s1 / cnt_f
        var = s2 / cnt_f - mean * mean
        scale = gamma * jax.lax.rsqrt(var + EPS)
        shift = beta - mean * scale
        return acc * scale + shift                    # (M,128) f32

    def block_step(step, carry):
        # Start of each D_ResBlock: snapshot its input for the skip add.
        @pl.when(lax.rem(step, group) == 0)
        def _():
            din_ref[...] = cur_ref[...]

        # conv -> BN -> PReLU -> (masked) padded plane
        y1 = conv_bn(cur_ref)
        y1 = jnp.where(y1 > 0, y1, alpha * y1)
        mid_ref[pl.ds(guard, m_rows), :] = y1 * mask

        # conv -> BN -> + x (ResBlock) [+ D_ResBlock skip] [+ trunk skip]
        y2 = conv_bn(mid_ref)
        sel_d = jnp.where(lax.rem(step, group) == group - 1,
                          1.0, 0.0).astype(jnp.float32)
        sel_x = jnp.where(step == n_blocks - 1, 1.0, 0.0).astype(jnp.float32)
        y2 = (y2
              + cur_ref[pl.ds(guard, m_rows), :]
              + sel_d * din_ref[pl.ds(guard, m_rows), :]
              + sel_x * x_ref[pl.ds(guard, m_rows), :])
        cur_ref[pl.ds(guard, m_rows), :] = y2 * mask
        return carry

    lax.fori_loop(0, n_blocks, block_step, 0)
    o_ref[...] = cur_ref[...]


def run_trunk(x_mega, w9, gamma, beta, alpha, mask, *,
              guard, m_rows, wp, cnt, n_blocks=15, group=3):
    tot = x_mega.shape[0]
    kernel = functools.partial(_trunk_kernel, guard=guard, m_rows=m_rows,
                               wp=wp, cnt=cnt, n_blocks=n_blocks, group=group)
    return pl.pallas_call(
        kernel,
        out_shape=jax.ShapeDtypeStruct((tot, CPAD), jnp.float32),
        in_specs=[_vmem()] * 5 + [_smem()],
        out_specs=_vmem(),
        scratch_shapes=[pltpu.VMEM((tot, CPAD), jnp.float32),   # cur plane
                        pltpu.VMEM((tot, CPAD), jnp.float32),   # mid plane
                        pltpu.VMEM((tot, CPAD), jnp.float32),   # d_in plane
                        pltpu.VMEM((tot, CPAD), jnp.bfloat16)], # bf16 tap src
    )(x_mega, w9, gamma, beta, mask, alpha)


# ---------------------------------------------------------------------------
# EnCoder forward
# ---------------------------------------------------------------------------

def init_params(key, k):
    keys = jax.random.split(key, 12)
    return {
        # conv weights stored as (kh, kw, Cin, Cout); bias=False in the reference
        "conv1_w": jax.random.normal(keys[0], (5, 5, 3, 64), jnp.float32) * 0.05,
        "conv2_w": jax.random.normal(keys[1], (5, 5, 64, 128), jnp.float32) * 0.05,
        "conv3_w": jax.random.normal(keys[2], (5, 5, 128, k + 1), jnp.float32) * 0.05,
        "res_conv_w": jax.random.normal(keys[3], (3, 3, 128, 128), jnp.float32) * 0.05,
        "bn64_g": 1.0 + 0.1 * jax.random.normal(keys[4], (64,), jnp.float32),
        "bn64_b": 0.1 * jax.random.normal(keys[5], (64,), jnp.float32),
        "bn128_g": 1.0 + 0.1 * jax.random.normal(keys[6], (128,), jnp.float32),
        "bn128_b": 0.1 * jax.random.normal(keys[7], (128,), jnp.float32),
        "bn65_g": 1.0 + 0.1 * jax.random.normal(keys[8], (k + 1,), jnp.float32),
        "bn65_b": 0.1 * jax.random.normal(keys[9], (k + 1,), jnp.float32),
        "res_bn_g": 1.0 + 0.1 * jax.random.normal(keys[10], (128,), jnp.float32),
        "res_bn_b": 0.1 * jax.random.normal(keys[11], (128,), jnp.float32),
        # nn.PReLU() default single parameter = 0.25
        "enc_alpha": jnp.array(0.25, jnp.float32),
        "res_alpha": jnp.array(0.25, jnp.float32),
    }


def encoder_forward(x_nchw, params, k):
    x = jnp.transpose(x_nchw, (0, 2, 3, 1)).astype(jnp.float32)   # NCHW -> NHWC
    nb = x.shape[0]
    ea = params["enc_alpha"]

    # conv1 -> bn64 -> PReLU (one matmul-fused pallas_call)
    h1 = conv_bn_stage(x, params["conv1_w"], params["bn64_g"], params["bn64_b"],
                       ea, ksize=5, stride=2, pad=2, use_prelu=True)

    # Trunk megaplane geometry (derived from conv2's output spatial size).
    h2 = (h1.shape[1] + 4 - 5) // 2 + 1
    w2 = (h1.shape[2] + 4 - 5) // 2 + 1
    wp = _round_up(w2 + 2, 8)          # padded plane width (multiple of 8)
    hp = h2 + 2
    guard = _round_up(wp + 1, 8)       # inter-image / boundary guard rows
    plane_rows = hp * wp
    m_rows = nb * plane_rows

    # conv2 -> bn128 -> PReLU, writing the trunk megaplane directly (no glue).
    x_mega = conv_bn_stage(h1, params["conv2_w"], params["bn128_g"],
                           params["bn128_b"], ea, ksize=5, stride=2, pad=2,
                           use_prelu=True, plane_cfg=(guard, hp, wp))

    # Valid-output mask over the megaplane rows (interior positions only).
    q = jnp.arange(m_rows, dtype=jnp.int32) % plane_rows
    i = q // wp
    j = q % wp
    valid = (i >= 1) & (i <= h2) & (j >= 1) & (j <= w2)
    mask = valid.astype(jnp.float32).reshape(m_rows, 1)

    w9 = params["res_conv_w"].reshape(9, 128, 128).astype(jnp.bfloat16)
    rg = params["res_bn_g"].reshape(1, 128).astype(jnp.float32)
    rb = params["res_bn_b"].reshape(1, 128).astype(jnp.float32)
    ra = params["res_alpha"].reshape(1).astype(jnp.float32)

    # Entire residual trunk (5 D_ResBlocks = 15 ResBlocks) in ONE pallas_call.
    mega = run_trunk(x_mega, w9, rg, rb, ra, mask, guard=guard, m_rows=m_rows,
                     wp=wp, cnt=float(nb * h2 * w2))

    # TODO(synk): conv3 could consume the megaplane layout in-kernel (strided
    # taps) to drop this small layout glue as well.
    x1 = mega[guard:guard + m_rows].reshape(nb, hp, wp, CPAD)
    x1 = x1[:, 1:1 + h2, 1:1 + w2, :]

    # conv3 -> bn65 (no activation), fused
    x2 = conv_bn_stage(x1, params["conv3_w"], params["bn65_g"], params["bn65_b"],
                       ea, ksize=5, stride=2, pad=2, use_prelu=False)

    # torch: attention_map = x2[:, k:k+1]; x2 = x2[:, :k]; x2.mul(attention_map)
    # is non-in-place so its result is discarded -> return the first k channels.
    feat = x2[..., :k]
    return jnp.transpose(feat, (0, 3, 1, 2))          # back to NCHW


if __name__ == "__main__":
    k = 64
    key = jax.random.PRNGKey(0)
    pkey, xkey = jax.random.split(key)
    params = init_params(pkey, k)

    # Small input consistent with the module: NCHW (2, 3, 16, 16)
    x = jax.random.normal(xkey, (2, 3, 16, 16), jnp.float32)

    fwd = jax.jit(functools.partial(encoder_forward, k=k))
    out = fwd(x, params)
    jax.block_until_ready(out)
    assert out.shape == (2, k, 2, 2), out.shape
    print("KERNEL_OK")
</pallas_src>

<mosaic_0001>
module attributes {stable_mosaic.version = 11 : i64} {
  func.func @_conv_stage_kernel(%arg0: memref<128x128xbf16, #tpu.memory_space<vmem>>, %arg1: memref<128x128xbf16, #tpu.memory_space<vmem>>, %arg2: memref<1x128xf32, #tpu.memory_space<vmem>>, %arg3: memref<1x128xf32, #tpu.memory_space<vmem>>, %arg4: memref<1xf32, #tpu.memory_space<smem>>, %arg5: memref<128x128xf32, #tpu.memory_space<vmem>>) attributes {dimension_semantics = [], scalar_prefetch = 0 : i64, scratch_operands = 0 : i64, tpu.core_type = #tpu.core_type<tc>} {
    %c0 = arith.constant 0 : index
    %c0_0 = arith.constant 0 : index
    %0 = vector.load %arg0[%c0, %c0_0] : memref<128x128xbf16, #tpu.memory_space<vmem>>, vector<128x128xbf16>
    %c0_1 = arith.constant 0 : index
    %c0_2 = arith.constant 0 : index
    %1 = vector.load %arg1[%c0_1, %c0_2] : memref<128x128xbf16, #tpu.memory_space<vmem>>, vector<128x128xbf16>
    %cst = arith.constant dense<0.000000e+00> : vector<128x128xf32>
    %2 = tpu.matmul %0, %1, %cst {dimension_numbers = #tpu.dot_dimension_numbers<[1], [0], [0], [1], [0, 0, 1, 1], [], []>} : vector<128x128xbf16>, vector<128x128xbf16>, vector<128x128xf32> -> vector<128x128xf32>
    %cst_3 = arith.constant dense<0.000000e+00> : vector<128xf32>
    %3 = vector.multi_reduction <add>, %2, %cst_3 [0] : vector<128x128xf32> to vector<128xf32>
    %4 = vector.shape_cast %3 : vector<128xf32> to vector<1x128xf32>
    %5 = arith.mulf %2, %2 : vector<128x128xf32>
    %cst_4 = arith.constant dense<0.000000e+00> : vector<128xf32>
    %6 = vector.multi_reduction <add>, %5, %cst_4 [0] : vector<128x128xf32> to vector<128xf32>
    %7 = vector.shape_cast %6 : vector<128xf32> to vector<1x128xf32>
    %cst_5 = arith.constant 1.280000e+02 : f32
    %8 = vector.broadcast %cst_5 : f32 to vector<1x128xf32>
    %9 = arith.divf %4, %8 : vector<1x128xf32>
    %cst_6 = arith.constant 1.280000e+02 : f32
    %10 = vector.broadcast %cst_6 : f32 to vector<1x128xf32>
    %11 = arith.divf %7, %10 : vector<1x128xf32>
    %12 = arith.mulf %9, %9 : vector<1x128xf32>
    %13 = arith.subf %11, %12 : vector<1x128xf32>
    %c0_7 = arith.constant 0 : index
    %c0_8 = arith.constant 0 : index
    %14 = vector.load %arg2[%c0_7, %c0_8] : memref<1x128xf32, #tpu.memory_space<vmem>>, vector<1x128xf32>
    %cst_9 = arith.constant 9.99999974E-6 : f32
    %15 = vector.broadcast %cst_9 : f32 to vector<1x128xf32>
    %16 = arith.addf %13, %15 : vector<1x128xf32>
    %17 = math.rsqrt %16 : vector<1x128xf32>
    %18 = arith.mulf %14, %17 : vector<1x128xf32>
    %c0_10 = arith.constant 0 : index
    %c0_11 = arith.constant 0 : index
    %19 = vector.load %arg3[%c0_10, %c0_11] : memref<1x128xf32, #tpu.memory_space<vmem>>, vector<1x128xf32>
    %20 = arith.mulf %9, %18 : vector<1x128xf32>
    %21 = arith.subf %19, %20 : vector<1x128xf32>
    %22 = vector.broadcast %18 : vector<1x128xf32> to vector<128x128xf32>
    %23 = arith.mulf %2, %22 : vector<128x128xf32>
    %24 = vector.broadcast %21 : vector<1x128xf32> to vector<128x128xf32>
    %25 = arith.addf %23, %24 : vector<128x128xf32>
    %c0_12 = arith.constant 0 : index
    %26 = memref.load %arg4[%c0_12] : memref<1xf32, #tpu.memory_space<smem>>
    %cst_13 = arith.constant 0.000000e+00 : f32
    %27 = vector.broadcast %cst_13 : f32 to vector<128x128xf32>
    %28 = arith.cmpf ogt, %25, %27 : vector<128x128xf32>
    %29 = vector.broadcast %26 : f32 to vector<128x128xf32>
    %30 = arith.mulf %29, %25 : vector<128x128xf32>
    %31 = arith.select %28, %25, %30 : vector<128x128xi1>, vector<128x128xf32>
    %c0_14 = arith.constant 0 : index
    %c0_15 = arith.constant 0 : index
    %32 = vector.load %arg5[%c0_14, %c0_15] : memref<128x128xf32, #tpu.memory_space<vmem>>, vector<128x128xf32>
    tpu.vector_store %arg5[%c0_14, %c0_15], %31 {strides = array<i32>} : memref<128x128xf32, #tpu.memory_space<vmem>>, vector<128x128xf32>,
    return
  }
}

module attributes {stable_mosaic.version = 11 : i64} {
  func.func @_conv_stage_kernel(%arg0: memref<32x1664xbf16, #tpu.memory_space<vmem>>, %arg1: memref<1664x128xbf16, #tpu.memory_space<vmem>>, %arg2: memref<1x128xf32, #tpu.memory_space<vmem>>, %arg3: memref<1x128xf32, #tpu.memory_space<vmem>>, %arg4: memref<1xf32, #tpu.memory_space<smem>>, %arg5: memref<128x128xf32, #tpu.memory_space<vmem>>) attributes {dimension_semantics = [], scalar_prefetch = 0 : i64, scratch_operands = 0 : i64, tpu.core_type = #tpu.core_type<tc>} {
    %c0 = arith.constant 0 : index
    %c0_0 = arith.constant 0 : index
    %0 = vector.load %arg0[%c0, %c0_0] : memref<32x1664xbf16, #tpu.memory_space<vmem>>, vector<32x1664xbf16>
    %c0_1 = arith.constant 0 : index
    %c0_2 = arith.constant 0 : index
    %1 = vector.load %arg1[%c0_1, %c0_2] : memref<1664x128xbf16, #tpu.memory_space<vmem>>, vector<1664x128xbf16>
    %cst = arith.constant dense<0.000000e+00> : vector<32x128xf32>
    %2 = tpu.matmul %0, %1, %cst {dimension_numbers = #tpu.dot_dimension_numbers<[1], [0], [0], [1], [0, 0, 1, 1], [], []>} : vector<32x1664xbf16>, vector<1664x128xbf16>, vector<32x128xf32> -> vector<32x128xf32>
    %cst_3 = arith.constant dense<0.000000e+00> : vector<128xf32>
    %3 = vector.multi_reduction <add>, %2, %cst_3 [0] : vector<32x128xf32> to vector<128xf32>
    %4 = vector.shape_cast %3 : vector<128xf32> to vector<1x128xf32>
    %5 = arith.mulf %2, %2 : vector<32x128xf32>
    %cst_4 = arith.constant dense<0.000000e+00> : vector<128xf32>
    %6 = vector.multi_reduction <add>, %5, %cst_4 [0] : vector<32x128xf32> to vector<128xf32>
    %7 = vector.shape_cast %6 : vector<128xf32> to vector<1x128xf32>
    %cst_5 = arith.constant 3.200000e+01 : f32
    %8 = vector.broadcast %cst_5 : f32 to vector<1x128xf32>
    %9 = arith.divf %4, %8 : vector<1x128xf32>
    %cst_6 = arith.constant 3.200000e+01 : f32
    %10 = vector.broadcast %cst_6 : f32 to vector<1x128xf32>
    %11 = arith.divf %7, %10 : vector<1x128xf32>
    %12 = arith.mulf %9, %9 : vector<1x128xf32>
    %13 = arith.subf %11, %12 : vector<1x128xf32>
    %c0_7 = arith.constant 0 : index
    %c0_8 = arith.constant 0 : index
    %14 = vector.load %arg2[%c0_7, %c0_8] : memref<1x128xf32, #tpu.memory_space<vmem>>, vector<1x128xf32>
    %cst_9 = arith.constant 9.99999974E-6 : f32
    %15 = vector.broadcast %cst_9 : f32 to vector<1x128xf32>
    %16 = arith.addf %13, %15 : vector<1x128xf32>
    %17 = math.rsqrt %16 : vector<1x128xf32>
    %18 = arith.mulf %14, %17 : vector<1x128xf32>
    %c0_10 = arith.constant 0 : index
    %c0_11 = arith.constant 0 : index
    %19 = vector.load %arg3[%c0_10, %c0_11] : memref<1x128xf32, #tpu.memory_space<vmem>>, vector<1x128xf32>
    %20 = arith.mulf %9, %18 : vector<1x128xf32>
    %21 = arith.subf %19, %20 : vector<1x128xf32>
    %22 = vector.broadcast %18 : vector<1x128xf32> to vector<32x128xf32>
    %23 = arith.mulf %2, %22 : vector<32x128xf32>
    %24 = vector.broadcast %21 : vector<1x128xf32> to vector<32x128xf32>
    %25 = arith.addf %23, %24 : vector<32x128xf32>
    %c0_12 = arith.constant 0 : index
    %26 = memref.load %arg4[%c0_12] : memref<1xf32, #tpu.memory_space<smem>>
    %cst_13 = arith.constant 0.000000e+00 : f32
    %27 = vector.broadcast %cst_13 : f32 to vector<32x128xf32>
    %28 = arith.cmpf ogt, %25, %27 : vector<32x128xf32>
    %29 = vector.broadcast %26 : f32 to vector<32x128xf32>
    %30 = arith.mulf %29, %25 : vector<32x128xf32>
    %31 = arith.select %28, %25, %30 : vector<32x128xi1>, vector<32x128xf32>
    %cst_14 = arith.constant 0.000000e+00 : f32
    %32 = vector.broadcast %cst_14 : f32 to vector<128x128xf32>
    %c0_15 = arith.constant 0 : index
    %c0_16 = arith.constant 0 : index
    %33 = vector.load %arg5[%c0_15, %c0_16] : memref<128x128xf32, #tpu.memory_space<vmem>>, vector<128x128xf32>
    tpu.vector_store %arg5[%c0_15, %c0_16], %32 {strides = array<i32>} : memref<128x128xf32, #tpu.memory_space<vmem>>, vector<128x128xf32>,
    %34 = vector.extract_strided_slice %31 {offsets = [0, 0], sizes = [4, 128], strides = [1, 1]} : vector<32x128xf32> to vector<4x128xf32>
    %c25 = arith.constant 25 : index
    %c0_17 = arith.constant 0 : index
    %35 = vector.load %arg5[%c25, %c0_17] : memref<128x128xf32, #tpu.memory_space<vmem>>, vector<4x128xf32>
    tpu.vector_store %arg5[%c25, %c0_17], %34 {strides = array<i32>} : memref<128x128xf32, #tpu.memory_space<vmem>>, vector<4x128xf32>,
    %36 = vector.extract_strided_slice %31 {offsets = [4, 0], sizes = [4, 128], strides = [1, 1]} : vector<32x128xf32> to vector<4x128xf32>
    %c33 = arith.constant 33 : index
    %c0_18 = arith.constant 0 : index
    %37 = vector.load %arg5[%c33, %c0_18] : memref<128x128xf32, #tpu.memory_space<vmem>>, vector<4x128xf32>
    tpu.vector_store %arg5[%c33, %c0_18], %36 {strides = array<i32>} : memref<128x128xf32, #tpu.memory_space<vmem>>, vector<4x128xf32>,
    %38 = vector.extract_strided_slice %31 {offsets = [8, 0], sizes = [4, 128], strides = [1, 1]} : vector<32x128xf32> to vector<4x128xf32>
    %c41 = arith.constant 41 : index
    %c0_19 = arith.constant 0 : index
    %39 = vector.load %arg5[%c41, %c0_19] : memref<128x128xf32, #tpu.memory_space<vmem>>, vector<4x128xf32>
    tpu.vector_store %arg5[%c41, %c0_19], %38 {strides = array<i32>} : memref<128x128xf32, #tpu.memory_space<vmem>>, vector<4x128xf32>,
    %40 = vector.extract_strided_slice %31 {offsets = [12, 0], sizes = [4, 128], strides = [1, 1]} : vector<32x128xf32> to vector<4x128xf32>
    %c49 = arith.constant 49 : index
    %c0_20 = arith.constant 0 : index
    %41 = vector.load %arg5[%c49, %c0_20] : memref<128x128xf32, #tpu.memory_space<vmem>>, vector<4x128xf32>
    tpu.vector_store %arg5[%c49, %c0_20], %40 {strides = array<i32>} : memref<128x128xf32, #tpu.memory_space<vmem>>, vector<4x128xf32>,
    %42 = vector.extract_strided_slice %31 {offsets = [16, 0], sizes = [4, 128], strides = [1, 1]} : vector<32x128xf32> to vector<4x128xf32>
    %c73 = arith.constant 73 : index
    %c0_21 = arith.constant 0 : index
    %43 = vector.load %arg5[%c73, %c0_21] : memref<128x128xf32, #tpu.memory_space<vmem>>, vector<4x128xf32>
    tpu.vector_store %arg5[%c73, %c0_21], %42 {strides = array<i32>} : memref<128x128xf32, #tpu.memory_space<vmem>>, vector<4x128xf32>,
    %44 = vector.extract_strided_slice %31 {offsets = [20, 0], sizes = [4, 128], strides = [1, 1]} : vector<32x128xf32> to vector<4x128xf32>
    %c81 = arith.constant 81 : index
    %c0_22 = arith.constant 0 : index
    %45 = vector.load %arg5[%c81, %c0_22] : memref<128x128xf32, #tpu.memory_space<vmem>>, vector<4x128xf32>
    tpu.vector_store %arg5[%c81, %c0_22], %44 {strides = array<i32>} : memref<128x128xf32, #tpu.memory_space<vmem>>, vector<4x128xf32>,
    %46 = vector.extract_strided_slice %31 {offsets = [24, 0], sizes = [4, 128], strides = [1, 1]} : vector<32x128xf32> to vector<4x128xf32>
    %c89 = arith.constant 89 : index
    %c0_23 = arith.constant 0 : index
    %47 = vector.load %arg5[%c89, %c0_23] : memref<128x128xf32, #tpu.memory_space<vmem>>, vector<4x128xf32>
    tpu.vector_store %arg5[%c89, %c0_23], %46 {strides = array<i32>} : memref<128x128xf32, #tpu.memory_space<vmem>>, vector<4x128xf32>,
    %48 = vector.extract_strided_slice %31 {offsets = [28, 0], sizes = [4, 128], strides = [1, 1]} : vector<32x128xf32> to vector<4x128xf32>
    %c97 = arith.constant 97 : index
    %c0_24 = arith.constant 0 : index
    %49 = vector.load %arg5[%c97, %c0_24] : memref<128x128xf32, #tpu.memory_space<vmem>>, vector<4x128xf32>
    tpu.vector_store %arg5[%c97, %c0_24], %48 {strides = array<i32>} : memref<128x128xf32, #tpu.memory_space<vmem>>, vector<4x128xf32>,
    return
  }
}

module attributes {stable_mosaic.version = 11 : i64} {
  func.func @_trunk_kernel(%arg0: memref<128x128xf32, #tpu.memory_space<vmem>>, %arg1: memref<9x128x128xbf16, #tpu.memory_space<vmem>>, %arg2: memref<1x128xf32, #tpu.memory_space<vmem>>, %arg3: memref<1x128xf32, #tpu.memory_space<vmem>>, %arg4: memref<96x1xf32, #tpu.memory_space<vmem>>, %arg5: memref<1xf32, #tpu.memory_space<smem>>, %arg6: memref<128x128xf32, #tpu.memory_space<vmem>>, %arg7: memref<128x128xf32, #tpu.memory_space<vmem>>, %arg8: memref<128x128xf32, #tpu.memory_space<vmem>>, %arg9: memref<128x128xf32, #tpu.memory_space<vmem>>, %arg10: memref<128x128xbf16, #tpu.memory_space<vmem>>) attributes {dimension_semantics = [], scalar_prefetch = 0 : i64, scratch_operands = 4 : i64, tpu.core_type = #tpu.core_type<tc>} {
    %c0 = arith.constant 0 : index
    %c0_0 = arith.constant 0 : index
    %0 = vector.load %arg4[%c0, %c0_0] : memref<96x1xf32, #tpu.memory_space<vmem>>, vector<96x1xf32>
    %c0_1 = arith.constant 0 : index
    %c0_2 = arith.constant 0 : index
    %1 = vector.load %arg2[%c0_1, %c0_2] : memref<1x128xf32, #tpu.memory_space<vmem>>, vector<1x128xf32>
    %c0_3 = arith.constant 0 : index
    %c0_4 = arith.constant 0 : index
    %2 = vector.load %arg3[%c0_3, %c0_4] : memref<1x128xf32, #tpu.memory_space<vmem>>, vector<1x128xf32>
    %c0_5 = arith.constant 0 : index
    %3 = memref.load %arg5[%c0_5] : memref<1xf32, #tpu.memory_space<smem>>
    %c0_6 = arith.constant 0 : index
    %c0_7 = arith.constant 0 : index
    %4 = vector.load %arg0[%c0_6, %c0_7] : memref<128x128xf32, #tpu.memory_space<vmem>>, vector<128x128xf32>
    %c0_8 = arith.constant 0 : index
    %c0_9 = arith.constant 0 : index
    %5 = vector.load %arg7[%c0_8, %c0_9] : memref<128x128xf32, #tpu.memory_space<vmem>>, vector<128x128xf32>
    tpu.vector_store %arg7[%c0_8, %c0_9], %4 {strides = array<i32>} : memref<128x128xf32, #tpu.memory_space<vmem>>, vector<128x128xf32>,
    %cst = arith.constant 0.000000e+00 : f32
    %6 = vector.broadcast %cst : f32 to vector<128x128xf32>
    %c0_10 = arith.constant 0 : index
    %c0_11 = arith.constant 0 : index
    %7 = vector.load %arg8[%c0_10, %c0_11] : memref<128x128xf32, #tpu.memory_space<vmem>>, vector<128x128xf32>
    tpu.vector_store %arg8[%c0_10, %c0_11], %6 {strides = array<i32>} : memref<128x128xf32, #tpu.memory_space<vmem>>, vector<128x128xf32>,
    %cst_12 = arith.constant 3.200000e+01 : f32
    %c0_i32 = arith.constant 0 : i32
    %c15_i32 = arith.constant 15 : i32
    %8 = arith.addi %c0_i32, %c15_i32 : i32
    %c1_i32 = arith.constant 1 : i32
    scf.for %arg11 = %c0_i32 to %8 step %c1_i32  : i32 {
      %c3_i32 = arith.constant 3 : i32
      %11 = arith.remsi %arg11, %c3_i32 : i32
      %c0_i32_18 = arith.constant 0 : i32
      %12 = arith.cmpi eq, %11, %c0_i32_18 : i32
      %13 = arith.extui %12 : i1 to i32
      %c0_i32_19 = arith.constant 0 : i32
      %14 = arith.cmpi ne, %13, %c0_i32_19 : i32
      scf.if %14 {
        %c0_143 = arith.constant 0 : index
        %c0_144 = arith.constant 0 : index
        %181 = vector.load %arg7[%c0_143, %c0_144] : memref<128x128xf32, #tpu.memory_space<vmem>>, vector<128x128xf32>
        %c0_145 = arith.constant 0 : index
        %c0_146 = arith.constant 0 : index
        %182 = vector.load %arg9[%c0_145, %c0_146] : memref<128x128xf32, #tpu.memory_space<vmem>>, vector<128x128xf32>
        tpu.vector_store %arg9[%c0_145, %c0_146], %181 {strides = array<i32>} : memref<128x128xf32, #tpu.memory_space<vmem>>, vector<128x128xf32>,
      } else {
      }
      %c0_20 = arith.constant 0 : index
      %c0_21 = arith.constant 0 : index
      %15 = vector.load %arg7[%c0_20, %c0_21] : memref<128x128xf32, #tpu.memory_space<vmem>>, vector<128x128xf32>
      %16 = arith.truncf %15 : vector<128x128xf32> to vector<128x128xbf16>
      %c0_22 = arith.constant 0 : index
      %c0_23 = arith.constant 0 : index
      %17 = vector.load %arg10[%c0_22, %c0_23] : memref<128x128xbf16, #tpu.memory_space<vmem>>, vector<128x128xbf16>
      tpu.vector_store %arg10[%c0_22, %c0_23], %16 {strides = array<i32>} : memref<128x128xbf16, #tpu.memory_space<vmem>>, vector<128x128xbf16>,
      %c7 = arith.constant 7 : index
      %c0_24 = arith.constant 0 : index
      %18 = vector.load %arg10[%c7, %c0_24] : memref<128x128xbf16, #tpu.memory_space<vmem>>, vector<96x128xbf16>
      %c0_25 = arith.constant 0 : index
      %c0_26 = arith.constant 0 : index
      %c0_27 = arith.constant 0 : index
      %19 = vector.load %arg1[%c0_25, %c0_26, %c0_27] : memref<9x128x128xbf16, #tpu.memory_space<vmem>>, vector<1x128x128xbf16>
      %20 = vector.shape_cast %19 : vector<1x128x128xbf16> to vector<128x128xbf16>
      %cst_28 = arith.constant dense<0.000000e+00> : vector<96x128xf32>
      %21 = tpu.matmul %18, %20, %cst_28 {dimension_numbers = #tpu.dot_dimension_numbers<[1], [0], [0], [1], [0, 0, 1, 1], [], []>} : vector<96x128xbf16>, vector<128x128xbf16>, vector<96x128xf32> -> vector<96x128xf32>
      %c8 = arith.constant 8 : index
      %c0_29 = arith.constant 0 : index
      %22 = vector.load %arg10[%c8, %c0_29] : memref<128x128xbf16, #tpu.memory_space<vmem>>, vector<96x128xbf16>
      %c1 = arith.constant 1 : index
      %c0_30 = arith.constant 0 : index
      %c0_31 = arith.constant 0 : index
      %23 = vector.load %arg1[%c1, %c0_30, %c0_31] : memref<9x128x128xbf16, #tpu.memory_space<vmem>>, vector<1x128x128xbf16>
      %24 = vector.shape_cast %23 : vector<1x128x128xbf16> to vector<128x128xbf16>
      %cst_32 = arith.constant dense<0.000000e+00> : vector<96x128xf32>
      %25 = tpu.matmul %22, %24, %cst_32 {dimension_numbers = #tpu.dot_dimension_numbers<[1], [0], [0], [1], [0, 0, 1, 1], [], []>} : vector<96x128xbf16>, vector<128x128xbf16>, vector<96x128xf32> -> vector<96x128xf32>
      %26 = arith.addf %21, %25 : vector<96x128xf32>
      %c9 = arith.constant 9 : index
      %c0_33 = arith.constant 0 : index
      %27 = vector.load %arg10[%c9, %c0_33] : memref<128x128xbf16, #tpu.memory_space<vmem>>, vector<96x128xbf16>
      %c2 = arith.constant 2 : index
      %c0_34 = arith.constant 0 : index
      %c0_35 = arith.constant 0 : index
      %28 = vector.load %arg1[%c2, %c0_34, %c0_35] : memref<9x128x128xbf16, #tpu.memory_space<vmem>>, vector<1x128x128xbf16>
      %29 = vector.shape_cast %28 : vector<1x128x128xbf16> to vector<128x128xbf16>
      %cst_36 = arith.constant dense<0.000000e+00> : vector<96x128xf32>
      %30 = tpu.matmul %27, %29, %cst_36 {dimension_numbers = #tpu.dot_dimension_numbers<[1], [0], [0], [1], [0, 0, 1, 1], [], []>} : vector<96x128xbf16>, vector<128x128xbf16>, vector<96x128xf32> -> vector<96x128xf32>
      %31 = arith.addf %26, %30 : vector<96x128xf32>
      %c15 = arith.constant 15 : index
      %c0_37 = arith.constant 0 : index
      %32 = vector.load %arg10[%c15, %c0_37] : memref<128x128xbf16, #tpu.memory_space<vmem>>, vector<96x128xbf16>
      %c3 = arith.constant 3 : index
      %c0_38 = arith.constant 0 : index
      %c0_39 = arith.constant 0 : index
      %33 = vector.load %arg1[%c3, %c0_38, %c0_39] : memref<9x128x128xbf16, #tpu.memory_space<vmem>>, vector<1x128x128xbf16>
      %34 = vector.shape_cast %33 : vector<1x128x128xbf16> to vector<128x128xbf16>
      %cst_40 = arith.constant dense<0.000000e+00> : vector<96x128xf32>
      %35 = tpu.matmul %32, %34, %cst_40 {dimension_numbers = #tpu.dot_dimension_numbers<[1], [0], [0], [1], [0, 0, 1, 1], [], []>} : vector<96x128xbf16>, vector<128x128xbf16>, vector<96x128xf32> -> vector<96x128xf32>
      %36 = arith.addf %31, %35 : vector<96x128xf32>
      %c16 = arith.constant 16 : index
      %c0_41 = arith.constant 0 : index
      %37 = vector.load %arg10[%c16, %c0_41] : memref<128x128xbf16, #tpu.memory_space<vmem>>, vector<96x128xbf16>
      %c4 = arith.constant 4 : index
      %c0_42 = arith.constant 0 : index
      %c0_43 = arith.constant 0 : index
      %38 = vector.load %arg1[%c4, %c0_42, %c0_43] : memref<9x128x128xbf16, #tpu.memory_space<vmem>>, vector<1x128x128xbf16>
      %39 = vector.shape_cast %38 : vector<1x128x128xbf16> to vector<128x128xbf16>
      %cst_44 = arith.constant dense<0.000000e+00> : vector<96x128xf32>
      %40 = tpu.matmul %37, %39, %cst_44 {dimension_numbers = #tpu.dot_dimension_numbers<[1], [0], [0], [1], [0, 0, 1, 1], [], []>} : vector<96x128xbf16>, vector<128x128xbf16>, vector<96x128xf32> -> vector<96x128xf32>
      %41 = arith.addf %36, %40 : vector<96x128xf32>
      %c17 = arith.constant 17 : index
      %c0_45 = arith.constant 0 : index
      %42 = vector.load %arg10[%c17, %c0_45] : memref<128x128xbf16, #tpu.memory_space<vmem>>, vector<96x128xbf16>
      %c5 = arith.constant 5 : index
      %c0_46 = arith.constant 0 : index
      %c0_47 = arith.constant 0 : index
      %43 = vector.load %arg1[%c5, %c0_46, %c0_47] : memref<9x128x128xbf16, #tpu.memory_space<vmem>>, vector<1x128x128xbf16>
      %44 = vector.shape_cast %43 : vector<1x128x128xbf16> to vector<128x128xbf16>
      %cst_48 = arith.constant dense<0.000000e+00> : vector<96x128xf32>
      %45 = tpu.matmul %42, %44, %cst_48 {dimension_numbers = #tpu.dot_dimension_numbers<[1], [0], [0], [1], [0, 0, 1, 1], [], []>} : vector<96x128xbf16>, vector<128x128xbf16>, vector<96x128xf32> -> vector<96x128xf32>
      %46 = arith.addf %41, %45 : vector<96x128xf32>
      %c23 = arith.constant 23 : index
      %c0_49 = arith.constant 0 : index
      %47 = vector.load %arg10[%c23, %c0_49] : memref<128x128xbf16, #tpu.memory_space<vmem>>, vector<96x128xbf16>
      %c6 = arith.constant 6 : index
      %c0_50 = arith.constant 0 : index
      %c0_51 = arith.constant 0 : index
      %48 = vector.load %arg1[%c6, %c0_50, %c0_51] : memref<9x128x128xbf16, #tpu.memory_space<vmem>>, vector<1x128x128xbf16>
      %49 = vector.shape_cast %48 : vector<1x128x128xbf16> to vector<128x128xbf16>
      %cst_52 = arith.constant dense<0.000000e+00> : vector<96x128xf32>
      %50 = tpu.matmul %47, %49, %cst_52 {dimension_numbers = #tpu.dot_dimension_numbers<[1], [0], [0], [1], [0, 0, 1, 1], [], []>} : vector<96x128xbf16>, vector<128x128xbf16>, vector<96x128xf32> -> vector<96x128xf32>
      %51 = arith.addf %46, %50 : vector<96x128xf32>
      %c24 = arith.constant 24 : index
      %c0_53 = arith.constant 0 : index
      %52 = vector.load %arg10[%c24, %c0_53] : memref<128x128xbf16, #tpu.memory_space<vmem>>, vector<96x128xbf16>
      %c7_54 = arith.constant 7 : index
      %c0_55 = arith.constant 0 : index
      %c0_56 = arith.constant 0 : index
      %53 = vector.load %arg1[%c7_54, %c0_55, %c0_56] : memref<9x128x128xbf16, #tpu.memory_space<vmem>>, vector<1x128x128xbf16>
      %54 = vector.shape_cast %53 : vector<1x128x128xbf16> to vector<128x128xbf16>
      %cst_57 = arith.constant dense<0.000000e+00> : vector<96x128xf32>
      %55 = tpu.matmul %52, %54, %cst_57 {dimension_numbers = #tpu.dot_dimension_numbers<[1], [0], [0], [1], [0, 0, 1, 1], [], []>} : vector<96x128xbf16>, vector<128x128xbf16>, vector<96x128xf32> -> vector<96x128xf32>
      %56 = arith.addf %51, %55 : vector<96x128xf32>
      %c25 = arith.constant 25 : index
      %c0_58 = arith.constant 0 : index
      %57 = vector.load %arg10[%c25, %c0_58] : memref<128x128xbf16, #tpu.memory_space<vmem>>, vector<96x128xbf16>
      %c8_59 = arith.constant 8 : index
      %c0_60 = arith.constant 0 : index
      %c0_61 = arith.constant 0 : index
      %58 = vector.load %arg1[%c8_59, %c0_60, %c0_61] : memref<9x128x128xbf16, #tpu.memory_space<vmem>>, vector<1x128x128xbf16>
      %59 = vector.shape_cast %58 : vector<1x128x128xbf16> to vector<128x128xbf16>
      %cst_62 = arith.constant dense<0.000000e+00> : vector<96x128xf32>
      %60 = tpu.matmul %57, %59, %cst_62 {dimension_numbers = #tpu.dot_dimension_numbers<[1], [0], [0], [1], [0, 0, 1, 1], [], []>} : vector<96x128xbf16>, vector<128x128xbf16>, vector<96x128xf32> -> vector<96x128xf32>
      %61 = arith.addf %56, %60 : vector<96x128xf32>
      %62 = vector.broadcast %0 : vector<96x1xf32> to vector<96x128xf32>
      %63 = arith.mulf %61, %62 : vector<96x128xf32>
      %cst_63 = arith.constant dense<0.000000e+00> : vector<128xf32>
      %64 = vector.multi_reduction <add>, %63, %cst_63 [0] : vector<96x128xf32> to vector<128xf32>
      %65 = vector.shape_cast %64 : vector<128xf32> to vector<1x128xf32>
      %66 = arith.mulf %63, %61 : vector<96x128xf32>
      %cst_64 = arith.constant dense<0.000000e+00> : vector<128xf32>
      %67 = vector.multi_reduction <add>, %66, %cst_64 [0] : vector<96x128xf32> to vector<128xf32>
      %68 = vector.shape_cast %67 : vector<128xf32> to vector<1x128xf32>
      %69 = vector.broadcast %cst_12 : f32 to vector<1x128xf32>
      %70 = arith.divf %65, %69 : vector<1x128xf32>
      %71 = vector.broadcast %cst_12 : f32 to vector<1x128xf32>
      %72 = arith.divf %68, %71 : vector<1x128xf32>
      %73 = arith.mulf %70, %70 : vector<1x128xf32>
      %74 = arith.subf %72, %73 : vector<1x128xf32>
      %cst_65 = arith.constant 9.99999974E-6 : f32
      %75 = vector.broadcast %cst_65 : f32 to vector<1x128xf32>
      %76 = arith.addf %74, %75 : vector<1x128xf32>
      %77 = math.rsqrt %76 : vector<1x128xf32>
      %78 = arith.mulf %1, %77 : vector<1x128xf32>
      %79 = arith.mulf %70, %78 : vector<1x128xf32>
      %80 = arith.subf %2, %79 : vector<1x128xf32>
      %81 = vector.broadcast %78 : vector<1x128xf32> to vector<96x128xf32>
      %82 = arith.mulf %61, %81 : vector<96x128xf32>
      %83 = vector.broadcast %80 : vector<1x128xf32> to vector<96x128xf32>
      %84 = arith.addf %82, %83 : vector<96x128xf32>
      %cst_66 = arith.constant 0.000000e+00 : f32
      %85 = vector.broadcast %cst_66 : f32 to vector<96x128xf32>
      %86 = arith.cmpf ogt, %84, %85 : vector<96x128xf32>
      %87 = vector.broadcast %3 : f32 to vector<96x128xf32>
      %88 = arith.mulf %87, %84 : vector<96x128xf32>
      %89 = arith.select %86, %84, %88 : vector<96x128xi1>, vector<96x128xf32>
      %90 = vector.broadcast %0 : vector<96x1xf32> to vector<96x128xf32>
      %91 = arith.mulf %89, %90 : vector<96x128xf32>
      %c16_67 = arith.constant 16 : index
      %c0_68 = arith.constant 0 : index
      %92 = vector.load %arg8[%c16_67, %c0_68] : memref<128x128xf32, #tpu.memory_space<vmem>>, vector<96x128xf32>
      tpu.vector_store %arg8[%c16_67, %c0_68], %91 {strides = array<i32>} : memref<128x128xf32, #tpu.memory_space<vmem>>, vector<96x128xf32>,
      %c0_69 = arith.constant 0 : index
      %c0_70 = arith.constant 0 : index
      %93 = vector.load %arg8[%c0_69, %c0_70] : memref<128x128xf32, #tpu.memory_space<vmem>>, vector<128x128xf32>
      %94 = arith.truncf %93 : vector<128x128xf32> to vector<128x128xbf16>
      %c0_71 = arith.constant 0 : index
      %c0_72 = arith.constant 0 : index
      %95 = vector.load %arg10[%c0_71, %c0_72] : memref<128x128xbf16, #tpu.memory_space<vmem>>, vector<128x128xbf16>
      tpu.vector_store %arg10[%c0_71, %c0_72], %94 {strides = array<i32>} : memref<128x128xbf16, #tpu.memory_space<vmem>>, vector<128x128xbf16>,
      %c7_73 = arith.constant 7 : index
      %c0_74 = arith.constant 0 : index
      %96 = vector.load %arg10[%c7_73, %c0_74] : memref<128x128xbf16, #tpu.memory_space<vmem>>, vector<96x128xbf16>
      %c0_75 = arith.constant 0 : index
      %c0_76 = arith.constant 0 : index
      %c0_77 = arith.constant 0 : index
      %97 = vector.load %arg1[%c0_75, %c0_76, %c0_77] : memref<9x128x128xbf16, #tpu.memory_space<vmem>>, vector<1x128x128xbf16>
      %98 = vector.shape_cast %97 : vector<1x128x128xbf16> to vector<128x128xbf16>
      %cst_78 = arith.constant dense<0.000000e+00> : vector<96x128xf32>
      %99 = tpu.matmul %96, %98, %cst_78 {dimension_numbers = #tpu.dot_dimension_numbers<[1], [0], [0], [1], [0, 0, 1, 1], [], []>} : vector<96x128xbf16>, vector<128x128xbf16>, vector<96x128xf32> -> vector<96x128xf32>
      %c8_79 = arith.constant 8 : index
      %c0_80 = arith.constant 0 : index
      %100 = vector.load %arg10[%c8_79, %c0_80] : memref<128x128xbf16, #tpu.memory_space<vmem>>, vector<96x128xbf16>
      %c1_81 = arith.constant 1 : index
      %c0_82 = arith.constant 0 : index
      %c0_83 = arith.constant 0 : index
      %101 = vector.load %arg1[%c1_81, %c0_82, %c0_83] : memref<9x128x128xbf16, #tpu.memory_space<vmem>>, vector<1x128x128xbf16>
      %102 = vector.shape_cast %101 : vector<1x128x128xbf16> to vector<128x128xbf16>
      %cst_84 = arith.constant dense<0.000000e+00> : vector<96x128xf32>
      %103 = tpu.matmul %100, %102, %cst_84 {dimension_numbers = #tpu.dot_dimension_numbers<[1], [0], [0], [1], [0, 0, 1, 1], [], []>} : vector<96x128xbf16>, vector<128x128xbf16>, vector<96x128xf32> -> vector<96x128xf32>
      %104 = arith.addf %99, %103 : vector<96x128xf32>
      %c9_85 = arith.constant 9 : index
      %c0_86 = arith.constant 0 : index
      %105 = vector.load %arg10[%c9_85, %c0_86] : memref<128x128xbf16, #tpu.memory_space<vmem>>, vector<96x128xbf16>
      %c2_87 = arith.constant 2 : index
      %c0_88 = arith.constant 0 : index
      %c0_89 = arith.constant 0 : index
      %106 = vector.load %arg1[%c2_87, %c0_88, %c0_89] : memref<9x128x128xbf16, #tpu.memory_space<vmem>>, vector<1x128x128xbf16>
      %107 = vector.shape_cast %106 : vector<1x128x128xbf16> to vector<128x128xbf16>
      %cst_90 = arith.constant dense<0.000000e+00> : vector<96x128xf32>
      %108 = tpu.matmul %105, %107, %cst_90 {dimension_numbers = #tpu.dot_dimension_numbers<[1], [0], [0], [1], [0, 0, 1, 1], [], []>} : vector<96x128xbf16>, vector<128x128xbf16>, vector<96x128xf32> -> vector<96x128xf32>
      %109 = arith.addf %104, %108 : vector<96x128xf32>
      %c15_91 = arith.constant 15 : index
      %c0_92 = arith.constant 0 : index
      %110 = vector.load %arg10[%c15_91, %c0_92] : memref<128x128xbf16, #tpu.memory_space<vmem>>, vector<96x128xbf16>
      %c3_93 = arith.constant 3 : index
      %c0_94 = arith.constant 0 : index
      %c0_95 = arith.constant 0 : index
      %111 = vector.load %arg1[%c3_93, %c0_94, %c0_95] : memref<9x128x128xbf16, #tpu.memory_space<vmem>>, vector<1x128x128xbf16>
      %112 = vector.shape_cast %111 : vector<1x128x128xbf16> to vector<128x128xbf16>
      %cst_96 = arith.constant dense<0.000000e+00> : vector<96x128xf32>
      %113 = tpu.matmul %110, %112, %cst_96 {dimension_numbers = #tpu.dot_dimension_numbers<[1], [0], [0], [1], [0, 0, 1, 1], [], []>} : vector<96x128xbf16>, vector<128x128xbf16>, vector<96x128xf32> -> vector<96x128xf32>
      %114 = arith.addf %109, %113 : vector<96x128xf32>
      %c16_97 = arith.constant 16 : index
      %c0_98 = arith.constant 0 : index
      %115 = vector.load %arg10[%c16_97, %c0_98] : memref<128x128xbf16, #tpu.memory_space<vmem>>, vector<96x128xbf16>
      %c4_99 = arith.constant 4 : index
      %c0_100 = arith.constant 0 : index
      %c0_101 = arith.constant 0 : index
      %116 = vector.load %arg1[%c4_99, %c0_100, %c0_101] : memref<9x128x128xbf16, #tpu.memory_space<vmem>>, vector<1x128x128xbf16>
      %117 = vector.shape_cast %116 : vector<1x128x128xbf16> to vector<128x128xbf16>
      %cst_102 = arith.constant dense<0.000000e+00> : vector<96x128xf32>
      %118 = tpu.matmul %115, %117, %cst_102 {dimension_numbers = #tpu.dot_dimension_numbers<[1], [0], [0], [1], [0, 0, 1, 1], [], []>} : vector<96x128xbf16>, vector<128x128xbf16>, vector<96x128xf32> -> vector<96x128xf32>
      %119 = arith.addf %114, %118 : vector<96x128xf32>
      %c17_103 = arith.constant 17 : index
      %c0_104 = arith.constant 0 : index
      %120 = vector.load %arg10[%c17_103, %c0_104] : memref<128x128xbf16, #tpu.memory_space<vmem>>, vector<96x128xbf16>
      %c5_105 = arith.constant 5 : index
      %c0_106 = arith.constant 0 : index
      %c0_107 = arith.constant 0 : index
      %121 = vector.load %arg1[%c5_105, %c0_106, %c0_107] : memref<9x128x128xbf16, #tpu.memory_space<vmem>>, vector<1x128x128xbf16>
      %122 = vector.shape_cast %121 : vector<1x128x128xbf16> to vector<128x128xbf16>
      %cst_108 = arith.constant dense<0.000000e+00> : vector<96x128xf32>
      %123 = tpu.matmul %120, %122, %cst_108 {dimension_numbers = #tpu.dot_dimension_numbers<[1], [0], [0], [1], [0, 0, 1, 1], [], []>} : vector<96x128xbf16>, vector<128x128xbf16>, vector<96x128xf32> -> vector<96x128xf32>
      %124 = arith.addf %119, %123 : vector<96x128xf32>
      %c23_109 = arith.constant 23 : index
      %c0_110 = arith.constant 0 : index
      %125 = vector.load %arg10[%c23_109, %c0_110] : memref<128x128xbf16, #tpu.memory_space<vmem>>, vector<96x128xbf16>
      %c6_111 = arith.constant 6 : index
      %c0_112 = arith.constant 0 : index
      %c0_113 = arith.constant 0 : index
      %126 = vector.load %arg1[%c6_111, %c0_112, %c0_113] : memref<9x128x128xbf16, #tpu.memory_space<vmem>>, vector<1x128x128xbf16>
      %127 = vector.shape_cast %126 : vector<1x128x128xbf16> to vector<128x128xbf16>
      %cst_114 = arith.constant dense<0.000000e+00> : vector<96x128xf32>
      %128 = tpu.matmul %125, %127, %cst_114 {dimension_numbers = #tpu.dot_dimension_numbers<[1], [0], [0], [1], [0, 0, 1, 1], [], []>} : vector<96x128xbf16>, vector<128x128xbf16>, vector<96x128xf32> -> vector<96x128xf32>
      %129 = arith.addf %124, %128 : vector<96x128xf32>
      %c24_115 = arith.constant 24 : index
      %c0_116 = arith.constant 0 : index
      %130 = vector.load %arg10[%c24_115, %c0_116] : memref<128x128xbf16, #tpu.memory_space<vmem>>, vector<96x128xbf16>
      %c7_117 = arith.constant 7 : index
      %c0_118 = arith.constant 0 : index
      %c0_119 = arith.constant 0 : index
      %131 = vector.load %arg1[%c7_117, %c0_118, %c0_119] : memref<9x128x128xbf16, #tpu.memory_space<vmem>>, vector<1x128x128xbf16>
      %132 = vector.shape_cast %131 : vector<1x128x128xbf16> to vector<128x128xbf16>
      %cst_120 = arith.constant dense<0.000000e+00> : vector<96x128xf32>
      %133 = tpu.matmul %130, %132, %cst_120 {dimension_numbers = #tpu.dot_dimension_numbers<[1], [0], [0], [1], [0, 0, 1, 1], [], []>} : vector<96x128xbf16>, vector<128x128xbf16>, vector<96x128xf32> -> vector<96x128xf32>
      %134 = arith.addf %129, %133 : vector<96x128xf32>
      %c25_121 = arith.constant 25 : index
      %c0_122 = arith.constant 0 : index
      %135 = vector.load %arg10[%c25_121, %c0_122] : memref<128x128xbf16, #tpu.memory_space<vmem>>, vector<96x128xbf16>
      %c8_123 = arith.constant 8 : index
      %c0_124 = arith.constant 0 : index
      %c0_125 = arith.constant 0 : index
      %136 = vector.load %arg1[%c8_123, %c0_124, %c0_125] : memref<9x128x128xbf16, #tpu.memory_space<vmem>>, vector<1x128x128xbf16>
      %137 = vector.shape_cast %136 : vector<1x128x128xbf16> to vector<128x128xbf16>
      %cst_126 = arith.constant dense<0.000000e+00> : vector<96x128xf32>
      %138 = tpu.matmul %135, %137, %cst_126 {dimension_numbers = #tpu.dot_dimension_numbers<[1], [0], [0], [1], [0, 0, 1, 1], [], []>} : vector<96x128xbf16>, vector<128x128xbf16>, vector<96x128xf32> -> vector<96x128xf32>
      %139 = arith.addf %134, %138 : vector<96x128xf32>
      %140 = vector.broadcast %0 : vector<96x1xf32> to vector<96x128xf32>
      %141 = arith.mulf %139, %140 : vector<96x128xf32>
      %cst_127 = arith.constant dense<0.000000e+00> : vector<128xf32>
      %142 = vector.multi_reduction <add>, %141, %cst_127 [0] : vector<96x128xf32> to vector<128xf32>
      %143 = vector.shape_cast %142 : vector<128xf32> to vector<1x128xf32>
      %144 = arith.mulf %141, %139 : vector<96x128xf32>
      %cst_128 = arith.constant dense<0.000000e+00> : vector<128xf32>
      %145 = vector.multi_reduction <add>, %144, %cst_128 [0] : vector<96x128xf32> to vector<128xf32>
      %146 = vector.shape_cast %145 : vector<128xf32> to vector<1x128xf32>
      %147 = vector.broadcast %cst_12 : f32 to vector<1x128xf32>
      %148 = arith.divf %143, %147 : vector<1x128xf32>
      %149 = vector.broadcast %cst_12 : f32 to vector<1x128xf32>
      %150 = arith.divf %146, %149 : vector<1x128xf32>
      %151 = arith.mulf %148, %148 : vector<1x128xf32>
      %152 = arith.subf %150, %151 : vector<1x128xf32>
      %cst_129 = arith.constant 9.99999974E-6 : f32
      %153 = vector.broadcast %cst_129 : f32 to vector<1x128xf32>
      %154 = arith.addf %152, %153 : vector<1x128xf32>
      %155 = math.rsqrt %154 : vector<1x128xf32>
      %156 = arith.mulf %1, %155 : vector<1x128xf32>
      %157 = arith.mulf %148, %156 : vector<1x128xf32>
      %158 = arith.subf %2, %157 : vector<1x128xf32>
      %159 = vector.broadcast %156 : vector<1x128xf32> to vector<96x128xf32>
      %160 = arith.mulf %139, %159 : vector<96x128xf32>
      %161 = vector.broadcast %158 : vector<1x128xf32> to vector<96x128xf32>
      %162 = arith.addf %160, %161 : vector<96x128xf32>
      %c3_i32_130 = arith.constant 3 : i32
      %163 = arith.remsi %arg11, %c3_i32_130 : i32
      %c2_i32 = arith.constant 2 : i32
      %164 = arith.cmpi eq, %163, %c2_i32 : i32
      %cst_131 = arith.constant 1.000000e+00 : f32
      %cst_132 = arith.constant 0.000000e+00 : f32
      %165 = arith.select %164, %cst_131, %cst_132 : f32
      %c14_i32 = arith.constant 14 : i32
      %166 = arith.cmpi eq, %arg11, %c14_i32 : i32
      %cst_133 = arith.constant 1.000000e+00 : f32
      %cst_134 = arith.constant 0.000000e+00 : f32
      %167 = arith.select %166, %cst_133, %cst_134 : f32
      %c16_135 = arith.constant 16 : index
      %c0_136 = arith.constant 0 : index
      %168 = vector.load %arg7[%c16_135, %c0_136] : memref<128x128xf32, #tpu.memory_space<vmem>>, vector<96x128xf32>
      %169 = arith.addf %162, %168 : vector<96x128xf32>
      %c16_137 = arith.constant 16 : index
      %c0_138 = arith.constant 0 : index
      %170 = vector.load %arg9[%c16_137, %c0_138] : memref<128x128xf32, #tpu.memory_space<vmem>>, vector<96x128xf32>
      %171 = vector.broadcast %165 : f32 to vector<96x128xf32>
      %172 = arith.mulf %171, %170 : vector<96x128xf32>
      %173 = arith.addf %169, %172 : vector<96x128xf32>
      %c16_139 = arith.constant 16 : index
      %c0_140 = arith.constant 0 : index
      %174 = vector.load %arg0[%c16_139, %c0_140] : memref<128x128xf32, #tpu.memory_space<vmem>>, vector<96x128xf32>
      %175 = vector.broadcast %167 : f32 to vector<96x128xf32>
      %176 = arith.mulf %175, %174 : vector<96x128xf32>
      %177 = arith.addf %173, %176 : vector<96x128xf32>
      %178 = vector.broadcast %0 : vector<96x1xf32> to vector<96x128xf32>
      %179 = arith.mulf %177, %178 : vector<96x128xf32>
      %c16_141 = arith.constant 16 : index
      %c0_142 = arith.constant 0 : index
      %180 = vector.load %arg7[%c16_141, %c0_142] : memref<128x128xf32, #tpu.memory_space<vmem>>, vector<96x128xf32>
      tpu.vector_store %arg7[%c16_141, %c0_142], %179 {strides = array<i32>} : memref<128x128xf32, #tpu.memory_space<vmem>>, vector<96x128xf32>,
    }
    %c15_i32_13 = arith.constant 15 : i32
    %c0_14 = arith.constant 0 : index
    %c0_15 = arith.constant 0 : index
    %9 = vector.load %arg7[%c0_14, %c0_15] : memref<128x128xf32, #tpu.memory_space<vmem>>, vector<128x128xf32>
    %c0_16 = arith.constant 0 : index
    %c0_17 = arith.constant 0 : index
    %10 = vector.load %arg6[%c0_16, %c0_17] : memref<128x128xf32, #tpu.memory_space<vmem>>, vector<128x128xf32>
    tpu.vector_store %arg6[%c0_16, %c0_17], %9 {strides = array<i32>} : memref<128x128xf32, #tpu.memory_space<vmem>>, vector<128x128xf32>,
    return
  }
}

module attributes {stable_mosaic.version = 11 : i64} {
  func.func @_conv_stage_kernel(%arg0: memref<8x3200xbf16, #tpu.memory_space<vmem>>, %arg1: memref<3200x128xbf16, #tpu.memory_space<vmem>>, %arg2: memref<1x128xf32, #tpu.memory_space<vmem>>, %arg3: memref<1x128xf32, #tpu.memory_space<vmem>>, %arg4: memref<1xf32, #tpu.memory_space<smem>>, %arg5: memref<8x128xf32, #tpu.memory_space<vmem>>) attributes {dimension_semantics = [], scalar_prefetch = 0 : i64, scratch_operands = 0 : i64, tpu.core_type = #tpu.core_type<tc>} {
    %c0 = arith.constant 0 : index
    %c0_0 = arith.constant 0 : index
    %0 = vector.load %arg0[%c0, %c0_0] : memref<8x3200xbf16, #tpu.memory_space<vmem>>, vector<8x3200xbf16>
    %c0_1 = arith.constant 0 : index
    %c0_2 = arith.constant 0 : index
    %1 = vector.load %arg1[%c0_1, %c0_2] : memref<3200x128xbf16, #tpu.memory_space<vmem>>, vector<3200x128xbf16>
    %cst = arith.constant dense<0.000000e+00> : vector<8x128xf32>
    %2 = tpu.matmul %0, %1, %cst {dimension_numbers = #tpu.dot_dimension_numbers<[1], [0], [0], [1], [0, 0, 1, 1], [], []>} : vector<8x3200xbf16>, vector<3200x128xbf16>, vector<8x128xf32> -> vector<8x128xf32>
    %cst_3 = arith.constant dense<0.000000e+00> : vector<128xf32>
    %3 = vector.multi_reduction <add>, %2, %cst_3 [0] : vector<8x128xf32> to vector<128xf32>
    %4 = vector.shape_cast %3 : vector<128xf32> to vector<1x128xf32>
    %5 = arith.mulf %2, %2 : vector<8x128xf32>
    %cst_4 = arith.constant dense<0.000000e+00> : vector<128xf32>
    %6 = vector.multi_reduction <add>, %5, %cst_4 [0] : vector<8x128xf32> to vector<128xf32>
    %7 = vector.shape_cast %6 : vector<128xf32> to vector<1x128xf32>
    %cst_5 = arith.constant 8.000000e+00 : f32
    %8 = vector.broadcast %cst_5 : f32 to vector<1x128xf32>
    %9 = arith.divf %4, %8 : vector<1x128xf32>
    %cst_6 = arith.constant 8.000000e+00 : f32
    %10 = vector.broadcast %cst_6 : f32 to vector<1x128xf32>
    %11 = arith.divf %7, %10 : vector<1x128xf32>
    %12 = arith.mulf %9, %9 : vector<1x128xf32>
    %13 = arith.subf %11, %12 : vector<1x128xf32>
    %c0_7 = arith.constant 0 : index
    %c0_8 = arith.constant 0 : index
    %14 = vector.load %arg2[%c0_7, %c0_8] : memref<1x128xf32, #tpu.memory_space<vmem>>, vector<1x128xf32>
    %cst_9 = arith.constant 9.99999974E-6 : f32
    %15 = vector.broadcast %cst_9 : f32 to vector<1x128xf32>
    %16 = arith.addf %13, %15 : vector<1x128xf32>
    %17 = math.rsqrt %16 : vector<1x128xf32>
    %18 = arith.mulf %14, %17 : vector<1x128xf32>
    %c0_10 = arith.constant 0 : index
    %c0_11 = arith.constant 0 : index
    %19 = vector.load %arg3[%c0_10, %c0_11] : memref<1x128xf32, #tpu.memory_space<vmem>>, vector<1x128xf32>
    %20 = arith.mulf %9, %18 : vector<1x128xf32>
    %21 = arith.subf %19, %20 : vector<1x128xf32>
    %22 = vector.broadcast %18 : vector<1x128xf32> to vector<8x128xf32>
    %23 = arith.mulf %2, %22 : vector<8x128xf32>
    %24 = vector.broadcast %21 : vector<1x128xf32> to vector<8x128xf32>
    %25 = arith.addf %23, %24 : vector<8x128xf32>
    %c0_12 = arith.constant 0 : index
    %c0_13 = arith.constant 0 : index
    %26 = vector.load %arg5[%c0_12, %c0_13] : memref<8x128xf32, #tpu.memory_space<vmem>>, vector<8x128xf32>
    tpu.vector_store %arg5[%c0_12, %c0_13], %25 {strides = array<i32>} : memref<8x128xf32, #tpu.memory_space<vmem>>, vector<8x128xf32>,
    return
  }
}

</mosaic_0001>

<bundles_post_ra>
// kernel: encoder_forward.4
= control target key start
LH: loop header
LB: loop body
LE: loop exit
PB: predicated region body
PF: predicated region fallthrough
CT: control target
= control target key end

     0   :  { %s776_s1 = inlined_call_operand.vmem [shape: bf16[128,128], index: 1, kind: input, shape index: {}]   ;;  %s777_s0 = inlined_call_operand.vmem [shape: bf16[128,128], index: 0, kind: input, shape index: {}]   ;;  %s778_s2 = inlined_call_operand.vmem [shape: f32[1,128], index: 2, kind: input, shape index: {}]   ;;  %s779_s3 = inlined_call_operand.vmem [shape: f32[1,128], index: 3, kind: input, shape index: {}]   ;;  %s780_s4 = inlined_call_operand.<no memory space> [shape: f32[1], index: 4, kind: input, shape index: {}]   ;;  %s781_s5 = inlined_call_operand.vmem [shape: f32[128,128], index: 5, kind: output, shape index: {}]  }
   0x1   :  { %v511_v0 = vld [vmem:[%s776_s1] sm:$0xff]   ;;  %v512_v1 = vld [vmem:[%s776_s1 + $0x8] sm:$0xff]   ;;  %v513_v2 = vld [vmem:[%s776_s1 + $0x10] sm:$0xff]  }
   0x2   :  { %463 = vmatprep.subr.bf16.mxu0 %v511_v0  ;;  %495 = vmatprep.subr.bf16.mxu1 %v511_v0  ;;  %v514_v3 = vld [vmem:[%s776_s1 + $0x18] sm:$0xff]   ;;  %v519_v4 = vld [vmem:[%s777_s0] sm:$0xff]   ;;  %v516_v7 = vld [vmem:[%s776_s1 + $0x28] sm:$0xff]  }
   0x3   :  { %464 = vmatpush3.bf16.msra.mxu0 %v511_v0  ;;  %503 = vmatpush3.bf16.msra.mxu1 %v511_v0  ;;  %v515_v5 = vld [vmem:[%s776_s1 + $0x20] sm:$0xff]   ;;  %v517_v8 = vld [vmem:[%s776_s1 + $0x30] sm:$0xff]   ;;  %v518_v9 = vld [vmem:[%s776_s1 + $0x38] sm:$0xff]  }
   0x4   :  { %465 = vmatprep.subr.bf16.mxu0 %v512_v1  ;;  %496 = vmatprep.subr.bf16.mxu1 %v512_v1  ;;  %v523_v6 = vld [vmem:[%s777_s0 + $0x20] sm:$0xff]   ;;  %v520_v10 = vld [vmem:[%s777_s0 + $0x8] sm:$0xff]   ;;  %v521_v12 = vld [vmem:[%s777_s0 + $0x10] sm:$0xff]  }
   0x5   :  { %479 = vmatprep.mubr.bf16.mxu0 %v519_v4  ;;  %487 = vmatprep.mubr.bf16.mxu1 %v523_v6  ;;  %v524_v11 = vld [vmem:[%s777_s0 + $0x28] sm:$0xff]   ;;  %v525_v13 = vld [vmem:[%s777_s0 + $0x30] sm:$0xff]   ;;  %v522_v14 = vld [vmem:[%s777_s0 + $0x18] sm:$0xff]  }
   0x6   :  { %v526_v15 = vld [vmem:[%s777_s0 + $0x38] sm:$0xff]  }
   0x7   :  { %466 = vmatpush3.bf16.msra.mxu0 %v512_v1  ;;  %504 = vmatpush3.bf16.msra.mxu1 %v512_v1 }
   0x8   :  { %467 = vmatprep.subr.bf16.mxu0 %v513_v2  ;;  %497 = vmatprep.subr.bf16.mxu1 %v513_v2 }
   0xb   :  { %468 = vmatpush3.bf16.msra.mxu0 %v513_v2  ;;  %505 = vmatpush3.bf16.msra.mxu1 %v513_v2 }
   0xc   :  { %469 = vmatprep.subr.bf16.mxu0 %v514_v3  ;;  %498 = vmatprep.subr.bf16.mxu1 %v514_v3 }
   0xf   :  { %470 = vmatpush3.bf16.msra.mxu0 %v514_v3  ;;  %506 = vmatpush3.bf16.msra.mxu1 %v514_v3 }
  0x10   :  { %471 = vmatprep.subr.bf16.mxu0 %v515_v5  ;;  %499 = vmatprep.subr.bf16.mxu1 %v515_v5 }
  0x13   :  { %472 = vmatpush3.bf16.msra.mxu0 %v515_v5  ;;  %507 = vmatpush3.bf16.msra.mxu1 %v515_v5 }
  0x14   :  { %473 = vmatprep.subr.bf16.mxu0 %v516_v7  ;;  %500 = vmatprep.subr.bf16.mxu1 %v516_v7 }
  0x17   :  { %474 = vmatpush3.bf16.msra.mxu0 %v516_v7  ;;  %508 = vmatpush3.bf16.msra.mxu1 %v516_v7 }
  0x18   :  { %475 = vmatprep.subr.bf16.mxu0 %v517_v8  ;;  %501 = vmatprep.subr.bf16.mxu1 %v517_v8 }
  0x1b   :  { %476 = vmatpush3.bf16.msra.mxu0 %v517_v8  ;;  %509 = vmatpush3.bf16.msra.mxu1 %v517_v8 }
  0x1c   :  { %477 = vmatprep.subr.bf16.mxu0 %v518_v9  ;;  %502 = vmatprep.subr.bf16.mxu1 %v518_v9 }
  0x1f   :  { %478 = vmatpush3.bf16.msra.mxu0 %v518_v9  ;;  %510 = vmatpush3.bf16.msra.mxu1 %v518_v9 }
  0x22   :  { %480 = vmatmul.mubr.bf16.vlgmr.msra.gmra.mrb[0].mxu0 %v520_v10  ;;  %488 = vmatmul.mubr.bf16.vlgmr.msra.gmra.mrb[0].mxu1 %v524_v11 }
  0x23   :  { %483 = vmatprep.mubr.bf16.mxu0 %v521_v12  ;;  %491 = vmatprep.mubr.bf16.mxu1 %v525_v13 }
  0x2a   :  { %484 = vmatmul.mubr.bf16.gmra.mrb[4].mxu0 %v522_v14  ;;  %492 = vmatmul.mubr.bf16.gmra.mrb[4].mxu1 %v526_v15 }
  0xf5   :  { %v607_v16 = vpop.f32.mrb[0].mxu0  ;;  %v609_v17 = vpop.f32.mrb[0].mxu1 }
  0xf6   :  { %v611_v18 = vpop.f32.mrb[1].mxu0  ;;  %v613_v19 = vpop.f32.mrb[1].mxu1  ;;  %v270_v27 = vmul.f32 %v607_v16, %v607_v16  ;;  %v278_v59 = vmul.f32 %v609_v17, %v609_v17 }
  0xf7   :  { %v615_v20 = vpop.f32.mrb[2].mxu0  ;;  %v617_v21 = vpop.f32.mrb[2].mxu1  ;;  %v268_v24 = vmul.f32 %v611_v18, %v611_v18  ;;  %v276_v53 = vmul.f32 %v613_v19, %v613_v19 }
  0xf8   :  { %v619_v22 = vpop.f32.mrb[3].mxu0  ;;  %v621_v23 = vpop.f32.mrb[3].mxu1  ;;  %v271_v30 = vmul.f32 %v615_v20, %v615_v20  ;;  %v279_v62 = vmul.f32 %v617_v21, %v617_v21 }
  0xf9   :  { %v247_v25 = vadd.f32 %v619_v22, %v611_v18  ;;  %v269_v26 = vmul.f32 %v619_v22, %v619_v22  ;;  %v277_v58 = vmul.f32 %v621_v23, %v621_v23 }
  0xfb   :  { %v248_v28 = vadd.f32 %v607_v16, %v247_v25  ;;  %v284_v29 = vadd.f32 %v269_v26, %v268_v24 }
  0xfd   :  { %v285_v31 = vadd.f32 %v284_v29, %v270_v27  ;;  %v634_v32 = vpop.f32.mrb[4].mxu0  ;;  %v249_v33 = vadd.f32 %v615_v20, %v248_v28  ;;  %v637_v34 = vpop.f32.mrb[4].mxu1 }
  0xfe   :  { %v639_v35 = vpop.f32.mrb[5].mxu0  ;;  %v641_v36 = vpop.f32.mrb[5].mxu1  ;;  %v274_v47 = vmul.f32 %v634_v32, %v634_v32  ;;  %v282_v7 = vmul.f32 %v637_v34, %v637_v34 }
  0xff   :  { %v250_v37 = vadd.f32 %v249_v33, %v639_v35  ;;  %v272_v38 = vmul.f32 %v639_v35, %v639_v35  ;;  %v286_v39 = vadd.f32 %v285_v31, %v271_v30  ;;  %v646_v40 = vpop.f32.mrb[6].mxu0  ;;  %v648_v41 = vpop.f32.mrb[6].mxu1  ;;  %v280_v1 = vmul.f32 %v641_v36, %v641_v36 }
 0x100   :  { %v650_v42 = vpop.f32.mrb[7].mxu0  ;;  %v652_v43 = vpop.f32.mrb[7].mxu1  ;;  %v275_v50 = vmul.f32 %v646_v40, %v646_v40  ;;  %v283_v10 = vmul.f32 %v648_v41, %v648_v41 }
 0x101   :  { %v287_v44 = vadd.f32 %v286_v39, %v272_v38  ;;  %v251_v45 = vadd.f32 %v250_v37, %v650_v42  ;;  %v273_v46 = vmul.f32 %v650_v42, %v650_v42  ;;  %v281_v6 = vmul.f32 %v652_v43, %v652_v43 }
 0x103   :  { %v252_v48 = vadd.f32 %v634_v32, %v251_v45  ;;  %v288_v49 = vadd.f32 %v287_v44, %v273_v46 }
 0x105   :  { %v289_v51 = vadd.f32 %v288_v49, %v274_v47  ;;  %v253_v52 = vadd.f32 %v646_v40, %v252_v48  ;;  %v318_v47 = vlaneseq  ;;  %v310_v49 = vld [vmem:[%s778_s2] sm:$0x1] }
 0x107   :  { %v254_v54 = vadd.f32 %v253_v52, %v613_v19  ;;  %v290_v55 = vadd.f32 %v289_v51, %v275_v50  ;;  %v319_v48 = vshrl.u32 %v318_v47, 7 }
 0x109   :  { %v291_v56 = vadd.f32 %v290_v55, %v276_v53  ;;  %v255_v57 = vadd.f32 %v254_v54, %v621_v23  ;;  %v320_v50 = vsub.s32 0, %v319_v48  ;;  %v314_v53 = vld [vmem:[%s779_s3] sm:$0x1] }
 0x10b   :  { %v256_v60 = vadd.f32 %v609_v17, %v255_v57  ;;  %v292_v61 = vadd.f32 %v291_v56, %v277_v58 }
 0x10d   :  { %v293_v63 = vadd.f32 %v292_v61, %v278_v59  ;;  %v257_v0 = vadd.f32 %v617_v21, %v256_v60 }
 0x10f   :  { %v258_v2 = vadd.f32 %v257_v0, %v641_v36  ;;  %v294_v3 = vadd.f32 %v293_v63, %v279_v62 }
 0x111   :  { %v295_v4 = vadd.f32 %v294_v3, %v280_v1  ;;  %v259_v5 = vadd.f32 %v258_v2, %v652_v43 }
 0x113   :  { %v260_v8 = vadd.f32 %v637_v34, %v259_v5  ;;  %v296_v9 = vadd.f32 %v295_v4, %v281_v6 }
 0x115   :  { %v261_v11 = vadd.f32 %v648_v41, %v260_v8  ;;  %v297_v12 = vadd.f32 %v296_v9, %v282_v7 }
 0x117   :  { %v262_v13 = vrot.slane %v261_v11, 4  ;;  %v298_v14 = vadd.f32 %v297_v12, %v283_v10 }
 0x119   :  { %v263_v15 = vadd.f32 %v262_v13, %v261_v11  ;;  %v299_v24 = vrot.slane %v298_v14, 4 }
 0x11b   :  { %v264_v25 = vrot.slane %v263_v15, 2  ;;  %v300_v26 = vadd.f32 %v299_v24, %v298_v14 }
 0x11d   :  { %v265_v27 = vadd.f32 %v264_v25, %v263_v15  ;;  %v301_v28 = vrot.slane %v300_v26, 2 }
 0x11f   :  { %v266_v29 = vrot.slane %v265_v27, 1  ;;  %v302_v30 = vadd.f32 %v301_v28, %v300_v26 }
 0x121   :  { %v267_v31 = vadd.f32 %v266_v29, %v265_v27  ;;  %v303_v33 = vrot.slane %v302_v30, 1 }
 0x123   :  { %v304_v37 = vadd.f32 %v303_v33, %v302_v30  ;;  %v306_v38 = vmul.f32 0.0078125, %v267_v31 }
 0x125   :  { %v307_v39 = vmul.f32 0.0078125, %v304_v37  ;;  %v308_v44 = vmul.f32 %v306_v38, %v306_v38 }
 0x127   :  { %v309_v45 = vsub.f32 %v307_v39, %v308_v44 }
 0x129   :  { %v311_v46 = vadd.f32 1e-05, %v309_v45 }
 0x12b   :  { %527 = vrsqrt.f32 %v311_v46 }
 0x135   :  { %v528_v51 = vpop.eup %527 }
 0x136   :  { %v313_v52 = vmul.f32 %v528_v51, %v310_v49 }
 0x138   :  { %v315_v54 = vmul.f32 %v313_v52, %v306_v38  ;;  %v321_v55 = vrot.slane %v313_v52, %v320_v50 }
 0x13a   :  { %v316_v56 = vsub.f32 %v314_v53, %v315_v54  ;;  %v323_v57 = vmul.f32 %v321_v55, %v611_v18  ;;  %v324_v58 = vmul.f32 %v321_v55, %v619_v22  ;;  %v325_v59 = vmul.f32 %v607_v16, %v321_v55 }
 0x13b   :  { %v326_v60 = vmul.f32 %v615_v20, %v321_v55  ;;  %v327_v61 = vmul.f32 %v321_v55, %v639_v35  ;;  %v328_v62 = vmul.f32 %v321_v55, %v650_v42  ;;  %v329_v63 = vmul.f32 %v634_v32, %v321_v55 }
 0x13c   :  { %v330_v0 = vmul.f32 %v646_v40, %v321_v55  ;;  %v331_v1 = vmul.f32 %v321_v55, %v613_v19  ;;  %v332_v2 = vmul.f32 %v321_v55, %v621_v23  ;;  %v333_v18 = vmul.f32 %v609_v17, %v321_v55 }
 0x13d   :  { %v334_v22 = vmul.f32 %v617_v21, %v321_v55  ;;  %v335_v16 = vmul.f32 %v321_v55, %v641_v36  ;;  %v336_v20 = vmul.f32 %v321_v55, %v652_v43  ;;  %v337_v35 = vmul.f32 %v637_v34, %v321_v55 }
 0x13e   :  { %v338_v42 = vmul.f32 %v648_v41, %v321_v55  ;;  %v343_v3 = vrot.slane %v316_v56, %v320_v50  ;;  %v378_v32 = vstv %s780_s4 }
 0x140   :  { %v345_v19 = vadd.f32 %v343_v3, %v323_v57  ;;  %v346_v40 = vadd.f32 %v343_v3, %v324_v58  ;;  %v347_v23 = vadd.f32 %v343_v3, %v325_v59  ;;  %v348_v4 = vadd.f32 %v343_v3, %v326_v60 }
 0x141   :  { %v349_v17 = vadd.f32 %v343_v3, %v327_v61  ;;  %v350_v5 = vadd.f32 %v343_v3, %v328_v62  ;;  %v351_v21 = vadd.f32 %v343_v3, %v329_v63  ;;  %v352_v6 = vadd.f32 %v343_v3, %v330_v0 }
 0x142   :  { %v353_v36 = vadd.f32 %v343_v3, %v331_v1  ;;  %v354_v7 = vadd.f32 %v343_v3, %v332_v2  ;;  %v355_v43 = vadd.f32 %v343_v3, %v333_v18  ;;  %v356_v8 = vadd.f32 %v343_v3, %v334_v22 }
 0x143   :  { %v357_v34 = vadd.f32 %v343_v3, %v335_v16  ;;  %v358_v9 = vadd.f32 %v343_v3, %v336_v20  ;;  %v359_v41 = vadd.f32 %v343_v3, %v337_v35  ;;  %v360_v10 = vadd.f32 %v343_v3, %v338_v42 }
 0x144   :  { %vm362_vm0 = vcmp.gt.f32.partialorder %v345_v19, 0.0  ;;  %vm363_vm1 = vcmp.gt.f32.partialorder %v346_v40, 0.0  ;;  %vm364_vm2 = vcmp.gt.f32.partialorder %v347_v23, 0.0  ;;  %vm365_vm3 = vcmp.gt.f32.partialorder %v348_v4, 0.0 }
 0x145   :  { %vm366_vm4 = vcmp.gt.f32.partialorder %v349_v17, 0.0  ;;  %vm367_vm5 = vcmp.gt.f32.partialorder %v350_v5, 0.0  ;;  %vm368_vm6 = vcmp.gt.f32.partialorder %v351_v21, 0.0  ;;  %vm369_vm7 = vcmp.gt.f32.partialorder %v352_v6, 0.0 }
 0x146   :  { %vm370_vm8 = vcmp.gt.f32.partialorder %v353_v36, 0.0  ;;  %vm371_vm9 = vcmp.gt.f32.partialorder %v354_v7, 0.0  ;;  %vm372_vm10 = vcmp.gt.f32.partialorder %v355_v43, 0.0  ;;  %vm373_vm11 = vcmp.gt.f32.partialorder %v356_v8, 0.0 }
 0x147   :  { %vm374_vm12 = vcmp.gt.f32.partialorder %v357_v34, 0.0  ;;  %vm375_vm13 = vcmp.gt.f32.partialorder %v358_v9, 0.0  ;;  %vm376_vm14 = vcmp.gt.f32.partialorder %v359_v41, 0.0  ;;  %vm377_vm15 = vcmp.gt.f32.partialorder %v360_v10, 0.0 }
 0x148   :  { %v379_v11 = vmul.f32 %v378_v32, %v345_v19  ;;  %v380_v12 = vmul.f32 %v378_v32, %v346_v40  ;;  %v381_v13 = vmul.f32 %v378_v32, %v347_v23  ;;  %v382_v14 = vmul.f32 %v378_v32, %v348_v4 }
 0x149   :  { %v383_v15 = vmul.f32 %v378_v32, %v349_v17  ;;  %v384_v24 = vmul.f32 %v378_v32, %v350_v5  ;;  %v385_v25 = vmul.f32 %v378_v32, %v351_v21  ;;  %v386_v26 = vmul.f32 %v378_v32, %v352_v6 }
 0x14a   :  { %v387_v27 = vmul.f32 %v378_v32, %v353_v36  ;;  %v388_v28 = vmul.f32 %v378_v32, %v354_v7  ;;  %v389_v29 = vmul.f32 %v378_v32, %v355_v43  ;;  %v390_v30 = vmul.f32 %v378_v32, %v356_v8 }
 0x14b   :  { %v391_v31 = vmul.f32 %v378_v32, %v357_v34  ;;  %v392_v33 = vmul.f32 %v378_v32, %v358_v9  ;;  %v393_v37 = vmul.f32 %v378_v32, %v359_v41  ;;  %v394_v38 = vmul.f32 %v378_v32, %v360_v10 }
 0x14c   :  { %v395_v39 = vsel %vm362_vm0, %v345_v19, %v379_v11  ;;  %v396_v44 = vsel %vm363_vm1, %v346_v40, %v380_v12  ;;  %v397_v45 = vsel %vm364_vm2, %v347_v23, %v381_v13  ;;  %v398_v46 = vsel %vm365_vm3, %v348_v4, %v382_v14 }
 0x14d   :  { %v399_v47 = vsel %vm366_vm4, %v349_v17, %v383_v15  ;;  %v400_v48 = vsel %vm367_vm5, %v350_v5, %v384_v24  ;;  %v401_v49 = vsel %vm368_vm6, %v351_v21, %v385_v25  ;;  %v402_v50 = vsel %vm369_vm7, %v352_v6, %v386_v26  ;;  %411 = vst [vmem:[%s781_s5] sm:$0xff] %v395_v39 }
 0x14e   :  { %412 = vst [vmem:[%s781_s5 + $0x8] sm:$0xff] %v396_v44  ;;  %413 = vst [vmem:[%s781_s5 + $0x10] sm:$0xff] %v397_v45  ;;  %v403_v51 = vsel %vm370_vm8, %v353_v36, %v387_v27  ;;  %v404_v52 = vsel %vm371_vm9, %v354_v7, %v388_v28  ;;  %v405_v53 = vsel %vm372_vm10, %v355_v43, %v389_v29 }
 0x14f   :  { %414 = vst [vmem:[%s781_s5 + $0x18] sm:$0xff] %v398_v46  ;;  %v406_v54 = vsel %vm373_vm11, %v356_v8, %v390_v30  ;;  %415 = vst [vmem:[%s781_s5 + $0x20] sm:$0xff] %v399_v47  ;;  %v407_v55 = vsel %vm374_vm12, %v357_v34, %v391_v31  ;;  %v408_v56 = vsel %vm375_vm13, %v358_v9, %v392_v33 }
 0x150   :  { %416 = vst [vmem:[%s781_s5 + $0x28] sm:$0xff] %v400_v48  ;;  %417 = vst [vmem:[%s781_s5 + $0x30] sm:$0xff] %v401_v49  ;;  %v409_v57 = vsel %vm376_vm14, %v359_v41, %v393_v37  ;;  %v410_v58 = vsel %vm377_vm15, %v360_v10, %v394_v38 }
 0x151   :  { %418 = vst [vmem:[%s781_s5 + $0x38] sm:$0xff] %v402_v50  ;;  %419 = vst [vmem:[%s781_s5 + $0x40] sm:$0xff] %v403_v51 }
 0x152   :  { %420 = vst [vmem:[%s781_s5 + $0x48] sm:$0xff] %v404_v52  ;;  %421 = vst [vmem:[%s781_s5 + $0x50] sm:$0xff] %v405_v53 }
 0x153   :  { %422 = vst [vmem:[%s781_s5 + $0x58] sm:$0xff] %v406_v54  ;;  %423 = vst [vmem:[%s781_s5 + $0x60] sm:$0xff] %v407_v55 }
 0x154   :  { %424 = vst [vmem:[%s781_s5 + $0x68] sm:$0xff] %v408_v56  ;;  %425 = vst [vmem:[%s781_s5 + $0x70] sm:$0xff] %v409_v57 }
 0x155   :  { %426 = vst [vmem:[%s781_s5 + $0x78] sm:$0xff] %v410_v58 }

// kernel: encoder_forward.5
= control target key start
LH: loop header
LB: loop body
LE: loop exit
PB: predicated region body
PF: predicated region fallthrough
CT: control target
= control target key end

     0   :  { %s2416_s1 = inlined_call_operand.vmem [shape: bf16[1664,128], index: 1, kind: input, shape index: {}]   ;;  %s2417_s0 = inlined_call_operand.vmem [shape: bf16[32,1664], index: 0, kind: input, shape index: {}]   ;;  %s2418_s5 = inlined_call_operand.vmem [shape: f32[128,128], index: 5, kind: output, shape index: {}]   ;;  %s2419_s2 = inlined_call_operand.vmem [shape: f32[1,128], index: 2, kind: input, shape index: {}]   ;;  %s2420_s3 = inlined_call_operand.vmem [shape: f32[1,128], index: 3, kind: input, shape index: {}]   ;;  %s2421_s4 = inlined_call_operand.<no memory space> [shape: f32[1], index: 4, kind: input, shape index: {}]  }
   0x1   :  { %v1782_v0 = vld [vmem:[%s2416_s1 + $0x40] sm:$0xff]   ;;  %v1786_v4 = vld [vmem:[%s2416_s1 + $0x48] sm:$0xff]   ;;  %v1790_v8 = vld [vmem:[%s2416_s1 + $0x50] sm:$0xff]  }
   0x2   :  { %v1783_v1 = vld [vmem:[%s2416_s1 + $0xc0] sm:$0xff]   ;;  %1583 = vmatprep.subr.bf16.mxu0 %v1782_v0  ;;  %v1787_v5 = vld [vmem:[%s2416_s1 + $0xc8] sm:$0xff]   ;;  %v1791_v9 = vld [vmem:[%s2416_s1 + $0xd0] sm:$0xff]  }
   0x3   :  { %v1784_v2 = vld [vmem:[%s2416_s1] sm:$0xff]   ;;  %1611 = vmatprep.subr.bf16.mxu1 %v1783_v1  ;;  %v1788_v6 = vld [vmem:[%s2416_s1 + $0x8] sm:$0xff]   ;;  %v1792_v10 = vld [vmem:[%s2416_s1 + $0x10] sm:$0xff]  }
   0x4   :  { %v1785_v3 = vld [vmem:[%s2416_s1 + $0x80] sm:$0xff]   ;;  %1584 = vmatpush3.bf16.msra.mxu0 %v1784_v2  ;;  %v1789_v7 = vld [vmem:[%s2416_s1 + $0x88] sm:$0xff]   ;;  %v1793_v11 = vld [vmem:[%s2416_s1 + $0x90] sm:$0xff]  }
   0x5   :  { %1612 = vmatpush3.bf16.msra.mxu1 %v1785_v3  ;;  %1585 = vmatprep.subr.bf16.mxu0 %v1786_v4  ;;  %v1794_v12 = vld [vmem:[%s2416_s1 + $0x58] sm:$0xff]   ;;  %v1798_v16 = vld [vmem:[%s2416_s1 + $0x60] sm:$0xff]   ;;  %v1802_v20 = vld [vmem:[%s2416_s1 + $0x68] sm:$0xff]  }
   0x6   :  { %1613 = vmatprep.subr.bf16.mxu1 %v1787_v5  ;;  %v1795_v13 = vld [vmem:[%s2416_s1 + $0xd8] sm:$0xff]   ;;  %v1799_v17 = vld [vmem:[%s2416_s1 + $0xe0] sm:$0xff]   ;;  %v1803_v21 = vld [vmem:[%s2416_s1 + $0xe8] sm:$0xff]  }
   0x7   :  { %v1796_v14 = vld [vmem:[%s2416_s1 + $0x18] sm:$0xff]   ;;  %v1800_v18 = vld [vmem:[%s2416_s1 + $0x20] sm:$0xff]   ;;  %v1804_v22 = vld [vmem:[%s2416_s1 + $0x28] sm:$0xff]  }
   0x8   :  { %1586 = vmatpush3.bf16.msra.mxu0 %v1788_v6  ;;  %v1797_v15 = vld [vmem:[%s2416_s1 + $0x98] sm:$0xff]   ;;  %v1801_v19 = vld [vmem:[%s2416_s1 + $0xa0] sm:$0xff]   ;;  %v1805_v23 = vld [vmem:[%s2416_s1 + $0xa8] sm:$0xff]  }
   0x9   :  { %1614 = vmatpush3.bf16.msra.mxu1 %v1789_v7  ;;  %1587 = vmatprep.subr.bf16.mxu0 %v1790_v8  ;;  %v1806_v24 = vld [vmem:[%s2416_s1 + $0x70] sm:$0xff]   ;;  %v1810_v28 = vld [vmem:[%s2416_s1 + $0x78] sm:$0xff]   ;;  %v1819_v35 = vld [vmem:[%s2417_s0 + $0xc] ss:$52 sps:$4 sm:$0xff]  }
   0xa   :  { %1615 = vmatprep.subr.bf16.mxu1 %v1791_v9  ;;  %v1807_v25 = vld [vmem:[%s2416_s1 + $0xf0] sm:$0xff]   ;;  %v1811_v29 = vld [vmem:[%s2416_s1 + $0xf8] sm:$0xff]   ;;  %v1820_v36 = vld [vmem:[%s2416_s1 + $0x140] sm:$0xff]   ;;  %1095 = vmatprep.mubr.bf16.mxu1 %v1819_v35 }
   0xb   :  { %v1808_v26 = vld [vmem:[%s2416_s1 + $0x30] sm:$0xff]   ;;  %v1812_v30 = vld [vmem:[%s2416_s1 + $0x38] sm:$0xff]   ;;  %v1821_v37 = vld [vmem:[%s2416_s1 + $0x100] sm:$0xff]  }
   0xc   :  { %1588 = vmatpush3.bf16.msra.mxu0 %v1792_v10  ;;  %v1809_v27 = vld [vmem:[%s2416_s1 + $0xb0] sm:$0xff]   ;;  %v1813_v31 = vld [vmem:[%s2416_s1 + $0xb8] sm:$0xff]   ;;  %v1822_v38 = vld [vmem:[%s2416_s1 + $0x1c0] sm:$0xff]  }
   0xd   :  { %1616 = vmatpush3.bf16.msra.mxu1 %v1793_v11  ;;  %1589 = vmatprep.subr.bf16.mxu0 %v1794_v12  ;;  %v1814_v32 = vld [vmem:[%s2417_s0] ss:$52 sps:$4 sm:$0xff]   ;;  %v1816_v33 = vld [vmem:[%s2417_s0 + $0x4] ss:$52 sps:$4 sm:$0xff]   ;;  %v1817_v34 = vld [vmem:[%s2417_s0 + $0x8] ss:$52 sps:$4 sm:$0xff]  }
   0xe   :  { %1617 = vmatprep.subr.bf16.mxu1 %v1795_v13  ;;  %1046 = vmatprep.mubr.bf16.mxu0 %v1816_v33  ;;  %v1823_v39 = vld [vmem:[%s2416_s1 + $0x180] sm:$0xff]   ;;  %v1824_v40 = vld [vmem:[%s2416_s1 + $0x148] sm:$0xff]   ;;  %v1828_v44 = vld [vmem:[%s2416_s1 + $0x150] sm:$0xff]  }
   0xf   :  { %v1825_v41 = vld [vmem:[%s2416_s1 + $0x108] sm:$0xff]   ;;  %v1829_v45 = vld [vmem:[%s2416_s1 + $0x110] sm:$0xff]   ;;  %v1832_v48 = vld [vmem:[%s2416_s1 + $0x158] sm:$0xff]  }
  0x10   :  { %1590 = vmatpush3.bf16.msra.mxu0 %v1796_v14  ;;  %v1826_v42 = vld [vmem:[%s2416_s1 + $0x1c8] sm:$0xff]   ;;  %v1830_v46 = vld [vmem:[%s2416_s1 + $0x1d0] sm:$0xff]   ;;  %v1833_v49 = vld [vmem:[%s2416_s1 + $0x118] sm:$0xff]  }
  0x11   :  { %1618 = vmatpush3.bf16.msra.mxu1 %v1797_v15  ;;  %1591 = vmatprep.subr.bf16.mxu0 %v1798_v16  ;;  %v1827_v43 = vld [vmem:[%s2416_s1 + $0x188] sm:$0xff]   ;;  %v1831_v47 = vld [vmem:[%s2416_s1 + $0x190] sm:$0xff]   ;;  %v1834_v50 = vld [vmem:[%s2416_s1 + $0x1d8] sm:$0xff]  }
  0x12   :  { %1619 = vmatprep.subr.bf16.mxu1 %v1799_v17  ;;  %v1835_v51 = vld [vmem:[%s2416_s1 + $0x198] sm:$0xff]   ;;  %v1836_v52 = vld [vmem:[%s2416_s1 + $0x160] sm:$0xff]   ;;  %v1840_v56 = vld [vmem:[%s2416_s1 + $0x168] sm:$0xff]  }
  0x13   :  { %v1837_v53 = vld [vmem:[%s2416_s1 + $0x120] sm:$0xff]   ;;  %v1843_v58 = vld [vmem:[%s2417_s0 + $0x74] ss:$52 sps:$4 sm:$0xff]   ;;  %v1854_v4 = vld [vmem:[%s2416_s1 + $0x178] sm:$0xff]  }
  0x14   :  { %1592 = vmatpush3.bf16.msra.mxu0 %v1800_v18  ;;  %v1838_v54 = vld [vmem:[%s2416_s1 + $0x1e0] sm:$0xff]   ;;  %v1845_v59 = vld [vmem:[%s2416_s1 + $0x128] sm:$0xff]   ;;  %v1850_v0 = vld [vmem:[%s2416_s1 + $0x170] sm:$0xff]  }
  0x15   :  { %1620 = vmatpush3.bf16.msra.mxu1 %v1801_v19  ;;  %1593 = vmatprep.subr.bf16.mxu0 %v1802_v20  ;;  %v1839_v55 = vld [vmem:[%s2416_s1 + $0x1a0] sm:$0xff]   ;;  %v1846_v60 = vld [vmem:[%s2417_s0 + $0x68] ss:$52 sps:$4 sm:$0xff]   ;;  %v1851_v1 = vld [vmem:[%s2416_s1 + $0x130] sm:$0xff]  }
  0x16   :  { %1621 = vmatprep.subr.bf16.mxu1 %v1803_v21  ;;  %v1841_v57 = vld [vmem:[%s2417_s0 + $0x6c] ss:$52 sps:$4 sm:$0xff]   ;;  %v1847_v61 = vld [vmem:[%s2417_s0 + $0x70] ss:$52 sps:$4 sm:$0xff]   ;;  %v1855_v5 = vld [vmem:[%s2416_s1 + $0x138] sm:$0xff]  }
  0x17   :  { %v1848_v62 = vld [vmem:[%s2416_s1 + $0x1e8] sm:$0xff]   ;;  %v1852_v2 = vld [vmem:[%s2416_s1 + $0x1f0] sm:$0xff]   ;;  %v1856_v6 = vld [vmem:[%s2416_s1 + $0x1f8] sm:$0xff]  }
  0x18   :  { %1594 = vmatpush3.bf16.msra.mxu0 %v1804_v22  ;;  %v1849_v63 = vld [vmem:[%s2416_s1 + $0x1a8] sm:$0xff]   ;;  %v1853_v3 = vld [vmem:[%s2416_s1 + $0x1b0] sm:$0xff]   ;;  %v1860_v9 = vld [vmem:[%s2416_s1 + $0x1b8] sm:$0xff]  }
  0x19   :  { %1622 = vmatpush3.bf16.msra.mxu1 %v1805_v23  ;;  %1595 = vmatprep.subr.bf16.mxu0 %v1806_v24  ;;  %v1857_v7 = vld [vmem:[%s2417_s0 + $0x10] ss:$52 sps:$4 sm:$0xff]   ;;  %v1859_v8 = vld [vmem:[%s2417_s0 + $0x14] ss:$52 sps:$4 sm:$0xff]   ;;  %v1862_v11 = vld [vmem:[%s2417_s0 + $0x18] ss:$52 sps:$4 sm:$0xff]  }
  0x1a   :  { %1623 = vmatprep.subr.bf16.mxu1 %v1807_v25  ;;  %v1861_v10 = vld [vmem:[%s2416_s1 + $0x240] sm:$0xff]   ;;  %v1864_v12 = vld [vmem:[%s2417_s0 + $0x1c] ss:$52 sps:$4 sm:$0xff]   ;;  %v1868_v16 = vld [vmem:[%s2416_s1 + $0x248] sm:$0xff]  }
  0x1b   :  { %v1865_v13 = vld [vmem:[%s2416_s1 + $0x200] sm:$0xff]   ;;  %v1869_v17 = vld [vmem:[%s2416_s1 + $0x208] sm:$0xff]   ;;  %v1871_v19 = vld [vmem:[%s2417_s0 + $0x7c] ss:$52 sps:$4 sm:$0xff]  }
  0x1c   :  { %1596 = vmatpush3.bf16.msra.mxu0 %v1808_v26  ;;  %v1866_v14 = vld [vmem:[%s2416_s1 + $0x2c0] sm:$0xff]   ;;  %v1870_v18 = vld [vmem:[%s2416_s1 + $0x2c8] sm:$0xff]   ;;  %v1875_v22 = vld [vmem:[%s2416_s1 + $0x250] sm:$0xff]  }
  0x1d   :  { %1624 = vmatpush3.bf16.msra.mxu1 %v1809_v27  ;;  %1597 = vmatprep.subr.bf16.mxu0 %v1810_v28  ;;  %v1867_v15 = vld [vmem:[%s2416_s1 + $0x280] sm:$0xff]   ;;  %v1873_v20 = vld [vmem:[%s2416_s1 + $0x288] sm:$0xff]   ;;  %v1878_v24 = vld [vmem:[%s2416_s1 + $0x210] sm:$0xff]  }
  0x1e   :  { %1625 = vmatprep.subr.bf16.mxu1 %v1811_v29  ;;  %v1874_v21 = vld [vmem:[%s2417_s0 + $0x78] ss:$52 sps:$4 sm:$0xff]   ;;  %v1879_v25 = vld [vmem:[%s2417_s0 + $0x80] ss:$52 sps:$4 sm:$0xff]  }
  0x1f   :  { %v1876_v23 = vld [vmem:[%s2417_s0 + $0x84] ss:$52 sps:$4 sm:$0xff]   ;;  %v1880_v26 = vld [vmem:[%s2416_s1 + $0x2d0] sm:$0xff]  }
  0x20   :  { %1598 = vmatpush3.bf16.msra.mxu0 %v1812_v30  ;;  %v1881_v27 = vld [vmem:[%s2416_s1 + $0x290] sm:$0xff]   ;;  %v1882_v28 = vld [vmem:[%s2416_s1 + $0x258] sm:$0xff]   ;;  %v1887_v33 = vld [vmem:[%s2416_s1 + $0x220] sm:$0xff]  }
  0x21   :  { %1626 = vmatpush3.bf16.msra.mxu1 %v1813_v31  ;;  %1639 = vmatprep.subr.bf16.mxu0 %v1820_v36  ;;  %v1883_v29 = vld [vmem:[%s2416_s1 + $0x218] sm:$0xff]   ;;  %v1889_v35 = vld [vmem:[%s2416_s1 + $0x2a0] sm:$0xff]   ;;  %v1890_v36 = vld [vmem:[%s2416_s1 + $0x268] sm:$0xff]  }
  0x22   :  { %1667 = vmatprep.subr.bf16.mxu1 %v1822_v38  ;;  %v1884_v30 = vld [vmem:[%s2416_s1 + $0x2d8] sm:$0xff]   ;;  %v1892_v38 = vld [vmem:[%s2416_s1 + $0x2e8] sm:$0xff]  }
  0x23   :  { %1047 = vmatmul.mubr.bf16.vlgmr.msra.gmra.mrb[0].mxu0 %v1814_v32  ;;  %v1885_v31 = vld [vmem:[%s2416_s1 + $0x298] sm:$0xff]   ;;  %v1886_v32 = vld [vmem:[%s2416_s1 + $0x260] sm:$0xff]  }
  0x24   :  { %1096 = vmatmul.mubr.bf16.vlgmr.msra.gmra.mrb[0].mxu1 %v1817_v34  ;;  %1640 = vmatpush3.bf16.msra.mxu0 %v1821_v37  ;;  %v1888_v34 = vld [vmem:[%s2416_s1 + $0x2e0] sm:$0xff]   ;;  %v1891_v37 = vld [vmem:[%s2416_s1 + $0x228] sm:$0xff]  }
  0x25   :  { %1668 = vmatpush3.bf16.msra.mxu1 %v1823_v39  ;;  %1641 = vmatprep.subr.bf16.mxu0 %v1824_v40  ;;  %v1893_v39 = vld [vmem:[%s2416_s1 + $0x2a8] sm:$0xff]   ;;  %v1894_v40 = vld [vmem:[%s2416_s1 + $0x270] sm:$0xff]  }
  0x26   :  { %1669 = vmatprep.subr.bf16.mxu1 %v1826_v42  ;;  %1054 = vmatprep.mubr.bf16.mxu0 %v1841_v57  ;;  %v1896_v42 = vld [vmem:[%s2416_s1 + $0x2f0] sm:$0xff]  }
  0x27   :  { %1103 = vmatprep.mubr.bf16.mxu1 %v1843_v58  ;;  %v1914_v57 = vld [vmem:[%s2417_s0 + $0x94] ss:$52 sps:$4 sm:$0xff]   ;;  %v1917_v58 = vld [vmem:[%s2416_s1 + $0x318] sm:$0xff]  }
  0x28   :  { %1642 = vmatpush3.bf16.msra.mxu0 %v1825_v41  ;;  %v1895_v41 = vld [vmem:[%s2416_s1 + $0x230] sm:$0xff]  }
  0x29   :  { %1670 = vmatpush3.bf16.msra.mxu1 %v1827_v43  ;;  %1643 = vmatprep.subr.bf16.mxu0 %v1828_v44  ;;  %v1897_v43 = vld [vmem:[%s2416_s1 + $0x2b0] sm:$0xff]   ;;  %v1898_v44 = vld [vmem:[%s2416_s1 + $0x278] sm:$0xff]  }
  0x2a   :  { %1671 = vmatprep.subr.bf16.mxu1 %v1830_v46  ;;  %v1900_v46 = vld [vmem:[%s2416_s1 + $0x2f8] sm:$0xff]  }
  0x2b   :  { %1055 = vmatmul.mubr.bf16.gmra.mrb[4].mxu0 %v1846_v60  ;;  %v1918_v60 = vld [vmem:[%s2416_s1 + $0x320] sm:$0xff]  }
  0x2c   :  { %1644 = vmatpush3.bf16.msra.mxu0 %v1829_v45  ;;  %1104 = vmatmul.mubr.bf16.gmra.mrb[4].mxu1 %v1847_v61  ;;  %v1899_v45 = vld [vmem:[%s2416_s1 + $0x238] sm:$0xff]   ;;  %v1922_v61 = vld [vmem:[%s2417_s0 + $0x30] ss:$52 sps:$4 sm:$0xff]  }
  0x2d   :  { %1672 = vmatpush3.bf16.msra.mxu1 %v1831_v47  ;;  %1645 = vmatprep.subr.bf16.mxu0 %v1832_v48  ;;  %v1901_v47 = vld [vmem:[%s2417_s0 + $0x20] ss:$52 sps:$4 sm:$0xff]   ;;  %v1903_v48 = vld [vmem:[%s2417_s0 + $0x24] ss:$52 sps:$4 sm:$0xff]  }
  0x2e   :  { %1673 = vmatprep.subr.bf16.mxu1 %v1834_v50  ;;  %1144 = vmatprep.mubr.bf16.mxu0 %v1859_v8  ;;  %v1905_v50 = vld [vmem:[%s2416_s1 + $0x300] sm:$0xff]  }
  0x2f   :  { %1193 = vmatprep.mubr.bf16.mxu1 %v1864_v12 }
  0x30   :  { %1646 = vmatpush3.bf16.msra.mxu0 %v1833_v49  ;;  %v1904_v49 = vld [vmem:[%s2416_s1 + $0x2b8] sm:$0xff]  }
  0x31   :  { %1674 = vmatpush3.bf16.msra.mxu1 %v1835_v51  ;;  %1647 = vmatprep.subr.bf16.mxu0 %v1836_v52  ;;  %v1906_v51 = vld [vmem:[%s2417_s0 + $0x28] ss:$52 sps:$4 sm:$0xff]   ;;  %v1908_v52 = vld [vmem:[%s2417_s0 + $0x2c] ss:$52 sps:$4 sm:$0xff]  }
  0x32   :  { %1675 = vmatprep.subr.bf16.mxu1 %v1838_v54  ;;  %v1910_v54 = vld [vmem:[%s2417_s0 + $0x8c] ss:$52 sps:$4 sm:$0xff]  }
  0x34   :  { %1648 = vmatpush3.bf16.msra.mxu0 %v1837_v53  ;;  %v1909_v53 = vld [vmem:[%s2416_s1 + $0x308] sm:$0xff]  }
  0x35   :  { %1676 = vmatpush3.bf16.msra.mxu1 %v1839_v55  ;;  %1649 = vmatprep.subr.bf16.mxu0 %v1840_v56  ;;  %v1912_v55 = vld [vmem:[%s2417_s0 + $0x88] ss:$52 sps:$4 sm:$0xff]   ;;  %v1913_v56 = vld [vmem:[%s2416_s1 + $0x310] sm:$0xff]  }
  0x36   :  { %1677 = vmatprep.subr.bf16.mxu1 %v1848_v62  ;;  %v1919_v62 = vld [vmem:[%s2416_s1 + $0x328] sm:$0xff]  }
  0x38   :  { %1650 = vmatpush3.bf16.msra.mxu0 %v1845_v59  ;;  %v1916_v59 = vld [vmem:[%s2417_s0 + $0x90] ss:$52 sps:$4 sm:$0xff]  }
  0x39   :  { %1678 = vmatpush3.bf16.msra.mxu1 %v1849_v63  ;;  %1651 = vmatprep.subr.bf16.mxu0 %v1850_v0  ;;  %v1920_v63 = vld [vmem:[%s2416_s1 + $0x330] sm:$0xff]   ;;  %v1921_v0 = vld [vmem:[%s2416_s1 + $0x338] sm:$0xff]  }
  0x3a   :  { %1679 = vmatprep.subr.bf16.mxu1 %v1852_v2 }
  0x3c   :  { %1652 = vmatpush3.bf16.msra.mxu0 %v1851_v1  ;;  %v1923_v1 = vld [vmem:[%s2417_s0 + $0x98] ss:$52 sps:$4 sm:$0xff]  }
  0x3d   :  { %1680 = vmatpush3.bf16.msra.mxu1 %v1853_v3  ;;  %1653 = vmatprep.subr.bf16.mxu0 %v1854_v4 }
  0x3e   :  { %1681 = vmatprep.subr.bf16.mxu1 %v1856_v6 }
  0x40   :  { %1654 = vmatpush3.bf16.msra.mxu0 %v1855_v5 }
  0x41   :  { %1682 = vmatpush3.bf16.msra.mxu1 %v1860_v9  ;;  %1695 = vmatprep.subr.bf16.mxu0 %v1861_v10 }
  0x42   :  { %1723 = vmatprep.subr.bf16.mxu1 %v1866_v14 }
  0x43   :  { %1145 = vmatmul.mubr.bf16.vlgmr.msra.gmra.mrb[8].mxu0 %v1857_v7 }
  0x44   :  { %1696 = vmatpush3.bf16.msra.mxu0 %v1865_v13  ;;  %1194 = vmatmul.mubr.bf16.vlgmr.msra.gmra.mrb[8].mxu1 %v1862_v11 }
  0x45   :  { %1724 = vmatpush3.bf16.msra.mxu1 %v1867_v15  ;;  %1697 = vmatprep.subr.bf16.mxu0 %v1868_v16 }
  0x46   :  { %1725 = vmatprep.subr.bf16.mxu1 %v1870_v18  ;;  %1152 = vmatprep.mubr.bf16.mxu0 %v1871_v19 }
  0x47   :  { %1201 = vmatprep.mubr.bf16.mxu1 %v1876_v23 }
  0x48   :  { %1698 = vmatpush3.bf16.msra.mxu0 %v1869_v17 }
  0x49   :  { %1726 = vmatpush3.bf16.msra.mxu1 %v1873_v20  ;;  %1699 = vmatprep.subr.bf16.mxu0 %v1875_v22 }
  0x4a   :  { %1727 = vmatprep.subr.bf16.mxu1 %v1880_v26 }
  0x4b   :  { %1153 = vmatmul.mubr.bf16.gmra.mrb[12].mxu0 %v1874_v21 }
  0x4c   :  { %1700 = vmatpush3.bf16.msra.mxu0 %v1878_v24  ;;  %1202 = vmatmul.mubr.bf16.gmra.mrb[12].mxu1 %v1879_v25 }
  0x4d   :  { %1728 = vmatpush3.bf16.msra.mxu1 %v1881_v27  ;;  %1701 = vmatprep.subr.bf16.mxu0 %v1882_v28 }
  0x4e   :  { %1729 = vmatprep.subr.bf16.mxu1 %v1884_v30  ;;  %1242 = vmatprep.mubr.bf16.mxu0 %v1903_v48  ;;  %v1926_v30 = vmov 0.0  }
  0x4f   :  { %1291 = vmatprep.mubr.bf16.mxu1 %v1908_v52  ;;  %1425 = vst [vmem:[%s2418_s5] sm:$0xff] %v1926_v30  ;;  %1426 = vst [vmem:[%s2418_s5 + $0x8] sm:$0xff] %v1926_v30 }
  0x50   :  { %1702 = vmatpush3.bf16.msra.mxu0 %v1883_v29  ;;  %1427 = vst [vmem:[%s2418_s5 + $0x10] sm:$0xff] %v1926_v30  ;;  %1428 = vst [vmem:[%s2418_s5 + $0x18] sm:$0xff] %v1926_v30 }
  0x51   :  { %1730 = vmatpush3.bf16.msra.mxu1 %v1885_v31  ;;  %1703 = vmatprep.subr.bf16.mxu0 %v1886_v32  ;;  %1429 = vst [vmem:[%s2418_s5 + $0x20] sm:$0xff] %v1926_v30  ;;  %1430 = vst [vmem:[%s2418_s5 + $0x28] sm:$0xff] %v1926_v30 }
  0x52   :  { %1731 = vmatprep.subr.bf16.mxu1 %v1888_v34  ;;  %1431 = vst [vmem:[%s2418_s5 + $0x30] sm:$0xff] %v1926_v30  ;;  %1432 = vst [vmem:[%s2418_s5 + $0x38] sm:$0xff] %v1926_v30 }
  0x53   :  { %1433 = vst [vmem:[%s2418_s5 + $0x40] sm:$0xff] %v1926_v30  ;;  %1434 = vst [vmem:[%s2418_s5 + $0x48] sm:$0xff] %v1926_v30 }
  0x54   :  { %1704 = vmatpush3.bf16.msra.mxu0 %v1887_v33  ;;  %1435 = vst [vmem:[%s2418_s5 + $0x50] sm:$0xff] %v1926_v30  ;;  %1436 = vst [vmem:[%s2418_s5 + $0x58] sm:$0xff] %v1926_v30 }
  0x55   :  { %1732 = vmatpush3.bf16.msra.mxu1 %v1889_v35  ;;  %1705 = vmatprep.subr.bf16.mxu0 %v1890_v36  ;;  %1437 = vst [vmem:[%s2418_s5 + $0x60] sm:$0xff] %v1926_v30  ;;  %1438 = vst [vmem:[%s2418_s5 + $0x68] sm:$0xff] %v1926_v30 }
  0x56   :  { %1733 = vmatprep.subr.bf16.mxu1 %v1892_v38  ;;  %1439 = vst [vmem:[%s2418_s5 + $0x70] sm:$0xff] %v1926_v30  ;;  %1440 = vst [vmem:[%s2418_s5 + $0x78] sm:$0xff] %v1926_v30 }
  0x58   :  { %1706 = vmatpush3.bf16.msra.mxu0 %v1891_v37 }
  0x59   :  { %1734 = vmatpush3.bf16.msra.mxu1 %v1893_v39  ;;  %1707 = vmatprep.subr.bf16.mxu0 %v1894_v40 }
  0x5a   :  { %1735 = vmatprep.subr.bf16.mxu1 %v1896_v42 }
  0x5c   :  { %1708 = vmatpush3.bf16.msra.mxu0 %v1895_v41 }
  0x5d   :  { %1736 = vmatpush3.bf16.msra.mxu1 %v1897_v43  ;;  %1709 = vmatprep.subr.bf16.mxu0 %v1898_v44 }
  0x5e   :  { %1737 = vmatprep.subr.bf16.mxu1 %v1900_v46 }
  0x60   :  { %1710 = vmatpush3.bf16.msra.mxu0 %v1899_v45 }
  0x61   :  { %1738 = vmatpush3.bf16.msra.mxu1 %v1904_v49  ;;  %1761 = vmatprep.subr.bf16.mxu0 %v1905_v50 }
  0x63   :  { %1243 = vmatmul.mubr.bf16.vlgmr.msra.gmra.mrb[16].mxu0 %v1901_v47 }
  0x64   :  { %1762 = vmatpush3.bf16.msra.mxu0 %v1905_v50  ;;  %1292 = vmatmul.mubr.bf16.vlgmr.msra.gmra.mrb[16].mxu1 %v1906_v51 }
  0x65   :  { %1763 = vmatprep.subr.bf16.mxu0 %v1909_v53  ;;  %1250 = vmatprep.mubr.bf16.mxu0 %v1910_v54 }
  0x66   :  { %1299 = vmatprep.mubr.bf16.mxu1 %v1914_v57 }
  0x68   :  { %1764 = vmatpush3.bf16.msra.mxu0 %v1909_v53 }
  0x69   :  { %1765 = vmatprep.subr.bf16.mxu0 %v1913_v56 }
  0x6b   :  { %1251 = vmatmul.mubr.bf16.gmra.mrb[20].mxu0 %v1912_v55 }
  0x6c   :  { %1766 = vmatpush3.bf16.msra.mxu0 %v1913_v56  ;;  %1300 = vmatmul.mubr.bf16.gmra.mrb[20].mxu1 %v1916_v59 }
  0x6d   :  { %1767 = vmatprep.subr.bf16.mxu0 %v1917_v58  ;;  %1777 = vmatprep.mubr.bf16.mxu0 %v1922_v61 }
  0x70   :  { %1768 = vmatpush3.bf16.msra.mxu0 %v1917_v58 }
  0x71   :  { %1769 = vmatprep.subr.bf16.mxu0 %v1918_v60 }
  0x74   :  { %1770 = vmatpush3.bf16.msra.mxu0 %v1918_v60 }
  0x75   :  { %1771 = vmatprep.subr.bf16.mxu0 %v1919_v62 }
  0x78   :  { %1772 = vmatpush3.bf16.msra.mxu0 %v1919_v62 }
  0x79   :  { %1773 = vmatprep.subr.bf16.mxu0 %v1920_v63 }
  0x7c   :  { %1774 = vmatpush3.bf16.msra.mxu0 %v1920_v63 }
  0x7d   :  { %1775 = vmatprep.subr.bf16.mxu0 %v1921_v0 }
  0x80   :  { %1776 = vmatpush3.bf16.msra.mxu0 %v1921_v0 }
  0x83   :  { %1778 = vmatmul.mubr.bf16.vlgmr.msra.gmra.mrb[24].mxu0 %v1923_v1 }
  0xf6   :  { %v1599_v2 = vpop.f32.mrb[0].mxu0 }
  0xf7   :  { %v1627_v3 = vpop.f32.mrb[0].mxu1  ;;  %v1600_v4 = vpop.f32.mrb[1].mxu0 }
  0xf8   :  { %v1601_v5 = vadd.f32 %v1600_v4, %v1599_v2  ;;  %v1628_v6 = vpop.f32.mrb[1].mxu1  ;;  %v1602_v7 = vpop.f32.mrb[2].mxu0 }
  0xf9   :  { %v1629_v8 = vadd.f32 %v1628_v6, %v1627_v3  ;;  %v1630_v9 = vpop.f32.mrb[2].mxu1  ;;  %v1603_v10 = vpop.f32.mrb[3].mxu0 }
  0xfa   :  { %v1604_v11 = vadd.f32 %v1603_v10, %v1602_v7  ;;  %v1631_v12 = vpop.f32.mrb[3].mxu1 }
  0xfb   :  { %v1098_v13 = vadd.f32 %v1629_v8, %v1601_v5  ;;  %v1632_v14 = vadd.f32 %v1631_v12, %v1630_v9 }
  0xfd   :  { %v1101_v15 = vadd.f32 %v1632_v14, %v1604_v11 }
  0xfe   :  { %v1605_v16 = vpop.f32.mrb[4].mxu0 }
  0xff   :  { %v1633_v17 = vpop.f32.mrb[4].mxu1  ;;  %v1606_v18 = vpop.f32.mrb[5].mxu0 }
 0x100   :  { %v1634_v19 = vpop.f32.mrb[5].mxu1  ;;  %v1607_v20 = vadd.f32 %v1606_v18, %v1605_v16  ;;  %v1608_v22 = vpop.f32.mrb[6].mxu0 }
 0x101   :  { %v1635_v21 = vadd.f32 %v1634_v19, %v1633_v17  ;;  %v1636_v23 = vpop.f32.mrb[6].mxu1  ;;  %v1609_v24 = vpop.f32.mrb[7].mxu0 }
 0x102   :  { %v1637_v25 = vpop.f32.mrb[7].mxu1  ;;  %v1610_v27 = vadd.f32 %v1609_v24, %v1608_v22 }
 0x103   :  { %v1106_v26 = vadd.f32 %v1635_v21, %v1607_v20  ;;  %v1638_v28 = vadd.f32 %v1637_v25, %v1636_v23 }
 0x105   :  { %v1109_v29 = vadd.f32 %v1638_v28, %v1610_v27 }
 0x116   :  { %v1655_v31 = vpop.f32.mrb[8].mxu0 }
 0x117   :  { %v1656_v32 = vpop.f32.mrb[9].mxu0  ;;  %v1683_v35 = vpop.f32.mrb[8].mxu1 }
 0x118   :  { %v1657_v33 = vadd.f32 %v1656_v32, %v1655_v31  ;;  %v1658_v34 = vpop.f32.mrb[10].mxu0  ;;  %v1684_v39 = vpop.f32.mrb[9].mxu1 }
 0x119   :  { %v1659_v36 = vpop.f32.mrb[11].mxu0  ;;  %v1685_v40 = vadd.f32 %v1684_v39, %v1683_v35  ;;  %v1686_v41 = vpop.f32.mrb[10].mxu1 }
 0x11a   :  { %v1147_v37 = vadd.f32 %v1657_v33, %v1098_v13  ;;  %v1660_v38 = vadd.f32 %v1659_v36, %v1658_v34  ;;  %v1687_v43 = vpop.f32.mrb[11].mxu1 }
 0x11b   :  { %v1688_v45 = vadd.f32 %v1687_v43, %v1686_v41 }
 0x11c   :  { %v1150_v42 = vadd.f32 %v1660_v38, %v1101_v15  ;;  %v1196_v44 = vadd.f32 %v1685_v40, %v1147_v37 }
 0x11e   :  { %v1199_v46 = vadd.f32 %v1688_v45, %v1150_v42  ;;  %v1661_v47 = vpop.f32.mrb[12].mxu0 }
 0x11f   :  { %v1662_v48 = vpop.f32.mrb[13].mxu0  ;;  %v1689_v51 = vpop.f32.mrb[12].mxu1 }
 0x120   :  { %v1663_v49 = vadd.f32 %v1662_v48, %v1661_v47  ;;  %v1664_v50 = vpop.f32.mrb[14].mxu0  ;;  %v1690_v55 = vpop.f32.mrb[13].mxu1 }
 0x121   :  { %v1665_v52 = vpop.f32.mrb[15].mxu0  ;;  %v1691_v56 = vadd.f32 %v1690_v55, %v1689_v51  ;;  %v1692_v57 = vpop.f32.mrb[14].mxu1 }
 0x122   :  { %v1155_v53 = vadd.f32 %v1663_v49, %v1106_v26  ;;  %v1666_v54 = vadd.f32 %v1665_v52, %v1664_v50  ;;  %v1693_v59 = vpop.f32.mrb[15].mxu1 }
 0x123   :  { %v1694_v61 = vadd.f32 %v1693_v59, %v1692_v57 }
 0x124   :  { %v1158_v58 = vadd.f32 %v1666_v54, %v1109_v29  ;;  %v1204_v60 = vadd.f32 %v1691_v56, %v1155_v53 }
 0x126   :  { %v1207_v62 = vadd.f32 %v1694_v61, %v1158_v58 }
 0x136   :  { %v1711_v63 = vpop.f32.mrb[16].mxu0 }
 0x137   :  { %v1712_v0 = vpop.f32.mrb[17].mxu0  ;;  %v1739_v5 = vpop.f32.mrb[16].mxu1 }
 0x138   :  { %v1713_v1 = vadd.f32 %v1712_v0, %v1711_v63  ;;  %v1714_v2 = vpop.f32.mrb[18].mxu0  ;;  %v1740_v7 = vpop.f32.mrb[17].mxu1 }
 0x139   :  { %v1715_v3 = vpop.f32.mrb[19].mxu0  ;;  %v1741_v9 = vadd.f32 %v1740_v7, %v1739_v5  ;;  %v1742_v10 = vpop.f32.mrb[18].mxu1 }
 0x13a   :  { %v1245_v4 = vadd.f32 %v1713_v1, %v1196_v44  ;;  %v1716_v6 = vadd.f32 %v1715_v3, %v1714_v2  ;;  %v1743_v11 = vpop.f32.mrb[19].mxu1  ;;  %v1392_v2 = vlaneseq }
 0x13b   :  { %v1744_v12 = vadd.f32 %v1743_v11, %v1742_v10 }
 0x13c   :  { %v1248_v8 = vadd.f32 %v1716_v6, %v1199_v46  ;;  %v1294_v14 = vadd.f32 %v1741_v9, %v1245_v4  ;;  %v1393_v3 = vshrl.u32 %v1392_v2, 7  ;;  %v1384_v4 = vld [vmem:[%s2419_s2] sm:$0x1] }
 0x13e   :  { %v1717_v13 = vpop.f32.mrb[20].mxu0  ;;  %v1297_v18 = vadd.f32 %v1744_v12, %v1248_v8  ;;  %v1394_v5 = vsub.s32 0, %v1393_v3  ;;  %v1388_v8 = vld [vmem:[%s2420_s3] sm:$0x1] }
 0x13f   :  { %v1718_v15 = vpop.f32.mrb[21].mxu0  ;;  %v1745_v21 = vpop.f32.mrb[20].mxu1 }
 0x140   :  { %v1719_v16 = vadd.f32 %v1718_v15, %v1717_v13  ;;  %v1720_v17 = vpop.f32.mrb[22].mxu0  ;;  %v1746_v23 = vpop.f32.mrb[21].mxu1 }
 0x141   :  { %v1721_v19 = vpop.f32.mrb[23].mxu0  ;;  %v1747_v25 = vadd.f32 %v1746_v23, %v1745_v21  ;;  %v1748_v26 = vpop.f32.mrb[22].mxu1 }
 0x142   :  { %v1253_v20 = vadd.f32 %v1719_v16, %v1204_v60  ;;  %v1722_v22 = vadd.f32 %v1721_v19, %v1720_v17  ;;  %v1749_v27 = vpop.f32.mrb[23].mxu1  ;;  %v1416_v17 = vstv %s2421_s4 }
 0x143   :  { %v1750_v28 = vadd.f32 %v1749_v27, %v1748_v26 }
 0x144   :  { %v1256_v24 = vadd.f32 %v1722_v22, %v1207_v62  ;;  %v1302_v29 = vadd.f32 %v1747_v25, %v1253_v20 }
 0x146   :  { %v1305_v30 = vadd.f32 %v1750_v28, %v1256_v24 }
 0x156   :  { %v1779_v31 = vpop.f32.mrb[24].mxu0 }
 0x157   :  { %v1351_v32 = vadd.f32 %v1779_v31, %v1302_v29  ;;  %v1342_v33 = vpop.f32.mrb[25].mxu0 }
 0x158   :  { %v1343_v34 = vadd.f32 %v1342_v33, %v1294_v14  ;;  %v1780_v35 = vpop.f32.mrb[26].mxu0 }
 0x159   :  { %v1354_v36 = vadd.f32 %v1780_v35, %v1305_v30  ;;  %v1345_v37 = vpop.f32.mrb[27].mxu0  ;;  %v1368_v42 = vmul.f32 %v1351_v32, %v1351_v32 }
 0x15a   :  { %v1346_v38 = vadd.f32 %v1345_v37, %v1297_v18  ;;  %v1366_v39 = vmul.f32 %v1343_v34, %v1343_v34 }
 0x15b   :  { %v1369_v45 = vmul.f32 %v1354_v36, %v1354_v36 }
 0x15c   :  { %v1357_v40 = vadd.f32 %v1346_v38, %v1343_v34  ;;  %v1367_v41 = vmul.f32 %v1346_v38, %v1346_v38 }
 0x15e   :  { %v1358_v43 = vadd.f32 %v1357_v40, %v1351_v32  ;;  %v1370_v44 = vadd.f32 %v1367_v41, %v1366_v39 }
 0x160   :  { %v1359_v46 = vadd.f32 %v1358_v43, %v1354_v36  ;;  %v1371_v47 = vadd.f32 %v1370_v44, %v1368_v42 }
 0x162   :  { %v1360_v48 = vrot.slane %v1359_v46, 4  ;;  %v1372_v49 = vadd.f32 %v1371_v47, %v1369_v45 }
 0x164   :  { %v1361_v50 = vadd.f32 %v1360_v48, %v1359_v46  ;;  %v1373_v51 = vrot.slane %v1372_v49, 4 }
 0x166   :  { %v1362_v52 = vrot.slane %v1361_v50, 2  ;;  %v1374_v53 = vadd.f32 %v1373_v51, %v1372_v49 }
 0x168   :  { %v1363_v54 = vadd.f32 %v1362_v52, %v1361_v50  ;;  %v1375_v55 = vrot.slane %v1374_v53, 2 }
 0x16a   :  { %v1364_v56 = vrot.slane %v1363_v54, 1  ;;  %v1376_v57 = vadd.f32 %v1375_v55, %v1374_v53 }
 0x16c   :  { %v1365_v58 = vadd.f32 %v1364_v56, %v1363_v54  ;;  %v1377_v59 = vrot.slane %v1376_v57, 1 }
 0x16e   :  { %v1378_v60 = vadd.f32 %v1377_v59, %v1376_v57  ;;  %v1380_v61 = vmul.f32 0.03125, %v1365_v58 }
 0x170   :  { %v1381_v62 = vmul.f32 0.03125, %v1378_v60  ;;  %v1382_v63 = vmul.f32 %v1380_v61, %v1380_v61 }
 0x172   :  { %v1383_v0 = vsub.f32 %v1381_v62, %v1382_v63 }
 0x174   :  { %v1385_v1 = vadd.f32 1e-05, %v1383_v0 }
 0x176   :  { %1924 = vrsqrt.f32 %v1385_v1 }
 0x180   :  { %v1925_v6 = vpop.eup %1924 }
 0x181   :  { %v1387_v7 = vmul.f32 %v1925_v6, %v1384_v4 }
 0x183   :  { %v1389_v9 = vmul.f32 %v1387_v7, %v1380_v61  ;;  %v1395_v10 = vrot.slane %v1387_v7, %v1394_v5 }
 0x185   :  { %v1390_v11 = vsub.f32 %v1388_v8, %v1389_v9  ;;  %v1397_v12 = vmul.f32 %v1395_v10, %v1343_v34  ;;  %v1398_v13 = vmul.f32 %v1395_v10, %v1346_v38  ;;  %v1399_v14 = vmul.f32 %v1395_v10, %v1351_v32 }
 0x186   :  { %v1400_v15 = vmul.f32 %v1395_v10, %v1354_v36 }
 0x187   :  { %v1405_v16 = vrot.slane %v1390_v11, %v1394_v5 }
 0x189   :  { %v1407_v18 = vadd.f32 %v1405_v16, %v1397_v12  ;;  %v1408_v19 = vadd.f32 %v1405_v16, %v1398_v13  ;;  %v1409_v20 = vadd.f32 %v1405_v16, %v1399_v14  ;;  %v1410_v21 = vadd.f32 %v1405_v16, %v1400_v15 }
 0x18b   :  { %vm1412_vm0 = vcmp.gt.f32.partialorder %v1407_v18, 0.0  ;;  %vm1413_vm1 = vcmp.gt.f32.partialorder %v1408_v19, 0.0  ;;  %vm1414_vm2 = vcmp.gt.f32.partialorder %v1409_v20, 0.0  ;;  %vm1415_vm3 = vcmp.gt.f32.partialorder %v1410_v21, 0.0 }
 0x18c   :  { %v1417_v22 = vmul.f32 %v1416_v17, %v1407_v18  ;;  %v1418_v23 = vmul.f32 %v1416_v17, %v1408_v19  ;;  %v1419_v24 = vmul.f32 %v1416_v17, %v1409_v20  ;;  %v1420_v25 = vmul.f32 %v1416_v17, %v1410_v21 }
 0x18e   :  { %v1421_v26 = vsel %vm1412_vm0, %v1407_v18, %v1417_v22  ;;  %v1422_v27 = vsel %vm1413_vm1, %v1408_v19, %v1418_v23  ;;  %v1423_v28 = vsel %vm1414_vm2, %v1409_v20, %v1419_v24  ;;  %v1424_v29 = vsel %vm1415_vm3, %v1410_v21, %v1420_v25 }
 0x18f   :  { %1441 = vst [vmem:[%s2418_s5 + $0x19] ss:$8 sps:$4 sm:$0xff] %v1421_v26   ;;  %1443 = vst [vmem:[%s2418_s5 + $0x29] ss:$8 sps:$4 sm:$0xff] %v1422_v27  }
 0x190   :  { %1445 = vst [vmem:[%s2418_s5 + $0x49] ss:$8 sps:$4 sm:$0xff] %v1423_v28   ;;  %1447 = vst [vmem:[%s2418_s5 + $0x59] ss:$8 sps:$4 sm:$0xff] %v1424_v29  }

// kernel: encoder_forward.6
= control target key start
LH: loop header
LB: loop body
LE: loop exit
PB: predicated region body
PF: predicated region fallthrough
CT: control target
= control target key end

     0   :  { %v5734_v3 = vmov 0.0   ;;  %s5889_s29 = smov 0   ;;  %s7219_s1 = inlined_call_operand.vmem [shape: bf16[9,128,128], index: 1, kind: input, shape index: {}]   ;;  %s7220_s4 = inlined_call_operand.vmem [shape: f32[96,1], index: 4, kind: input, shape index: {}]   ;;  %s7221_s5 = inlined_call_operand.<no memory space> [shape: f32[1], index: 5, kind: input, shape index: {}]   ;;  %s7222_s6 = inlined_call_operand.vmem [shape: f32[128,128], index: 6, kind: output, shape index: {}]   ;;  %s7223_s0 = inlined_call_operand.vmem [shape: f32[128,128], index: 0, kind: input, shape index: {}]   ;;  %s7224_s2 = inlined_call_operand.vmem [shape: f32[1,128], index: 2, kind: input, shape index: {}]   ;;  %s7225_s3 = inlined_call_operand.vmem [shape: f32[1,128], index: 3, kind: input, shape index: {}]  }
   0x1   :  { %v5774_v0 = vld [vmem:[%s7220_s4] sm:$0xff]  ;;  %v5779_v1 = vld [vmem:[%s7220_s4 + $0x8] sm:$0xff]  ;;  %v5784_v2 = vld [vmem:[%s7220_s4 + $0x10] sm:$0xff]  ;;  %72 = vst [vmem:[#allocation3] sm:$0xff] %v5734_v3 }
   0x2   :  { %7246 = vst [vmem:[#allocation7_spill] sm:$0xff] %v5774_v0  ;;  %7247 = vst [vmem:[#allocation8_spill] sm:$0xff] %v5779_v1  ;;  %v5789_v4 = vld [vmem:[%s7220_s4 + $0x18] sm:$0xff]  ;;  %v5794_v5 = vld [vmem:[%s7220_s4 + $0x20] sm:$0xff] }
   0x3   :  { %7248 = vst [vmem:[#allocation9_spill] sm:$0xff] %v5784_v2  ;;  %73 = vst [vmem:[#allocation3 + $0x8] sm:$0xff] %v5734_v3  ;;  %v5799_v6 = vld [vmem:[%s7220_s4 + $0x28] sm:$0xff]  ;;  %v5804_v7 = vld [vmem:[%s7220_s4 + $0x30] sm:$0xff] }
   0x4   :  { %86 = vst [vmem:[#allocation3 + $0x70] sm:$0xff] %v5734_v3  ;;  %87 = vst [vmem:[#allocation3 + $0x78] sm:$0xff] %v5734_v3  ;;  %v5809_v8 = vld [vmem:[%s7220_s4 + $0x38] sm:$0xff]  ;;  %v5814_v9 = vld [vmem:[%s7220_s4 + $0x40] sm:$0xff] }
   0x5   :  { %7249 = vst [vmem:[#allocation10_spill] sm:$0xff] %v5789_v4  ;;  %7250 = vst [vmem:[#allocation11_spill] sm:$0xff] %v5794_v5  ;;  %v5819_v10 = vld [vmem:[%s7220_s4 + $0x48] sm:$0xff]  ;;  %v5824_v11 = vld [vmem:[%s7220_s4 + $0x50] sm:$0xff] }
   0x6   :  { %7251 = vst [vmem:[#allocation12_spill] sm:$0xff] %v5799_v6  ;;  %7252 = vst [vmem:[#allocation13_spill] sm:$0xff] %v5804_v7  ;;  %v5829_v12 = vld [vmem:[%s7220_s4 + $0x58] sm:$0xff]  ;;  %v5834_v13 = vld [vmem:[%s7224_s2] sm:$0x1] }
   0x7   :  { %7253 = vst [vmem:[#allocation14_spill] sm:$0xff] %v5809_v8  ;;  %7254 = vst [vmem:[#allocation15_spill] sm:$0xff] %v5814_v9  ;;  %v5839_v14 = vld [vmem:[%s7225_s3] sm:$0x1]  ;;  %v41_v16 = vld [vmem:[%s7223_s0 + $0x8] sm:$0xff] }
   0x8   :  { %7255 = vst [vmem:[#allocation16_spill] sm:$0xff] %v5819_v10  ;;  %7256 = vst [vmem:[#allocation17_spill] sm:$0xff] %v5824_v11  ;;  %v40_v15 = vld [vmem:[%s7223_s0] sm:$0xff]  ;;  %v42_v17 = vld [vmem:[%s7223_s0 + $0x10] sm:$0xff] }
   0x9   :  { %7257 = vst [vmem:[#allocation18_spill] sm:$0xff] %v5829_v12  ;;  %7258 = vst [vmem:[#allocation19_spill] sm:$0xff] %v5834_v13  ;;  %v43_v18 = vld [vmem:[%s7223_s0 + $0x18] sm:$0xff]  ;;  %v44_v19 = vld [vmem:[%s7223_s0 + $0x20] sm:$0xff] }
   0xa   :  { %7259 = vst [vmem:[#allocation20_spill] sm:$0xff] %v5839_v14  ;;  %56 = vst [vmem:[#allocation2] sm:$0xff] %v40_v15  ;;  %v45_v20 = vld [vmem:[%s7223_s0 + $0x28] sm:$0xff]  ;;  %v46_v21 = vld [vmem:[%s7223_s0 + $0x30] sm:$0xff] }
   0xb   :  { %57 = vst [vmem:[#allocation2 + $0x8] sm:$0xff] %v41_v16  ;;  %58 = vst [vmem:[#allocation2 + $0x10] sm:$0xff] %v42_v17  ;;  %v47_v22 = vld [vmem:[%s7223_s0 + $0x38] sm:$0xff]  ;;  %v48_v23 = vld [vmem:[%s7223_s0 + $0x40] sm:$0xff] }
   0xc   :  { %59 = vst [vmem:[#allocation2 + $0x18] sm:$0xff] %v43_v18  ;;  %60 = vst [vmem:[#allocation2 + $0x20] sm:$0xff] %v44_v19  ;;  %v49_v24 = vld [vmem:[%s7223_s0 + $0x48] sm:$0xff]  ;;  %v50_v25 = vld [vmem:[%s7223_s0 + $0x50] sm:$0xff] }
   0xd   :  { %61 = vst [vmem:[#allocation2 + $0x28] sm:$0xff] %v45_v20  ;;  %62 = vst [vmem:[#allocation2 + $0x30] sm:$0xff] %v46_v21  ;;  %v51_v26 = vld [vmem:[%s7223_s0 + $0x58] sm:$0xff]  ;;  %v52_v27 = vld [vmem:[%s7223_s0 + $0x60] sm:$0xff] }
   0xe   :  { %63 = vst [vmem:[#allocation2 + $0x38] sm:$0xff] %v47_v22  ;;  %64 = vst [vmem:[#allocation2 + $0x40] sm:$0xff] %v48_v23  ;;  %v53_v28 = vld [vmem:[%s7223_s0 + $0x68] sm:$0xff]  ;;  %v54_v29 = vld [vmem:[%s7223_s0 + $0x70] sm:$0xff] }
   0xf   :  { %65 = vst [vmem:[#allocation2 + $0x48] sm:$0xff] %v49_v24  ;;  %66 = vst [vmem:[#allocation2 + $0x50] sm:$0xff] %v50_v25  ;;  %v55_v30 = vld [vmem:[%s7223_s0 + $0x78] sm:$0xff] }
  0x10   :  { %67 = vst [vmem:[#allocation2 + $0x58] sm:$0xff] %v51_v26  ;;  %68 = vst [vmem:[#allocation2 + $0x60] sm:$0xff] %v52_v27 }
  0x11   :  { %69 = vst [vmem:[#allocation2 + $0x68] sm:$0xff] %v53_v28  ;;  %70 = vst [vmem:[#allocation2 + $0x70] sm:$0xff] %v54_v29 }
  0x12   :  { %71 = vst [vmem:[#allocation2 + $0x78] sm:$0xff] %v55_v30 }
  0x13 LB: > { %s95_s2 = ssub.s32 0, %s5732_s29  ;;  %p94_p0 = scmp.lt.s32.totalorder %s5732_s29, 0  ;;  %s5732_s29 = sphi %s5889_s29, %s93_s29  }
  0x14   : > { %s4211_s30 = smin.u32 %s5732_s29, %s95_s2 }
  0x15   : > { %5572 = sdivrem.u32 %s4211_s30, 3 }
  0x1e   : > { %s5573_s3 = spop.drf %5572 }
  0x1f   : > { %s99_s7 = ssub.s32 0, %s5573_s3 }
  0x20   : > { %s7311_s7 = smov (!%p94_p0, %s99_s7), %s5573_s3 }
  0x21   : > { %p4212_p1 = scmp.ne.s32.totalorder %s7311_s7, 0 }
  0x22   : > { %v107_v31 = vld [vmem:[#allocation2 + $0x10] sm:$0xff] (!%p4212_p1)  ;;  %v108_v32 = vld [vmem:[#allocation2 + $0x18] sm:$0xff] (!%p4212_p1)  ;;  %v109_v33 = vld [vmem:[#allocation2 + $0x20] sm:$0xff] (!%p4212_p1) }
  0x23   : > { %104 = sbr.rel (%p4212_p1) target bundleno = 42 (0x2a), region = 36  ;;  %123 = vst [vmem:[#allocation4 + $0x10] sm:$0xff] (!%p4212_p1), %v107_v31  ;;  %v110_v34 = vld [vmem:[#allocation2 + $0x28] sm:$0xff] (!%p4212_p1)  ;;  %124 = vst [vmem:[#allocation4 + $0x18] sm:$0xff] (!%p4212_p1), %v108_v32  ;;  %v111_v35 = vld [vmem:[#allocation2 + $0x30] sm:$0xff] (!%p4212_p1) }
  0x24   : > { %125 = vst [vmem:[#allocation4 + $0x20] sm:$0xff] (!%p4212_p1), %v109_v33  ;;  %126 = vst [vmem:[#allocation4 + $0x28] sm:$0xff] (!%p4212_p1), %v110_v34  ;;  %v112_v36 = vld [vmem:[#allocation2 + $0x38] sm:$0xff] (!%p4212_p1)  ;;  %v113_v37 = vld [vmem:[#allocation2 + $0x40] sm:$0xff] (!%p4212_p1) }
  0x25   : > { %127 = vst [vmem:[#allocation4 + $0x30] sm:$0xff] (!%p4212_p1), %v111_v35  ;;  %128 = vst [vmem:[#allocation4 + $0x38] sm:$0xff] (!%p4212_p1), %v112_v36  ;;  %v114_v38 = vld [vmem:[#allocation2 + $0x48] sm:$0xff] (!%p4212_p1)  ;;  %v115_v39 = vld [vmem:[#allocation2 + $0x50] sm:$0xff] (!%p4212_p1) }
  0x26   : > { %129 = vst [vmem:[#allocation4 + $0x40] sm:$0xff] (!%p4212_p1), %v113_v37  ;;  %v116_v40 = vld [vmem:[#allocation2 + $0x58] sm:$0xff] (!%p4212_p1)  ;;  %130 = vst [vmem:[#allocation4 + $0x48] sm:$0xff] (!%p4212_p1), %v114_v38  ;;  %v117_v41 = vld [vmem:[#allocation2 + $0x60] sm:$0xff] (!%p4212_p1) }
  0x27   : > { %131 = vst [vmem:[#allocation4 + $0x50] sm:$0xff] (!%p4212_p1), %v115_v39  ;;  %132 = vst [vmem:[#allocation4 + $0x58] sm:$0xff] (!%p4212_p1), %v116_v40  ;;  %v118_v42 = vld [vmem:[#allocation2 + $0x68] sm:$0xff] (!%p4212_p1) }
  0x28   : > { %133 = vst [vmem:[#allocation4 + $0x60] sm:$0xff] (!%p4212_p1), %v117_v41  ;;  %134 = vst [vmem:[#allocation4 + $0x68] sm:$0xff] (!%p4212_p1), %v118_v42 }
  0x2a PF: > { %v5576_v43 = vld [vmem:[%s7219_s1 + $0x40] sm:$0xff]   ;;  %v5577_v44 = vld [vmem:[%s7219_s1 + $0x48] sm:$0xff]   ;;  %v5578_v45 = vld [vmem:[%s7219_s1 + $0x50] sm:$0xff]   ;;  %vm217_vm0 = vcmask 1043456   ;;  %vm366_vm1 = vsmask.f32 4352 }
  0x2b   : > { %4865 = vmatprep.subr.bf16.mxu0 %v5576_v43  ;;  %v5579_v46 = vld [vmem:[%s7219_s1 + $0x58] sm:$0xff]   ;;  %v137_v47 = vld [vmem:[#allocation2] sm:$0xff]  ;;  %v138_v48 = vld [vmem:[#allocation2 + $0x8] sm:$0xff]  ;;  %vm786_vm2 = vsmask.f32 256  ;;  %p4044_p2 = scmp.eq.s32.totalorder %s7311_s7, 2 }
  0x2c   : > { %4866 = vmatpush3.bf16.msra.mxu0 %v5576_v43  ;;  %v139_v49 = vld [vmem:[#allocation2 + $0x10] sm:$0xff]  ;;  %v140_v50 = vld [vmem:[#allocation2 + $0x18] sm:$0xff]  ;;  %v153_v51 = vpack.c.bf16 %v138_v48, %v137_v47  ;;  %v5580_v53 = vld [vmem:[%s7219_s1 + $0x60] sm:$0xff]   ;;  %vm1143_vm3 = vsmask.f32 7424  ;;  %p4046_p3 = scmp.eq.s32.totalorder %s5732_s29, 14 }
  0x2d   : > { %4867 = vmatprep.subr.bf16.mxu0 %v5577_v44  ;;  %v154_v52 = vpack.c.bf16 %v140_v50, %v139_v49  ;;  %v5581_v54 = vld [vmem:[%s7219_s1 + $0x68] sm:$0xff]   ;;  %v5582_v56 = vld [vmem:[%s7219_s1 + $0x70] sm:$0xff]   ;;  %v141_v58 = vld [vmem:[#allocation2 + $0x20] sm:$0xff]  ;;  %vm582_vm4 = vsmask.f32 3328  ;;  %s93_s29 = sadd.s32 1, %s5732_s29  }
  0x2e   : > { %161 = vst [vmem:[#allocation5] sm:$0xff] %v153_v51  ;;  %v142_v60 = vld [vmem:[#allocation2 + $0x28] sm:$0xff]  ;;  %v149_v61 = vld [vmem:[#allocation2 + $0x60] sm:$0xff]  ;;  %v143_v63 = vld [vmem:[#allocation2 + $0x30] sm:$0xff]  ;;  %s4045_s23 = scalar_select %p4044_p2, 1.0, 0.0 }
  0x2f   : > { %162 = vst [vmem:[#allocation5 + $0x8] sm:$0xff] %v154_v52  ;;  %v219_v55 = vrot.slane %v154_v52, 4  ;;  %v150_v62 = vld [vmem:[#allocation2 + $0x68] sm:$0xff]  ;;  %v144_v16 = vld [vmem:[#allocation2 + $0x38] sm:$0xff]  ;;  %v5928_v17 = vpack.c.bf16 %v142_v60, %v141_v58  ;;  %v5584_v20 = vld [vmem:[%s7219_s1] sm:$0xff]   ;;  %v5958_v34 = vshrl.u32 %v154_v52, 16 }
  0x30   : > { %4868 = vmatpush3.bf16.msra.mxu0 %v5577_v44  ;;  %v5924_v3 = vpack.c.bf16 %v150_v62, %v149_v61  ;;  %v5583_v18 = vld [vmem:[%s7219_s1 + $0x78] sm:$0xff]   ;;  %v5933_v19 = vpack.c.bf16 %v144_v16, %v143_v63  ;;  %v145_v23 = vld [vmem:[#allocation2 + $0x40] sm:$0xff]  ;;  %v146_v24 = vld [vmem:[#allocation2 + $0x48] sm:$0xff]  ;;  %v5960_v35 = vshll.u32 %v154_v52, 16  ;;  %s4047_s24 = scalar_select %p4046_p3, 1.0, 0.0 }
  0x31   : > { %4869 = vmatprep.subr.bf16.mxu0 %v5578_v45  ;;  %v5939_v21 = vrot.slane %v5928_v17, 4  ;;  %v147_v25 = vld [vmem:[#allocation2 + $0x50] sm:$0xff]  ;;  %v148_v26 = vld [vmem:[#allocation2 + $0x58] sm:$0xff]  ;;  %v5585_v28 = vld [vmem:[%s7219_s1 + $0x8] sm:$0xff]   ;;  %v5947_v29 = vpack.c.bf16 %v146_v24, %v145_v23  ;;  %v378_v41 = vrot.slane %v5958_v34, 3  ;;  %v791_v48 = vrot.slane %v5958_v34, 7 }
  0x32   : > { %167 = vst [vmem:[#allocation5 + $0x30] sm:$0xff] %v5924_v3  ;;  %v223_v22 = vrot.slane %v5933_v19, 4  ;;  %v5953_v31 = vpack.c.bf16 %v148_v26, %v147_v25  ;;  %v5586_v33 = vld [vmem:[%s7219_s1 + $0x10] sm:$0xff]   ;;  %v5587_v40 = vld [vmem:[%s7219_s1 + $0x18] sm:$0xff]   ;;  %v381_v44 = vrot.slane %v5960_v35, 4  ;;  %v2158_v49 = vld [vmem:[#allocation3] sm:$0xff] }
  0x33   : > { %v222_v27 = vsel %vm217_vm0, %v219_v55, %v5939_v21  ;;  %v225_v36 = vrot.slane %v5947_v29, 4  ;;  %v5588_v50 = vld [vmem:[%s7219_s1 + $0x20] sm:$0xff]   ;;  %v5987_v51 = vshrl.u32 %v5928_v17, 16  ;;  %v5990_v52 = vshll.u32 %v5928_v17, 16  ;;  %v7262_v2 = vld [vmem:[#allocation9_spill] sm:$0xff]  ;;  %v7263_v1 = vld [vmem:[#allocation8_spill] sm:$0xff] }
  0x34   : > { %4870 = vmatpush3.bf16.msra.mxu0 %v5578_v45  ;;  %v5951_v30 = vsel %vm217_vm0, %v5939_v21, %v223_v22  ;;  %v5965_v38 = vrot.slane %v5953_v31, 4  ;;  %v5999_v62 = vshll.u32 %v5933_v19, 16  ;;  %v6003_v16 = vshrl.u32 %v5947_v29, 16  ;;  %v7261_v0 = vld [vmem:[#allocation7_spill] sm:$0xff]  ;;  %v7264_v4 = vld [vmem:[#allocation10_spill] sm:$0xff]  ;;  %v7266_v6 = vld [vmem:[#allocation12_spill] sm:$0xff] }
  0x35   : > { %4871 = vmatprep.subr.bf16.mxu0 %v5579_v46  ;;  %v5921_v57 = vld [vmem:[#allocation5] sm:$0xf0]  ;;  %v5972_v42 = vsel %vm217_vm0, %v223_v22, %v225_v36  ;;  %v6012_v24 = vshrl.u32 %v5953_v31, 16  ;;  %v7267_v7 = vld [vmem:[#allocation13_spill] sm:$0xff]  ;;  %v7268_v8 = vld [vmem:[#allocation14_spill] sm:$0xff]  ;;  %p90_p4 = scmp.ge.s32.totalorder %s93_s29, 15  }
  0x36   : > { %v218_v59 = vrot.slane %v5921_v57, 4  ;;  %v169_v32 = vld [vmem:[#allocation5] sm:$0xf8]  ;;  %v5977_v45 = vsel %vm217_vm0, %v225_v36, %v5965_v38  ;;  %v6027_v36 = vshll.u32 %v5953_v31, 16  ;;  %v7270_v10 = vld [vmem:[#allocation16_spill] sm:$0xff]  ;;  %v7271_v11 = vld [vmem:[#allocation17_spill] sm:$0xff] }
  0x37   : > { %v368_v37 = vshrl.u32 %v169_v32, 16  ;;  %v371_v39 = vshll.u32 %v169_v32, 16  ;;  %v7265_v5 = vld [vmem:[#allocation11_spill] sm:$0xff]  ;;  %v7272_v12 = vld [vmem:[#allocation18_spill] sm:$0xff]  ;;  %v7287_v14 = vld [vmem:[#allocation20_spill] sm:$0xff] }
  0x38   : > { %4872 = vmatpush3.bf16.msra.mxu0 %v5579_v46  ;;  %v220_v15 = vsel %vm217_vm0, %v218_v59, %v219_v55  ;;  %v792_v55 = vor.u32 %v791_v48, %v5960_v35  ;;  %v382_v59 = vor.u32 %v381_v44, %v378_v41  ;;  %v5590_v44 = vld [vmem:[%s7219_s1 + $0x30] sm:$0xff]   ;;  %v7269_v9 = vld [vmem:[#allocation15_spill] sm:$0xff] }
  0x39   : > { %4873 = vmatprep.subr.bf16.mxu0 %v5580_v53  ;;  %4881 = vmatprep.mubr.bf16.mxu0 %v220_v15  ;;  %v370_v43 = vrot.slane %v368_v37, 3  ;;  %v5979_v46 = vld [vmem:[#allocation5 + $0x30] sm:$0xf]  ;;  %v373_v47 = vrot.slane %v371_v39, 4  ;;  %v794_v15 = vrot.slane %v5987_v51, 7  ;;  %v7226_v39 = vrot.slane %v6012_v24, 7 }
  0x3a   : > { %v229_v58 = vrot.slane %v5979_v46, 4  ;;  %v7286_v13 = vld [vmem:[#allocation19_spill] sm:$0xff] }
  0x3b   : > { %v374_v61 = vor.u32 %v373_v47, %v370_v43  ;;  %v795_v22 = vor.u32 %v794_v15, %v5990_v52  ;;  %v804_v43 = vor.u32 %v7226_v39, %v6027_v36 }
  0x3c   : > { %4874 = vmatpush3.bf16.msra.mxu0 %v5580_v53  ;;  %v5993_v53 = vshrl.u32 %v5933_v19, 16  ;;  %v230_v23 = vsel %vm217_vm0, %v5965_v38, %v229_v58  ;;  %v405_v58 = vrot.slane %v6003_v16, 3 }
  0x3d   : > { %4875 = vmatprep.subr.bf16.mxu0 %v5581_v54  ;;  %v6023_v32 = vsel %vm786_vm2, %v791_v48, %v795_v22 }
  0x3e   : > { %v797_v26 = vrot.slane %v5993_v53, 7 }
  0x40   : > { %4876 = vmatpush3.bf16.msra.mxu0 %v5581_v54  ;;  %v767_v54 = vld [vmem:[#allocation5] sm:$0x80]  ;;  %v798_v37 = vor.u32 %v797_v26, %v5999_v62 }
  0x41   : > { %4877 = vmatprep.subr.bf16.mxu0 %v5582_v56  ;;  %v788_v60 = vshrl.u32 %v767_v54, 16  ;;  %v5591_v54 = vld [vmem:[%s7219_s1 + $0x38] sm:$0xff]  }
  0x42   : > { %v6033_v41 = vsel %vm786_vm2, %v794_v15, %v798_v37  ;;  %v414_v15 = vrot.slane %v6012_v24, 3  ;;  %v584_v37 = vshrl.u32 %v5921_v57, 16 }
  0x44   : > { %4878 = vmatpush3.bf16.msra.mxu0 %v5582_v56  ;;  %v2159_v56 = vld [vmem:[#allocation3 + $0x8] sm:$0xff] }
  0x45   : > { %4879 = vmatprep.subr.bf16.mxu0 %v5583_v18  ;;  %v2174_v63 = vpack.c.bf16 %v2159_v56, %v2158_v49  ;;  %v387_v49 = vrot.slane %v5987_v51, 3  ;;  %v399_v56 = vrot.slane %v5999_v62, 4 }
  0x47   : > { %2182 = vst [vmem:[#allocation5] sm:$0xff] %v2174_v63 }
  0x48   : > { %4880 = vmatpush3.bf16.msra.mxu0 %v5583_v18  ;;  %v790_v18 = vrot.slane %v788_v60, 7  ;;  %v5592_v60 = vld [vmem:[%s7219_s1 + $0x80] sm:$0xff]  }
  0x49   : > { %4893 = vmatprep.subr.bf16.mxu0 %v5584_v20 }
  0x4a   : > { %v6015_v25 = vsel %vm786_vm2, %v790_v18, %v792_v55  ;;  %v396_v55 = vrot.slane %v5993_v53, 3  ;;  %v421_v18 = vshrl.u32 %v5979_v46, 16 }
  0x4b   : > { %4882 = vmatmul.mubr.bf16.vlgmr.msra.gmra.mrb[0].mxu0 %v222_v27  ;;  %v383_v27 = vsel %vm366_vm1, %v374_v61, %v382_v59 }
  0x4c   : > { %4894 = vmatpush3.bf16.msra.mxu0 %v5584_v20  ;;  %4885 = vmatprep.mubr.bf16.mxu0 %v5951_v30  ;;  %v5589_v20 = vld [vmem:[%s7219_s1 + $0x28] sm:$0xff]   ;;  %v400_v22 = vor.u32 %v399_v56, %v396_v55  ;;  %v1162_v55 = vrot.slane %v5999_v62, 1 }
  0x4d   : > { %4895 = vmatprep.subr.bf16.mxu0 %v5585_v28 }
  0x50   : > { %4896 = vmatpush3.bf16.msra.mxu0 %v5585_v28  ;;  %v6020_v28 = vshll.u32 %v5947_v29, 16 }
  0x51   : > { %4897 = vmatprep.subr.bf16.mxu0 %v5586_v33 }
  0x52   : > { %v408_v63 = vrot.slane %v6020_v28, 4 }
  0x53   : > { %4886 = vmatmul.mubr.bf16.gmra.mrb[4].mxu0 %v5972_v42 }
  0x54   : > { %4898 = vmatpush3.bf16.msra.mxu0 %v5586_v33  ;;  %4889 = vmatprep.mubr.bf16.mxu0 %v5977_v45  ;;  %v800_v33 = vrot.slane %v6003_v16, 7 }
  0x55   : > { %4899 = vmatprep.subr.bf16.mxu0 %v5587_v40 }
  0x56   : > { %v6045_v48 = vsel %vm786_vm2, %v800_v33, %v804_v43  ;;  %v423_v43 = vrot.slane %v421_v18, 3  ;;  %v409_v18 = vor.u32 %v408_v63, %v405_v58 }
  0x58   : > { %4900 = vmatpush3.bf16.msra.mxu0 %v5587_v40  ;;  %v801_v40 = vor.u32 %v800_v33, %v6020_v28  ;;  %v5593_v33 = vld [vmem:[%s7219_s1 + $0x88] sm:$0xff]  }
  0x59   : > { %4901 = vmatprep.subr.bf16.mxu0 %v5588_v50 }
  0x5a   : > { %v6042_v47 = vsel %vm786_vm2, %v797_v26, %v801_v40  ;;  %v1149_v26 = vrot.slane %v5960_v35, 1  ;;  %v1154_v40 = vrot.slane %v5990_v52, 1 }
  0x5b   : > { %4890 = vmatmul.mubr.bf16.gmra.mrb[8].mxu0 %v230_v23  ;;  %v417_v23 = vrot.slane %v6027_v36, 4 }
  0x5c   : > { %4902 = vmatpush3.bf16.msra.mxu0 %v5588_v50  ;;  %4909 = vmatprep.mubr.bf16.mxu0 %v383_v27  ;;  %v390_v50 = vrot.slane %v5990_v52, 4 }
  0x5d   : > { %4903 = vmatprep.subr.bf16.mxu0 %v5589_v20  ;;  %v6092_v39 = vor.u32 %v417_v23, %v414_v15  ;;  %v151_v15 = vld [vmem:[#allocation2 + $0x70] sm:$0xff] }
  0x5e   : > { %v6058_v61 = vor.u32 %v390_v50, %v387_v49  ;;  %v1158_v50 = vor.u32 %v1154_v40, %v5987_v51 }
  0x5f   : > { %v6103_v58 = vsel %vm366_vm1, %v409_v18, %v6092_v39 }
  0x60   : > { %4904 = vmatpush3.bf16.msra.mxu0 %v5589_v20  ;;  %v424_v20 = vshll.u32 %v5979_v46, 16  ;;  %v392_v27 = vsel %vm366_vm1, %v382_v59, %v6058_v61  ;;  %v587_v46 = vshll.u32 %v5921_v57, 16  ;;  %v6077_v49 = vsel %vm366_vm1, %v6058_v61, %v400_v22  ;;  %v5594_v57 = vld [vmem:[%s7219_s1 + $0x90] sm:$0xff]  }
  0x61   : > { %4905 = vmatprep.subr.bf16.mxu0 %v5590_v44 }
  0x62   : > { %v426_v59 = vrot.slane %v424_v20, 4  ;;  %v586_v20 = vrot.slane %v584_v37, 4  ;;  %v1170_v37 = vrot.slane %v6020_v28, 1 }
  0x64   : > { %4906 = vmatpush3.bf16.msra.mxu0 %v5590_v44  ;;  %v1150_v44 = vor.u32 %v1149_v26, %v5958_v34  ;;  %v591_v26 = vrot.slane %v5958_v34, 4  ;;  %v5596_v34 = vld [vmem:[%s7219_s1 + $0xa0] sm:$0xff]   ;;  %v427_v63 = vor.u32 %v426_v59, %v423_v43  ;;  %v5597_v43 = vld [vmem:[%s7219_s1 + $0xa8] sm:$0xff]  }
  0x65   : > { %4907 = vmatprep.subr.bf16.mxu0 %v5591_v54 }
  0x66   : > { %v6082_v56 = vsel %vm1143_vm3, %v1150_v44, %v1154_v40  ;;  %v6098_v40 = vsel %vm366_vm1, %v400_v22, %v409_v18  ;;  %v589_v44 = vrot.slane %v587_v46, 5  ;;  %v152_v22 = vld [vmem:[#allocation2 + $0x78] sm:$0xff]  ;;  %v428_v46 = vsel %vm366_vm1, %v6092_v39, %v427_v63 }
  0x67   : > { %v1178_v18 = vrot.slane %v6027_v36, 1 }
  0x68   : > { %4908 = vmatpush3.bf16.msra.mxu0 %v5591_v54  ;;  %v6088_v54 = vsel %vm1143_vm3, %v1158_v50, %v1162_v55  ;;  %v1166_v50 = vor.u32 %v1162_v55, %v5993_v53  ;;  %v5598_v55 = vld [vmem:[%s7219_s1 + $0xb0] sm:$0xff]  }
  0x69   : > { %4921 = vmatprep.subr.bf16.mxu0 %v5592_v60  ;;  %v6135_v63 = vor.u32 %v1178_v18, %v6012_v24 }
  0x6b   : > { %4910 = vmatmul.mubr.bf16.vlgmr.msra.gmra.mrb[0].mxu0 %v392_v27  ;;  %v5595_v27 = vld [vmem:[%s7219_s1 + $0x98] sm:$0xff]  }
  0x6c   : > { %4922 = vmatpush3.bf16.msra.mxu0 %v5592_v60  ;;  %4913 = vmatprep.mubr.bf16.mxu0 %v6077_v49  ;;  %v592_v60 = vrot.slane %v5960_v35, 5  ;;  %v590_v35 = vor.u32 %v589_v44, %v586_v20  ;;  %v6121_v20 = vsel %vm1143_vm3, %v1166_v50, %v1170_v37  ;;  %v595_v44 = vrot.slane %v5987_v51, 4  ;;  %v564_v50 = vld [vmem:[#allocation5 + $0x30] sm:$0x1f] }
  0x6d   : > { %4923 = vmatprep.subr.bf16.mxu0 %v5593_v33  ;;  %v604_v51 = vrot.slane %v6020_v28, 5  ;;  %v5602_v28 = vld [vmem:[%s7219_s1 + $0xd0] sm:$0xff]  }
  0x6e   : > { %v593_v23 = vor.u32 %v592_v60, %v591_v26  ;;  %v596_v60 = vrot.slane %v5990_v52, 5 }
  0x70   : > { %4924 = vmatpush3.bf16.msra.mxu0 %v5593_v33  ;;  %v160_v33 = vpack.c.bf16 %v152_v22, %v151_v15  ;;  %v594_v59 = vsel %vm582_vm4, %v590_v35, %v593_v23  ;;  %v600_v15 = vrot.slane %v5999_v62, 5  ;;  %v5600_v22 = vld [vmem:[%s7219_s1 + $0xc0] sm:$0xff]   ;;  %v6142_v35 = vor.u32 %v596_v60, %v595_v44 }
  0x71   : > { %4925 = vmatprep.subr.bf16.mxu0 %v5594_v57  ;;  %v5604_v60 = vld [vmem:[%s7219_s1 + $0xe0] sm:$0xff]  }
  0x72   : > { %168 = vst [vmem:[#allocation5 + $0x38] sm:$0xff] %v160_v33  ;;  %v603_v33 = vrot.slane %v6003_v16, 4  ;;  %v598_v62 = vsel %vm582_vm4, %v593_v23, %v6142_v35  ;;  %v5603_v23 = vld [vmem:[%s7219_s1 + $0xd8] sm:$0xff]  }
  0x73   : > { %4914 = vmatmul.mubr.bf16.gmra.mrb[4].mxu0 %v6098_v40 }
  0x74   : > { %4926 = vmatpush3.bf16.msra.mxu0 %v5594_v57  ;;  %4917 = vmatprep.mubr.bf16.mxu0 %v6103_v58  ;;  %v1174_v57 = vor.u32 %v1170_v37, %v6003_v16  ;;  %v607_v37 = vrot.slane %v6012_v24, 4 }
  0x75   : > { %4927 = vmatprep.subr.bf16.mxu0 %v5595_v27 }
  0x76   : > { %v6124_v26 = vsel %vm1143_vm3, %v1174_v57, %v1178_v18 }
  0x78   : > { %4928 = vmatpush3.bf16.msra.mxu0 %v5595_v27  ;;  %v5599_v27 = vld [vmem:[%s7219_s1 + $0xb8] sm:$0xff]  }
  0x79   : > { %4929 = vmatprep.subr.bf16.mxu0 %v5596_v34 }
  0x7b   : > { %4918 = vmatmul.mubr.bf16.gmra.mrb[8].mxu0 %v428_v46  ;;  %v608_v46 = vrot.slane %v6027_v36, 5  ;;  %v605_v36 = vor.u32 %v604_v51, %v603_v33  ;;  %v5606_v33 = vld [vmem:[%s7219_s1 + $0xf0] sm:$0xff]   ;;  %v5607_v51 = vld [vmem:[%s7219_s1 + $0xf8] sm:$0xff]  }
  0x7c   : > { %4930 = vmatpush3.bf16.msra.mxu0 %v5596_v34  ;;  %4937 = vmatprep.mubr.bf16.mxu0 %v594_v59  ;;  %v599_v34 = vrot.slane %v5993_v53, 4  ;;  %v5601_v53 = vld [vmem:[%s7219_s1 + $0xc8] sm:$0xff]   ;;  %v615_v59 = vshll.u32 %v564_v50, 16 }
  0x7d   : > { %4931 = vmatprep.subr.bf16.mxu0 %v5597_v43  ;;  %v6161_v57 = vor.u32 %v608_v46, %v607_v37  ;;  %v5610_v37 = vld [vmem:[%s7219_s1 + $0x110] sm:$0xff]   ;;  %v6202_v46 = vshrl.u32 %v5924_v3, 16 }
  0x7e   : > { %v601_v52 = vor.u32 %v600_v15, %v599_v34  ;;  %v5605_v15 = vld [vmem:[%s7219_s1 + $0xe8] sm:$0xff]  }
  0x7f   : > { %v6171_v44 = vsel %vm582_vm4, %v605_v36, %v6161_v57 }
  0x80   : > { %4932 = vmatpush3.bf16.msra.mxu0 %v5597_v43  ;;  %v6155_v16 = vsel %vm582_vm4, %v6142_v35, %v601_v52  ;;  %v612_v43 = vshrl.u32 %v564_v50, 16  ;;  %v6167_v18 = vsel %vm582_vm4, %v601_v52, %v605_v36  ;;  %v5608_v52 = vld [vmem:[%s7219_s1 + $0x100] sm:$0xff]   ;;  %v5614_v36 = vld [vmem:[%s7219_s1 + $0x130] sm:$0xff]  }
  0x81   : > { %4933 = vmatprep.subr.bf16.mxu0 %v5598_v55  ;;  %v5612_v50 = vld [vmem:[%s7219_s1 + $0x120] sm:$0xff]  }
  0x84   : > { %4934 = vmatpush3.bf16.msra.mxu0 %v5598_v55  ;;  %v614_v55 = vrot.slane %v612_v43, 4  ;;  %v5616_v43 = vld [vmem:[%s7219_s1 + $0x140] sm:$0xff]  }
  0x85   : > { %4935 = vmatprep.subr.bf16.mxu0 %v5599_v27 }
  0x88   : > { %4936 = vmatpush3.bf16.msra.mxu0 %v5599_v27  ;;  %v617_v27 = vrot.slane %v615_v59, 5  ;;  %v5617_v59 = vld [vmem:[%s7219_s1 + $0x148] sm:$0xff]  }
  0x89   : > { %4949 = vmatprep.subr.bf16.mxu0 %v5600_v22 }
  0x8a   : > { %v618_v34 = vor.u32 %v617_v27, %v614_v55  ;;  %v5619_v55 = vld [vmem:[%s7219_s1 + $0x158] sm:$0xff]   ;;  %v6251_v27 = vld [vmem:[#allocation5 + $0x30] sm:$0xff] }
  0x8b   : > { %4938 = vmatmul.mubr.bf16.vlgmr.msra.gmra.mrb[0].mxu0 %v598_v62  ;;  %v6206_v62 = vshll.u32 %v5924_v3, 16  ;;  %v7260_v3 = vrot.slane %v6012_v24, 7  ;;  %v5615_v24 = vld [vmem:[%s7219_s1 + $0x138] sm:$0xff]  }
  0x8c   : > { %4950 = vmatpush3.bf16.msra.mxu0 %v5600_v22  ;;  %4941 = vmatprep.mubr.bf16.mxu0 %v6155_v16  ;;  %v619_v22 = vsel %vm582_vm4, %v6161_v57, %v618_v34 }
  0x8d   : > { %4951 = vmatprep.subr.bf16.mxu0 %v5601_v53 }
  0x90   : > { %4952 = vmatpush3.bf16.msra.mxu0 %v5601_v53  ;;  %v809_v53 = vrot.slane %v6202_v46, 7 }
  0x91   : > { %4953 = vmatprep.subr.bf16.mxu0 %v5602_v28 }
  0x93   : > { %4942 = vmatmul.mubr.bf16.gmra.mrb[4].mxu0 %v6167_v18 }
  0x94   : > { %4954 = vmatpush3.bf16.msra.mxu0 %v5602_v28  ;;  %4945 = vmatprep.mubr.bf16.mxu0 %v6171_v44 }
  0x95   : > { %4955 = vmatprep.subr.bf16.mxu0 %v5603_v23 }
  0x98   : > { %4956 = vmatpush3.bf16.msra.mxu0 %v5603_v23  ;;  %v5618_v23 = vld [vmem:[%s7219_s1 + $0x150] sm:$0xff]  }
  0x99   : > { %4957 = vmatprep.subr.bf16.mxu0 %v5604_v60 }
  0x9b   : > { %4946 = vmatmul.mubr.bf16.gmra.mrb[8].mxu0 %v619_v22  ;;  %v6258_v22 = vld [vmem:[#allocation5 + $0x38] sm:$0xf] }
  0x9c   : > { %4958 = vmatpush3.bf16.msra.mxu0 %v5604_v60  ;;  %4965 = vmatprep.mubr.bf16.mxu0 %v6015_v25  ;;  %v5609_v25 = vld [vmem:[%s7219_s1 + $0x108] sm:$0xff]   ;;  %v2172_v60 = vld [vmem:[#allocation3 + $0x70] sm:$0xff] }
  0x9d   : > { %4959 = vmatprep.subr.bf16.mxu0 %v5605_v15 }
  0xa0   : > { %4960 = vmatpush3.bf16.msra.mxu0 %v5605_v15  ;;  %v1125_v15 = vld [vmem:[#allocation5 + $0x38] sm:$0x1] }
  0xa1   : > { %4961 = vmatprep.subr.bf16.mxu0 %v5606_v33 }
  0xa4   : > { %4962 = vmatpush3.bf16.msra.mxu0 %v5606_v33  ;;  %v6260_v33 = vld [vmem:[#allocation5 + $0x38] sm:$0x1f] }
  0xa5   : > { %4963 = vmatprep.subr.bf16.mxu0 %v5607_v51 }
  0xa8   : > { %4964 = vmatpush3.bf16.msra.mxu0 %v5607_v51  ;;  %v5735_v51 = vmov 0  }
  0xa9   : > { %4977 = vmatprep.subr.bf16.mxu0 %v5608_v52  ;;  %5574 = vset.pattern.permute.xlu0 %v5735_v51 }
  0xaa   : > { %1935 = vperm.xlu0 %5574, %v7261_v0   ;;  %5575 = vset.pattern.permute.xlu1 %v5735_v51 }
  0xab   : > { %4966 = vmatmul.mubr.bf16.vlgmr.msra.gmra.mrb[0].mxu0 %v6023_v32  ;;  %v5611_v32 = vld [vmem:[%s7219_s1 + $0x118] sm:$0xff]   ;;  %1945 = vperm.xlu1 %5575, %v7262_v2  }
  0xac   : > { %4978 = vmatpush3.bf16.msra.mxu0 %v5608_v52  ;;  %4969 = vmatprep.mubr.bf16.mxu0 %v6033_v41  ;;  %v812_v41 = vor.u32 %v6206_v62, %v809_v53  ;;  %v5624_v52 = vld [vmem:[%s7219_s1 + $0x180] sm:$0xff]   ;;  %v5626_v53 = vld [vmem:[%s7219_s1 + $0x190] sm:$0xff]  }
  0xad   : > { %4979 = vmatprep.subr.bf16.mxu0 %v5609_v25 }
  0xae   : > { %v813_v28 = vsel %vm786_vm2, %v7260_v3, %v812_v41  ;;  %1940 = vperm.xlu0 %5574, %v7263_v1  }
  0xaf   : > { %1950 = vperm.xlu1 %5575, %v7264_v4  }
  0xb0   : > { %4980 = vmatpush3.bf16.msra.mxu0 %v5609_v25  ;;  %v5625_v25 = vld [vmem:[%s7219_s1 + $0x188] sm:$0xff]  }
  0xb1   : > { %4981 = vmatprep.subr.bf16.mxu0 %v5610_v37 }
  0xb2   : > { %1955 = vperm.xlu0 %5574, %v7265_v5  }
  0xb3   : > { %4970 = vmatmul.mubr.bf16.gmra.mrb[4].mxu0 %v6042_v47  ;;  %v5613_v47 = vld [vmem:[%s7219_s1 + $0x128] sm:$0xff]   ;;  %1960 = vperm.xlu1 %5575, %v7266_v6  }
  0xb4   : > { %4982 = vmatpush3.bf16.msra.mxu0 %v5610_v37  ;;  %4973 = vmatprep.mubr.bf16.mxu0 %v6045_v48  ;;  %v5724_v48 = vld [vmem:[#allocation5 + $0x8] sm:$0xff] }
  0xb5   : > { %4983 = vmatprep.subr.bf16.mxu0 %v5611_v32  ;;  %v1343_v37 = vld [vmem:[#allocation5 + $0x8] sm:$0xf8] }
  0xb6   : > { %1965 = vperm.xlu0 %5574, %v7267_v7   ;;  %v1363_v41 = vshrl.u32 %v1343_v37, 16 }
  0xb7   : > { %1970 = vperm.xlu1 %5575, %v7268_v8  }
  0xb8   : > { %4984 = vmatpush3.bf16.msra.mxu0 %v5611_v32  ;;  %v1186_v32 = vrot.slane %v6206_v62, 1 }
  0xb9   : > { %4985 = vmatprep.subr.bf16.mxu0 %v5612_v50 }
  0xba   : > { %1975 = vperm.xlu0 %5574, %v7269_v9   ;;  %v1187_v3 = vsel %vm1143_vm3, %v6135_v63, %v1186_v32 }
  0xbb   : > { %4974 = vmatmul.mubr.bf16.gmra.mrb[8].mxu0 %v813_v28  ;;  %1980 = vperm.xlu1 %5575, %v7270_v10   ;;  %v1365_v28 = vrot.slane %v1363_v41, 3  ;;  %v5638_v41 = vld [vmem:[%s7219_s1 + $0x1f0] sm:$0xff]  }
  0xbc   : > { %4986 = vmatpush3.bf16.msra.mxu0 %v5612_v50  ;;  %4993 = vmatprep.mubr.bf16.mxu0 %v5724_v48  ;;  %v1366_v50 = vshll.u32 %v1343_v37, 16  ;;  %v1190_v48 = vor.u32 %v1186_v32, %v6202_v46  ;;  %v5636_v37 = vld [vmem:[%s7219_s1 + $0x1e0] sm:$0xff]  }
  0xbd   : > { %4987 = vmatprep.subr.bf16.mxu0 %v5613_v47 }
  0xbe   : > { %1985 = vperm.xlu0 %5574, %v7271_v11  }
  0xbf   : > { %1990 = vperm.xlu1 %5575, %v7272_v12  }
  0xc0   : > { %4988 = vmatpush3.bf16.msra.mxu0 %v5613_v47  ;;  %v1368_v47 = vrot.slane %v1366_v50, 4  ;;  %v5639_v50 = vld [vmem:[%s7219_s1 + $0x1f8] sm:$0xff]  }
  0xc1   : > { %4989 = vmatprep.subr.bf16.mxu0 %v5614_v36 }
  0xc4   : > { %4990 = vmatpush3.bf16.msra.mxu0 %v5614_v36 }
  0xc5   : > { %4991 = vmatprep.subr.bf16.mxu0 %v5615_v24 }
  0xc8   : > { %4992 = vmatpush3.bf16.msra.mxu0 %v5615_v24  ;;  %v5628_v24 = vld [vmem:[%s7219_s1 + $0x1a0] sm:$0xff]  }
  0xc9   : > { %5005 = vmatprep.subr.bf16.mxu0 %v5616_v43 }
  0xcb   : > { %4994 = vmatmul.mubr.bf16.vlgmr.msra.gmra.mrb[0].mxu0 %v5928_v17  ;;  %v5620_v17 = vld [vmem:[%s7219_s1 + $0x160] sm:$0xff]  }
  0xcc   : > { %5006 = vmatpush3.bf16.msra.mxu0 %v5616_v43  ;;  %4997 = vmatprep.mubr.bf16.mxu0 %v5933_v19  ;;  %v5621_v19 = vld [vmem:[%s7219_s1 + $0x168] sm:$0xff]   ;;  %v1369_v43 = vor.u32 %v1368_v47, %v1365_v28 }
  0xcd   : > { %5007 = vmatprep.subr.bf16.mxu0 %v5617_v59 }
  0xd0   : > { %5008 = vmatpush3.bf16.msra.mxu0 %v5617_v59  ;;  %v1373_v59 = vsel %vm366_vm1, %v1369_v43, %v6058_v61  ;;  %v5632_v61 = vld [vmem:[%s7219_s1 + $0x1c0] sm:$0xff]  }
  0xd1   : > { %5009 = vmatprep.subr.bf16.mxu0 %v5618_v23 }
  0xd3   : > { %4998 = vmatmul.mubr.bf16.gmra.mrb[4].mxu0 %v5947_v29  ;;  %v2173_v29 = vld [vmem:[#allocation3 + $0x78] sm:$0xff] }
  0xd4   : > { %5010 = vmatpush3.bf16.msra.mxu0 %v5618_v23  ;;  %5001 = vmatprep.mubr.bf16.mxu0 %v5953_v31  ;;  %v5622_v31 = vld [vmem:[%s7219_s1 + $0x170] sm:$0xff]   ;;  %v2181_v34 = vpack.c.bf16 %v2173_v29, %v2172_v60  ;;  %v1387_v60 = vrot.slane %v6206_v62, 4  ;;  %v1391_v29 = vshrl.u32 %v6258_v22, 16 }
  0xd5   : > { %5011 = vmatprep.subr.bf16.mxu0 %v5619_v55  ;;  %v5630_v23 = vld [vmem:[%s7219_s1 + $0x1b0] sm:$0xff]  }
  0xd6   : > { %2189 = vst [vmem:[#allocation5 + $0x38] sm:$0xff] %v2181_v34  ;;  %v5634_v34 = vld [vmem:[%s7219_s1 + $0x1d0] sm:$0xff]   ;;  %v1393_v51 = vrot.slane %v1391_v29, 3  ;;  %v5653_v29 = vld [vmem:[%s7219_s1 + $0x68] sm:$0xff]  }
  0xd8   : > { %5012 = vmatpush3.bf16.msra.mxu0 %v5619_v55  ;;  %v5631_v55 = vld [vmem:[%s7219_s1 + $0x1b8] sm:$0xff]  }
  0xd9   : > { %5013 = vmatprep.subr.bf16.mxu0 %v5620_v17 }
  0xdb   : > { %5002 = vmatmul.mubr.bf16.gmra.mrb[8].mxu0 %v6251_v27 }
  0xdc   : > { %5014 = vmatpush3.bf16.msra.mxu0 %v5620_v17  ;;  %5021 = vmatprep.mubr.bf16.mxu0 %v6082_v56  ;;  %v5623_v56 = vld [vmem:[%s7219_s1 + $0x178] sm:$0xff]   ;;  %v5633_v17 = vld [vmem:[%s7219_s1 + $0x1c8] sm:$0xff]  }
  0xdd   : > { %5015 = vmatprep.subr.bf16.mxu0 %v5621_v19 }
  0xe0   : > { %5016 = vmatpush3.bf16.msra.mxu0 %v5621_v19  ;;  %v1386_v19 = vrot.slane %v6202_v46, 3 }
  0xe1   : > { %5017 = vmatprep.subr.bf16.mxu0 %v5622_v31 }
  0xe4   : > { %5018 = vmatpush3.bf16.msra.mxu0 %v5622_v31  ;;  %v1394_v31 = vshll.u32 %v6258_v22, 16 }
  0xe5   : > { %5019 = vmatprep.subr.bf16.mxu0 %v5623_v56 }
  0xe8   : > { %5020 = vmatpush3.bf16.msra.mxu0 %v5623_v56  ;;  %v1396_v56 = vrot.slane %v1394_v31, 4  ;;  %v5654_v31 = vld [vmem:[%s7219_s1 + $0x70] sm:$0xff]  }
  0xe9   : > { %5033 = vmatprep.subr.bf16.mxu0 %v5624_v52 }
  0xeb   : > { %5022 = vmatmul.mubr.bf16.vlgmr.msra.gmra.mrb[0].mxu0 %v6088_v54  ;;  %v1192_v54 = vshll.u32 %v1125_v15, 16  ;;  %v1388_v15 = vor.u32 %v1387_v60, %v1386_v19 }
  0xec   : > { %5034 = vmatpush3.bf16.msra.mxu0 %v5624_v52  ;;  %5025 = vmatprep.mubr.bf16.mxu0 %v6121_v20  ;;  %v5627_v20 = vld [vmem:[%s7219_s1 + $0x198] sm:$0xff]   ;;  %v1546_v52 = vld [vmem:[#allocation5 + $0x8] sm:$0xf0] }
  0xed   : > { %5035 = vmatprep.subr.bf16.mxu0 %v5625_v25  ;;  %v1194_v36 = vrot.slane %v1192_v54, 1  ;;  %v5641_v54 = vld [vmem:[%s7219_s1 + $0x208] sm:$0xff]   ;;  %v1750_v28 = vshrl.u32 %v1546_v52, 16  ;;  %v1753_v47 = vshll.u32 %v1546_v52, 16 }
  0xef   : > { %v1195_v63 = vsel %vm1143_vm3, %v1190_v48, %v1194_v36  ;;  %v5643_v48 = vld [vmem:[%s7219_s1 + $0x218] sm:$0xff]   ;;  %v1752_v36 = vrot.slane %v1750_v28, 4 }
  0xf0   : > { %5036 = vmatpush3.bf16.msra.mxu0 %v5625_v25  ;;  %v1397_v25 = vor.u32 %v1396_v56, %v1393_v51 }
  0xf1   : > { %5037 = vmatprep.subr.bf16.mxu0 %v5626_v53 }
  0xf2   : > { %v1398_v32 = vsel %vm366_vm1, %v1388_v15, %v1397_v25 }
  0xf3   : > { %5026 = vmatmul.mubr.bf16.gmra.mrb[4].mxu0 %v6124_v26  ;;  %v5629_v26 = vld [vmem:[%s7219_s1 + $0x1a8] sm:$0xff]  }
  0xf4   : > { %5038 = vmatpush3.bf16.msra.mxu0 %v5626_v53  ;;  %5029 = vmatprep.mubr.bf16.mxu0 %v1187_v3  ;;  %v1571_v53 = vrot.slane %v1546_v52, 4  ;;  %v1580_v3 = vrot.slane %v6251_v27, 4  ;;  %v5644_v27 = vld [vmem:[%s7219_s1 + $0x220] sm:$0xff]  }
  0xf5   : > { %5039 = vmatprep.subr.bf16.mxu0 %v5627_v20 }
  0xf8   : > { %5040 = vmatpush3.bf16.msra.mxu0 %v5627_v20  ;;  %v5642_v20 = vld [vmem:[%s7219_s1 + $0x210] sm:$0xff]  }
  0xf9   : > { %5041 = vmatprep.subr.bf16.mxu0 %v5628_v24 }
  0xfb   : > { %5030 = vmatmul.mubr.bf16.gmra.mrb[8].mxu0 %v1195_v63 }
  0xfc   : > { %5042 = vmatpush3.bf16.msra.mxu0 %v5628_v24  ;;  %5049 = vmatprep.mubr.bf16.mxu0 %v1373_v59  ;;  %v1582_v24 = vrot.slane %v6258_v22, 4  ;;  %v5646_v22 = vld [vmem:[%s7219_s1 + $0x230] sm:$0xff]   ;;  %v1773_v59 = vrot.slane %v6202_v46, 4 }
  0xfd   : > { %5043 = vmatprep.subr.bf16.mxu0 %v5629_v26 }
  0xfe   : > { %v1583_v63 = vsel %vm217_vm0, %v1580_v3, %v1582_v24 }
 0x100   : > { %5044 = vmatpush3.bf16.msra.mxu0 %v5629_v26  ;;  %v5647_v26 = vld [vmem:[%s7219_s1 + $0x238] sm:$0xff]  }
 0x101   : > { %5045 = vmatprep.subr.bf16.mxu0 %v5630_v23 }
 0x104   : > { %5046 = vmatpush3.bf16.msra.mxu0 %v5630_v23  ;;  %v1778_v23 = vshrl.u32 %v6260_v33, 16 }
 0x105   : > { %5047 = vmatprep.subr.bf16.mxu0 %v5631_v55 }
 0x108   : > { %5048 = vmatpush3.bf16.msra.mxu0 %v5631_v55  ;;  %v1781_v55 = vshll.u32 %v6260_v33, 16  ;;  %v5652_v33 = vld [vmem:[%s7219_s1 + $0x60] sm:$0xff]  }
 0x109   : > { %5061 = vmatprep.subr.bf16.mxu0 %v5632_v61 }
 0x10a   : > { %v1783_v19 = vrot.slane %v1781_v55, 5 }
 0x10b   : > { %5050 = vmatmul.mubr.bf16.vlgmr.msra.gmra.mrb[0].mxu0 %v6077_v49  ;;  %v5635_v49 = vld [vmem:[%s7219_s1 + $0x1d8] sm:$0xff]  }
 0x10c   : > { %5062 = vmatpush3.bf16.msra.mxu0 %v5632_v61  ;;  %5053 = vmatprep.mubr.bf16.mxu0 %v6098_v40  ;;  %v1389_v40 = vsel %vm366_vm1, %v6092_v39, %v1388_v15  ;;  %v5637_v39 = vld [vmem:[%s7219_s1 + $0x1e8] sm:$0xff]   ;;  %v6418_v15 = vld [vmem:[%s7219_s1] sm:$0xff]  }
 0x10d   : > { %5063 = vmatprep.subr.bf16.mxu0 %v5633_v17 }
 0x110   : > { %5064 = vmatpush3.bf16.msra.mxu0 %v5633_v17  ;;  %v1780_v17 = vrot.slane %v1778_v23, 4 }
 0x111   : > { %5065 = vmatprep.subr.bf16.mxu0 %v5634_v34 }
 0x112   : > { %v1784_v46 = vor.u32 %v1783_v19, %v1780_v17 }
 0x113   : > { %5054 = vmatmul.mubr.bf16.gmra.mrb[4].mxu0 %v6103_v58  ;;  %v1573_v58 = vsel %vm217_vm0, %v1571_v53, %v5939_v21  ;;  %v5640_v21 = vld [vmem:[%s7219_s1 + $0x200] sm:$0xff]  }
 0x114   : > { %5066 = vmatpush3.bf16.msra.mxu0 %v5634_v34  ;;  %5057 = vmatprep.mubr.bf16.mxu0 %v1389_v40  ;;  %v5655_v34 = vld [vmem:[%s7219_s1 + $0x78] sm:$0xff]  }
 0x115   : > { %5067 = vmatprep.subr.bf16.mxu0 %v5635_v49 }
 0x118   : > { %5068 = vmatpush3.bf16.msra.mxu0 %v5635_v49 }
 0x119   : > { %5069 = vmatprep.subr.bf16.mxu0 %v5636_v37 }
 0x11b   : > { %5058 = vmatmul.mubr.bf16.gmra.mrb[8].mxu0 %v1398_v32 }
 0x11c   : > { %5070 = vmatpush3.bf16.msra.mxu0 %v5636_v37  ;;  %5077 = vmatprep.mubr.bf16.mxu0 %v1573_v58 }
 0x11d   : > { %5071 = vmatprep.subr.bf16.mxu0 %v5637_v39 }
 0x120   : > { %5072 = vmatpush3.bf16.msra.mxu0 %v5637_v39 }
 0x121   : > { %5073 = vmatprep.subr.bf16.mxu0 %v5638_v41 }
 0x124   : > { %5074 = vmatpush3.bf16.msra.mxu0 %v5638_v41 }
 0x125   : > { %5075 = vmatprep.subr.bf16.mxu0 %v5639_v50 }
 0x128   : > { %5076 = vmatpush3.bf16.msra.mxu0 %v5639_v50 }
 0x129   : > { %5089 = vmatprep.subr.bf16.mxu0 %v5640_v21  ;;  %v6421_v51 = vpop.permute.xlu0 %1935 }
 0x12a   : > { %7273 = vst [vmem:[#allocation21_spill] sm:$0xff] %v6421_v51  ;;  %v6423_v56 = vpop.permute.xlu1 %1945 }
 0x12b   : > { %5078 = vmatmul.mubr.bf16.vlgmr.msra.gmra.mrb[0].mxu0 %v5951_v30  ;;  %v1581_v30 = vsel %vm217_vm0, %v5965_v38, %v1580_v3  ;;  %v5645_v38 = vld [vmem:[%s7219_s1 + $0x228] sm:$0xff]   ;;  %7274 = vst [vmem:[#allocation22_spill] sm:$0xff] %v6423_v56 }
 0x12c   : > { %5090 = vmatpush3.bf16.msra.mxu0 %v5640_v21  ;;  %5081 = vmatprep.mubr.bf16.mxu0 %v5972_v42  ;;  %v1755_v42 = vrot.slane %v1753_v47, 5 }
 0x12d   : > { %5091 = vmatprep.subr.bf16.mxu0 %v5641_v54  ;;  %v6425_v49 = vpop.permute.xlu0 %1940 }
 0x12e   : > { %v1756_v43 = vor.u32 %v1755_v42, %v1752_v36  ;;  %7275 = vst [vmem:[#allocation23_spill] sm:$0xff] %v6425_v49  ;;  %v6427_v40 = vpop.permute.xlu1 %1950 }
 0x12f   : > { %7276 = vst [vmem:[#allocation24_spill] sm:$0xff] %v6427_v40 }
 0x130   : > { %5092 = vmatpush3.bf16.msra.mxu0 %v5641_v54 }
 0x131   : > { %5093 = vmatprep.subr.bf16.mxu0 %v5642_v20  ;;  %v6429_v52 = vpop.permute.xlu0 %1955 }
 0x132   : > { %7277 = vst [vmem:[#allocation25_spill] sm:$0xff] %v6429_v52  ;;  %v6439_v39 = vpop.permute.xlu1 %1960 }
 0x133   : > { %5082 = vmatmul.mubr.bf16.gmra.mrb[4].mxu0 %v5977_v45  ;;  %v1760_v45 = vsel %vm582_vm4, %v1756_v43, %v6142_v35  ;;  %v1774_v35 = vrot.slane %v6206_v62, 5  ;;  %7278 = vst [vmem:[#allocation26_spill] sm:$0xff] %v6439_v39 }
 0x134   : > { %5094 = vmatpush3.bf16.msra.mxu0 %v5642_v20  ;;  %5085 = vmatprep.mubr.bf16.mxu0 %v1581_v30 }
 0x135   : > { %5095 = vmatprep.subr.bf16.mxu0 %v5643_v48  ;;  %v1775_v61 = vor.u32 %v1774_v35, %v1773_v59  ;;  %v6447_v21 = vpop.permute.xlu0 %1965 }
 0x136   : > { %7279 = vst [vmem:[#allocation27_spill] sm:$0xff] %v6447_v21  ;;  %v6456_v42 = vpop.permute.xlu1 %1970 }
 0x137   : > { %v1776_v60 = vsel %vm582_vm4, %v6161_v57, %v1775_v61  ;;  %v1785_v62 = vsel %vm582_vm4, %v1775_v61, %v1784_v46  ;;  %v5650_v57 = vld [vmem:[%s7219_s1 + $0x50] sm:$0xff]   ;;  %7280 = vst [vmem:[#allocation28_spill] sm:$0xff] %v6456_v42 }
 0x138   : > { %5096 = vmatpush3.bf16.msra.mxu0 %v5643_v48 }
 0x139   : > { %5097 = vmatprep.subr.bf16.mxu0 %v5644_v27  ;;  %v6469_v59 = vpop.permute.xlu0 %1975 }
 0x13a   : > { %7281 = vst [vmem:[#allocation29_spill] sm:$0xff] %v6469_v59 }
 0x13b   : > { %5086 = vmatmul.mubr.bf16.gmra.mrb[8].mxu0 %v1583_v63 }
 0x13c   : > { %5098 = vmatpush3.bf16.msra.mxu0 %v5644_v27  ;;  %5105 = vmatprep.mubr.bf16.mxu0 %v1760_v45 }
 0x13d   : > { %5099 = vmatprep.subr.bf16.mxu0 %v5645_v38 }
 0x140   : > { %5100 = vmatpush3.bf16.msra.mxu0 %v5645_v38 }
 0x141   : > { %5101 = vmatprep.subr.bf16.mxu0 %v5646_v22 }
 0x144   : > { %5102 = vmatpush3.bf16.msra.mxu0 %v5646_v22 }
 0x145   : > { %5103 = vmatprep.subr.bf16.mxu0 %v5647_v26 }
 0x148   : > { %5104 = vmatpush3.bf16.msra.mxu0 %v5647_v26 }
 0x14b   : > { %5106 = vmatmul.mubr.bf16.vlgmr.msra.gmra.mrb[0].mxu0 %v6155_v16  ;;  %v5648_v16 = vld [vmem:[%s7219_s1 + $0x40] sm:$0xff]  }
 0x14c   : > { %5109 = vmatprep.mubr.bf16.mxu0 %v6167_v18  ;;  %5117 = vmatprep.subr.bf16.mxu1 %v5648_v16  ;;  %v5649_v18 = vld [vmem:[%s7219_s1 + $0x48] sm:$0xff]  }
 0x14d   : > { %5118 = vmatpush3.bf16.msra.mxu1 %v5648_v16 }
 0x14e   : > { %5119 = vmatprep.subr.bf16.mxu1 %v5649_v18 }
 0x151   : > { %5120 = vmatpush3.bf16.msra.mxu1 %v5649_v18 }
 0x152   : > { %5121 = vmatprep.subr.bf16.mxu1 %v5650_v57 }
 0x153   : > { %5110 = vmatmul.mubr.bf16.gmra.mrb[4].mxu0 %v6171_v44  ;;  %v5651_v44 = vld [vmem:[%s7219_s1 + $0x58] sm:$0xff]  }
 0x154   : > { %5113 = vmatprep.mubr.bf16.mxu0 %v1776_v60 }
 0x155   : > { %5122 = vmatpush3.bf16.msra.mxu1 %v5650_v57 }
 0x156   : > { %5123 = vmatprep.subr.bf16.mxu1 %v5651_v44 }
 0x159   : > { %5124 = vmatpush3.bf16.msra.mxu1 %v5651_v44 }
 0x15a   : > { %5125 = vmatprep.subr.bf16.mxu1 %v5652_v33 }
 0x15b   : > { %5114 = vmatmul.mubr.bf16.gmra.mrb[8].mxu0 %v1785_v62  ;;  %v6477_v62 = vpop.permute.xlu1 %1980 }
 0x15c   : > { %7282 = vst [vmem:[#allocation30_spill] sm:$0xff] %v6477_v62 }
 0x15d   : > { %5126 = vmatpush3.bf16.msra.mxu1 %v5652_v33 }
 0x15e   : > { %5127 = vmatprep.subr.bf16.mxu1 %v5653_v29 }
 0x161   : > { %5128 = vmatpush3.bf16.msra.mxu1 %v5653_v29  ;;  %v6480_v29 = vpop.permute.xlu0 %1985 }
 0x162   : > { %5129 = vmatprep.subr.bf16.mxu1 %v5654_v31  ;;  %7283 = vst [vmem:[#allocation31_spill] sm:$0xff] %v6480_v29 }
 0x165   : > { %5130 = vmatpush3.bf16.msra.mxu1 %v5654_v31 }
 0x166   : > { %5131 = vmatprep.subr.bf16.mxu1 %v5655_v34 }
 0x169   : > { %5132 = vmatpush3.bf16.msra.mxu1 %v5655_v34 }
 0x16a   : > { %5145 = vmatprep.subr.bf16.mxu1 %v6418_v15 }
 0x21e   : > { %v6431_v25 = vpop.f32.mrb[0].mxu0 }
 0x21f   : > { %v6433_v37 = vpop.f32.mrb[1].mxu0  ;;  %v1995_v41 = vmul.f32 %v6431_v25, %v6423_v56 }
 0x220   : > { %v1993_v53 = vmul.f32 %v6421_v51, %v6433_v37  ;;  %v6437_v32 = vpop.f32.mrb[2].mxu0 }
 0x221   : > { %v6441_v58 = vpop.f32.mrb[3].mxu0  ;;  %v1996_v20 = vmul.f32 %v6437_v32, %v6427_v40  ;;  %v2024_v47 = vmul.f32 %v6431_v25, %v1995_v41 }
 0x222   : > { %v1994_v50 = vmul.f32 %v6425_v49, %v6441_v58  ;;  %v2022_v54 = vmul.f32 %v1993_v53, %v6433_v37 }
 0x223   : > { %v2025_v27 = vmul.f32 %v6437_v32, %v1996_v20 }
 0x224   : > { %v2005_v3 = vadd.f32 %v1994_v50, %v1993_v53  ;;  %v2023_v28 = vmul.f32 %v1994_v50, %v6441_v58 }
 0x226   : > { %v2006_v48 = vadd.f32 %v2005_v3, %v1995_v41  ;;  %v2034_v30 = vadd.f32 %v2023_v28, %v2022_v54  ;;  %v6454_v36 = vpop.f32.mrb[4].mxu0 }
 0x227   : > { %v6458_v24 = vpop.f32.mrb[5].mxu0  ;;  %v1999_v22 = vmul.f32 %v6454_v36, %v6447_v21 }
 0x228   : > { %v2035_v43 = vadd.f32 %v2034_v30, %v2024_v47  ;;  %v1997_v63 = vmul.f32 %v6429_v52, %v6458_v24  ;;  %v2007_v38 = vadd.f32 %v2006_v48, %v1996_v20  ;;  %v6463_v45 = vpop.f32.mrb[6].mxu0  ;;  %v6486_v30 = vpop.permute.xlu1 %1990 }
 0x229   : > { %v6467_v26 = vpop.f32.mrb[7].mxu0  ;;  %v2000_v19 = vmul.f32 %v6463_v45, %v6456_v42  ;;  %v2028_v16 = vmul.f32 %v6454_v36, %v1999_v22  ;;  %7284 = vst [vmem:[#allocation32_spill] sm:$0xff] %v6486_v30 }
 0x22a   : > { %v2008_v35 = vadd.f32 %v2007_v38, %v1997_v63  ;;  %v2026_v23 = vmul.f32 %v1997_v63, %v6458_v24  ;;  %v2036_v55 = vadd.f32 %v2035_v43, %v2025_v27  ;;  %v1998_v61 = vmul.f32 %v6439_v39, %v6467_v26 }
 0x22b   : > { %v2029_v31 = vmul.f32 %v6463_v45, %v2000_v19 }
 0x22c   : > { %v2037_v17 = vadd.f32 %v2036_v55, %v2026_v23  ;;  %v2009_v60 = vadd.f32 %v2008_v35, %v1998_v61  ;;  %v2027_v46 = vmul.f32 %v1998_v61, %v6467_v26 }
 0x22e   : > { %v2010_v18 = vadd.f32 %v2009_v60, %v1999_v22  ;;  %v2038_v57 = vadd.f32 %v2037_v17, %v2027_v46  ;;  %v5115_v44 = vpop.f32.mrb[8].mxu0 }
 0x22f   : > { %v1906_v33 = vpop.f32.mrb[9].mxu0  ;;  %v2003_v54 = vmul.f32 %v5115_v44, %v6480_v29 }
 0x230   : > { %v2039_v34 = vadd.f32 %v2038_v57, %v2028_v16  ;;  %v2001_v53 = vmul.f32 %v6469_v59, %v1906_v33  ;;  %v2011_v41 = vadd.f32 %v2010_v18, %v2000_v19  ;;  %v5116_v50 = vpop.f32.mrb[10].mxu0 }
 0x231   : > { %v1909_v20 = vpop.f32.mrb[11].mxu0  ;;  %v2004_v43 = vmul.f32 %v5116_v50, %v6486_v30  ;;  %v2032_v22 = vmul.f32 %v5115_v44, %v2003_v54 }
 0x232   : > { %v2012_v3 = vadd.f32 %v2011_v41, %v2001_v53  ;;  %v2030_v28 = vmul.f32 %v2001_v53, %v1906_v33  ;;  %v2040_v47 = vadd.f32 %v2039_v34, %v2029_v31  ;;  %v2002_v48 = vmul.f32 %v6477_v62, %v1909_v20 }
 0x233   : > { %v2033_v55 = vmul.f32 %v5116_v50, %v2004_v43 }
 0x234   : > { %v2041_v27 = vadd.f32 %v2040_v47, %v2030_v28  ;;  %v2013_v63 = vadd.f32 %v2012_v3, %v2002_v48  ;;  %v2031_v38 = vmul.f32 %v2002_v48, %v1909_v20 }
 0x236   : > { %v2014_v35 = vadd.f32 %v2013_v63, %v2003_v54  ;;  %v2042_v23 = vadd.f32 %v2041_v27, %v2031_v38 }
 0x238   : > { %v2015_v61 = vadd.f32 %v2014_v35, %v2004_v43  ;;  %v2043_v17 = vadd.f32 %v2042_v23, %v2032_v22  ;;  %v2062_v43 = vlaneseq }
 0x23a   : > { %v2016_v19 = vrot.slane %v2015_v61, 4  ;;  %v2044_v60 = vadd.f32 %v2043_v17, %v2033_v55  ;;  %v2063_v38 = vshrl.u32 %v2062_v43, 7 }
 0x23c   : > { %v2017_v46 = vadd.f32 %v2016_v19, %v2015_v61  ;;  %v2045_v16 = vrot.slane %v2044_v60, 4  ;;  %v6489_v22 = vsub.s32 0, %v2063_v38 }
 0x23e   : > { %v2018_v18 = vrot.slane %v2017_v46, 2  ;;  %v2046_v57 = vadd.f32 %v2045_v16, %v2044_v60  ;;  %7285 = vst [vmem:[#allocation33_spill] sm:$0xff] %v6489_v22 }
 0x240   : > { %v2019_v31 = vadd.f32 %v2018_v18, %v2017_v46  ;;  %v2047_v34 = vrot.slane %v2046_v57, 2 }
 0x242   : > { %v2020_v53 = vrot.slane %v2019_v31, 1  ;;  %v2048_v41 = vadd.f32 %v2047_v34, %v2046_v57 }
 0x244   : > { %v2021_v28 = vadd.f32 %v2020_v53, %v2019_v31  ;;  %v2049_v47 = vrot.slane %v2048_v41, 1 }
 0x246   : > { %v2050_v3 = vadd.f32 %v2049_v47, %v2048_v41  ;;  %v2052_v48 = vmul.f32 0.03125, %v2021_v28 }
 0x248   : > { %v2053_v0 = vmul.f32 0.03125, %v2050_v3  ;;  %v2054_v54 = vmul.f32 %v2052_v48, %v2052_v48  ;;  %v6506_v3 = vld [vmem:[#allocation5] sm:$0xf0] }
 0x24a   : > { %v2055_v27 = vsub.f32 %v2053_v0, %v2054_v54 }
 0x24c   : > { %v2056_v63 = vadd.f32 1e-05, %v2055_v27 }
 0x24e   : > { %5720 = vrsqrt.f32 %v2056_v63  ;;  %v2237_v63 = vrot.slane %v6506_v3, 4 }
 0x258   : > { %v5721_v35 = vpop.eup %5720 }
 0x259   : > { %v2058_v23 = vmul.f32 %v5721_v35, %v7286_v13 }
 0x25b   : > { %v2059_v55 = vmul.f32 %v2058_v23, %v2052_v48  ;;  %v2065_v61 = vrot.slane %v2058_v23, %v6489_v22 }
 0x25d   : > { %v2060_v17 = vsub.f32 %v7287_v14, %v2059_v55  ;;  %v2067_v19 = vmul.f32 %v2065_v61, %v6433_v37  ;;  %v2068_v60 = vmul.f32 %v2065_v61, %v6441_v58  ;;  %v2069_v0 = vmul.f32 %v6431_v25, %v2065_v61 }
 0x25e   : > { %v2070_v46 = vmul.f32 %v6437_v32, %v2065_v61  ;;  %v2071_v16 = vmul.f32 %v2065_v61, %v6458_v24  ;;  %v2072_v18 = vmul.f32 %v2065_v61, %v6467_v26  ;;  %v2073_v57 = vmul.f32 %v6454_v36, %v2065_v61 }
 0x25f   : > { %v2074_v31 = vmul.f32 %v6463_v45, %v2065_v61  ;;  %v2075_v34 = vmul.f32 %v2065_v61, %v1906_v33  ;;  %v2076_v53 = vmul.f32 %v2065_v61, %v1909_v20  ;;  %v2077_v41 = vmul.f32 %v5115_v44, %v2065_v61 }
 0x260   : > { %v2078_v28 = vmul.f32 %v5116_v50, %v2065_v61  ;;  %v2083_v37 = vrot.slane %v2060_v17, %v6489_v22  ;;  %v2109_v25 = vstv %s7221_s5 }
 0x262   : > { %v2085_v58 = vadd.f32 %v2083_v37, %v2067_v19  ;;  %v2086_v32 = vadd.f32 %v2083_v37, %v2068_v60  ;;  %v2087_v47 = vadd.f32 %v2083_v37, %v2069_v0  ;;  %v2088_v24 = vadd.f32 %v2083_v37, %v2070_v46 }
 0x263   : > { %v2089_v26 = vadd.f32 %v2083_v37, %v2071_v16  ;;  %v2090_v36 = vadd.f32 %v2083_v37, %v2072_v18  ;;  %v2091_v48 = vadd.f32 %v2083_v37, %v2073_v57  ;;  %v2092_v45 = vadd.f32 %v2083_v37, %v2074_v31 }
 0x264   : > { %v2093_v33 = vadd.f32 %v2083_v37, %v2075_v34  ;;  %v2094_v20 = vadd.f32 %v2083_v37, %v2076_v53  ;;  %v2095_v44 = vadd.f32 %v2083_v37, %v2077_v41  ;;  %v2096_v50 = vadd.f32 %v2083_v37, %v2078_v28 }
 0x265   : > { %vm2097_vm5 = vcmp.gt.f32.partialorder %v2085_v58, 0.0  ;;  %v2110_v54 = vmul.f32 %v2109_v25, %v2085_v58  ;;  %v2111_v27 = vmul.f32 %v2109_v25, %v2086_v32  ;;  %vm2098_vm6 = vcmp.gt.f32.partialorder %v2086_v32, 0.0 }
 0x266   : > { %vm2105_vm7 = vcmp.gt.f32.partialorder %v2093_v33, 0.0  ;;  %vm2106_vm8 = vcmp.gt.f32.partialorder %v2094_v20, 0.0  ;;  %vm2107_vm9 = vcmp.gt.f32.partialorder %v2095_v44, 0.0  ;;  %vm2108_vm10 = vcmp.gt.f32.partialorder %v2096_v50, 0.0 }
 0x267   : > { %v2112_v43 = vmul.f32 %v2109_v25, %v2087_v47  ;;  %v2113_v38 = vmul.f32 %v2109_v25, %v2088_v24  ;;  %v2114_v35 = vmul.f32 %v2109_v25, %v2089_v26  ;;  %v2115_v23 = vmul.f32 %v2109_v25, %v2090_v36 }
 0x268   : > { %v2116_v55 = vmul.f32 %v2109_v25, %v2091_v48  ;;  %v2118_v61 = vmul.f32 %v2109_v25, %v2093_v33  ;;  %v2119_v17 = vmul.f32 %v2109_v25, %v2094_v20  ;;  %v2120_v19 = vmul.f32 %v2109_v25, %v2095_v44 }
 0x269   : > { %v2121_v60 = vmul.f32 %v2109_v25, %v2096_v50  ;;  %v2122_v0 = vsel %vm2097_vm5, %v2085_v58, %v2110_v54  ;;  %v2123_v46 = vsel %vm2098_vm6, %v2086_v32, %v2111_v27  ;;  %vm2099_vm11 = vcmp.gt.f32.partialorder %v2087_v47, 0.0 }
 0x26a   : > { %v2130_v16 = vsel %vm2105_vm7, %v2093_v33, %v2118_v61  ;;  %v2131_v18 = vsel %vm2106_vm8, %v2094_v20, %v2119_v17  ;;  %v2134_v57 = vmul.f32 %v2122_v0, %v6421_v51  ;;  %v2135_v31 = vmul.f32 %v2123_v46, %v6425_v49  ;;  %v5658_v46 = vld [vmem:[%s7219_s1 + $0x10] sm:$0xff]  }
 0x26b   : > { %v2132_v34 = vsel %vm2107_vm9, %v2095_v44, %v2120_v19  ;;  %v2133_v53 = vsel %vm2108_vm10, %v2096_v50, %v2121_v60  ;;  %v2142_v41 = vmul.f32 %v2130_v16, %v6469_v59  ;;  %v2143_v28 = vmul.f32 %v2131_v18, %v6477_v62 }
 0x26c   : > { %v2144_v37 = vmul.f32 %v2132_v34, %v6480_v29  ;;  %v2145_v1 = vmul.f32 %v2133_v53, %v6486_v30  ;;  %v6518_v58 = vpack.c.bf16 %v2135_v31, %v2134_v57  ;;  %vm2100_vm12 = vcmp.gt.f32.partialorder %v2088_v24, 0.0  ;;  %v5659_v53 = vld [vmem:[%s7219_s1 + $0x18] sm:$0xff]  }
 0x26d   : > { %v6520_v32 = vpack.c.bf16 %v2143_v28, %v2142_v41  ;;  %v2124_v33 = vsel %vm2099_vm11, %v2087_v47, %v2112_v43  ;;  %vm2101_vm13 = vcmp.gt.f32.partialorder %v2089_v26, 0.0  ;;  %v2117_v20 = vmul.f32 %v2109_v25, %v2092_v45 }
 0x26e   : > { %2183 = vst [vmem:[#allocation5 + $0x8] sm:$0xff] %v6518_v58  ;;  %v2238_v44 = vrot.slane %v6518_v58, 4  ;;  %v2125_v50 = vsel %vm2100_vm12, %v2088_v24, %v2113_v38  ;;  %v2136_v54 = vmul.f32 %v2124_v33, %v6423_v56  ;;  %vm2102_vm14 = vcmp.gt.f32.partialorder %v2090_v36, 0.0 }
 0x26f   : > { %v2137_v27 = vmul.f32 %v2125_v50, %v6427_v40  ;;  %v2126_v61 = vsel %vm2101_vm13, %v2089_v26, %v2114_v35  ;;  %v2127_v19 = vsel %vm2102_vm14, %v2090_v36, %v2115_v23  ;;  %vm2103_vm15 = vcmp.gt.f32.partialorder %v2091_v48, 0.0  ;;  %v5657_v36 = vld [vmem:[%s7219_s1 + $0x8] sm:$0xff]   ;;  %v2190_v23 = vld [vmem:[#allocation5] sm:$0xf8] }
 0x270   : > { %v2239_v17 = vsel %vm217_vm0, %v2237_v63, %v2238_v44  ;;  %v2138_v60 = vmul.f32 %v2126_v61, %v6429_v52  ;;  %v2139_v25 = vmul.f32 %v2127_v19, %v6439_v39  ;;  %vm2104_vm5 = vcmp.gt.f32.partialorder %v2092_v45, 0.0 }
 0x271   : > { %5133 = vmatprep.mubr.bf16.mxu1 %v2239_v17  ;;  %v6528_v47 = vpack.c.bf16 %v2137_v27, %v2136_v54  ;;  %v2128_v43 = vsel %vm2103_vm15, %v2091_v48, %v2116_v55  ;;  %v2129_v24 = vsel %vm2104_vm5, %v2092_v45, %v2117_v20  ;;  %v6532_v0 = vpack.c.bf16 %v2145_v1, %v2144_v37  ;;  %v5660_v27 = vld [vmem:[%s7219_s1 + $0x20] sm:$0xff]  }
 0x272   : > { %v2140_v38 = vmul.f32 %v2128_v43, %v6447_v21  ;;  %v6537_v63 = vpack.c.bf16 %v2139_v25, %v2138_v60  ;;  %v2141_v35 = vmul.f32 %v2129_v24, %v6456_v42  ;;  %v2386_v18 = vshrl.u32 %v2190_v23, 16 }
 0x273   : > { %v6535_v26 = vrot.slane %v6528_v47, 4  ;;  %2188 = vst [vmem:[#allocation5 + $0x30] sm:$0xff] %v6532_v0  ;;  %v6560_v57 = vshrl.u32 %v6518_v58, 16  ;;  %v6563_v31 = vshll.u32 %v6518_v58, 16  ;;  %v2389_v34 = vshll.u32 %v2190_v23, 16 }
 0x274   : > { %v2242_v45 = vrot.slane %v6537_v63, 4  ;;  %v6547_v1 = vpack.c.bf16 %v2141_v35, %v2140_v38  ;;  %v2388_v28 = vrot.slane %v2386_v18, 3  ;;  %v6585_v54 = vshrl.u32 %v6528_v47, 16  ;;  %v5661_v35 = vld [vmem:[%s7219_s1 + $0x28] sm:$0xff]  }
 0x275   : > { %v2241_v48 = vsel %vm217_vm0, %v2238_v44, %v6535_v26  ;;  %v2391_v20 = vrot.slane %v2389_v34, 4  ;;  %v2396_v44 = vrot.slane %v6560_v57, 3  ;;  %v2399_v50 = vrot.slane %v6563_v31, 4 }
 0x276   : > { %5134 = vmatmul.mubr.bf16.vlgmr.msra.gmra.mrb[0].mxu1 %v2241_v48  ;;  %v6552_v55 = vsel %vm217_vm0, %v6535_v26, %v2242_v45  ;;  %v2244_v16 = vrot.slane %v6547_v1, 4  ;;  %v6591_v61 = vshrl.u32 %v6537_v63, 16  ;;  %v6595_v19 = vshrl.u32 %v6547_v1, 16 }
 0x277   : > { %5146 = vmatpush3.bf16.msra.mxu1 %v6418_v15  ;;  %5137 = vmatprep.mubr.bf16.mxu1 %v6552_v55  ;;  %v6566_v15 = vrot.slane %v6520_v32, 4  ;;  %v6598_v60 = vshrl.u32 %v6520_v32, 16  ;;  %v2392_v25 = vor.u32 %v2391_v20, %v2388_v28  ;;  %v6600_v43 = vor.u32 %v2399_v50, %v2396_v44 }
 0x278   : > { %5147 = vmatprep.subr.bf16.mxu1 %v5657_v36  ;;  %v6572_v41 = vsel %vm217_vm0, %v2242_v45, %v2244_v16  ;;  %v6603_v24 = vshll.u32 %v6528_v47, 16  ;;  %v6606_v38 = vshll.u32 %v6537_v63, 16  ;;  %v6613_v48 = vshll.u32 %v6547_v1, 16 }
 0x279   : > { %v6577_v37 = vsel %vm217_vm0, %v2244_v16, %v6566_v15  ;;  %v6616_v45 = vshll.u32 %v6520_v32, 16  ;;  %v2808_v23 = vrot.slane %v6585_v54, 7  ;;  %v2814_v34 = vrot.slane %v6595_v19, 7 }
 0x27a   : > { %v6579_v33 = vld [vmem:[#allocation5 + $0x30] sm:$0xf]  ;;  %v2401_v28 = vsel %vm366_vm1, %v2392_v25, %v6600_v43  ;;  %v2432_v2 = vrot.slane %v6598_v60, 3  ;;  %v3165_v5 = vrot.slane %v6603_v24, 1  ;;  %v3173_v7 = vrot.slane %v6606_v38, 1 }
 0x27b   : > { %5148 = vmatpush3.bf16.msra.mxu1 %v5657_v36  ;;  %v2248_v17 = vrot.slane %v6579_v33, 4  ;;  %v2805_v36 = vrot.slane %v6560_v57, 7  ;;  %v2809_v20 = vor.u32 %v2808_v23, %v6603_v24  ;;  %v2815_v50 = vor.u32 %v2814_v34, %v6613_v48 }
 0x27c   : > { %5149 = vmatprep.subr.bf16.mxu1 %v5658_v46  ;;  %v2435_v6 = vrot.slane %v6616_v45, 4  ;;  %v2405_v9 = vrot.slane %v6585_v54, 3  ;;  %v2408_v10 = vrot.slane %v6603_v24, 4  ;;  %v2414_v12 = vrot.slane %v6591_v61, 3 }
 0x27d   : > { %v2249_v16 = vsel %vm217_vm0, %v6566_v15, %v2248_v17  ;;  %v6623_v18 = vor.u32 %v2805_v36, %v6563_v31  ;;  %v6640_v25 = vsel %vm786_vm2, %v2805_v36, %v2809_v20  ;;  %v3181_v36 = vrot.slane %v6613_v48, 1 }
 0x27e   : > { %5138 = vmatmul.mubr.bf16.gmra.mrb[4].mxu1 %v6572_v41  ;;  %v3189_v20 = vrot.slane %v6616_v45, 1  ;;  %v2417_v14 = vrot.slane %v6606_v38, 4  ;;  %v2436_v30 = vor.u32 %v2435_v6, %v2432_v2 }
 0x27f   : > { %5150 = vmatpush3.bf16.msra.mxu1 %v5658_v46  ;;  %5141 = vmatprep.mubr.bf16.mxu1 %v6577_v37  ;;  %v2811_v46 = vrot.slane %v6591_v61, 7  ;;  %v3185_v8 = vor.u32 %v3181_v36, %v6595_v19 }
 0x280   : > { %5151 = vmatprep.subr.bf16.mxu1 %v5659_v53 }
 0x281   : > { %v2812_v44 = vor.u32 %v2811_v46, %v6606_v38  ;;  %v6687_v13 = vsel %vm1143_vm3, %v3185_v8, %v3189_v20  ;;  %v2418_v8 = vor.u32 %v2417_v14, %v2414_v12  ;;  %v2423_v12 = vrot.slane %v6595_v19, 3 }
 0x282   : > { %v2426_v14 = vrot.slane %v6613_v48, 4 }
 0x283   : > { %5152 = vmatpush3.bf16.msra.mxu1 %v5659_v53  ;;  %v7227_v53 = vrot.slane %v6598_v60, 7  ;;  %v6643_v4 = vsel %vm786_vm2, %v2808_v23, %v2812_v44  ;;  %v6658_v23 = vshrl.u32 %v6532_v0, 16  ;;  %v3169_v44 = vor.u32 %v3165_v5, %v6585_v54 }
 0x284   : > { %5153 = vmatprep.subr.bf16.mxu1 %v5660_v27 }
 0x285   : > { %v2818_v17 = vor.u32 %v7227_v53, %v6616_v45  ;;  %v3160_v53 = vrot.slane %v6563_v31, 1  ;;  %v6679_v11 = vsel %vm1143_vm3, %v3169_v44, %v3173_v7  ;;  %v3396_v62 = vrot.slane %v6658_v23, 3 }
 0x286   : > { %5142 = vmatmul.mubr.bf16.gmra.mrb[8].mxu1 %v2249_v16  ;;  %v5662_v16 = vld [vmem:[%s7219_s1 + $0x30] sm:$0xff]   ;;  %v2624_v44 = vrot.slane %v6616_v45, 5  ;;  %v3781_v2 = vrot.slane %v6658_v23, 4 }
 0x287   : > { %5154 = vmatpush3.bf16.msra.mxu1 %v5660_v27  ;;  %5161 = vmatprep.mubr.bf16.mxu1 %v2401_v28  ;;  %v6646_v27 = vsel %vm786_vm2, %v2811_v46, %v2815_v50  ;;  %v6649_v28 = vsel %vm786_vm2, %v2814_v34, %v2818_v17  ;;  %v6661_v46 = vshll.u32 %v6532_v0, 16  ;;  %v3161_v34 = vor.u32 %v3160_v53, %v6560_v57  ;;  %v5663_v50 = vld [vmem:[%s7219_s1 + $0x38] sm:$0xff]  }
 0x288   : > { %5155 = vmatprep.subr.bf16.mxu1 %v5661_v35  ;;  %v3177_v17 = vor.u32 %v3173_v7, %v6591_v61  ;;  %v5664_v7 = vld [vmem:[%s7219_s1 + $0x80] sm:$0xff]  }
 0x289   : > { %v6676_v53 = vsel %vm1143_vm3, %v3161_v34, %v3165_v5  ;;  %v3397_v5 = vrot.slane %v6661_v46, 4  ;;  %v2623_v34 = vrot.slane %v6598_v60, 4 }
 0x28a   : > { %v6684_v22 = vsel %vm1143_vm3, %v3177_v17, %v3181_v36  ;;  %v6696_v36 = vor.u32 %v2408_v10, %v2405_v9  ;;  %v3782_v9 = vrot.slane %v6661_v46, 5 }
 0x28b   : > { %5156 = vmatpush3.bf16.msra.mxu1 %v5661_v35  ;;  %v6671_v35 = vor.u32 %v3189_v20, %v6598_v60  ;;  %v6698_v17 = vor.u32 %v3397_v5, %v3396_v62  ;;  %v6708_v20 = vor.u32 %v2624_v44, %v2623_v34  ;;  %v2427_v5 = vor.u32 %v2426_v14, %v2423_v12 }
 0x28c   : > { %5157 = vmatprep.subr.bf16.mxu1 %v5662_v16  ;;  %v2410_v10 = vsel %vm366_vm1, %v6600_v43, %v6696_v36  ;;  %v6718_v62 = vsel %vm366_vm1, %v6696_v36, %v2418_v8  ;;  %v6720_v45 = vor.u32 %v3782_v9, %v3781_v2  ;;  %v2439_v34 = vshrl.u32 %v6579_v33, 16 }
 0x28d   : > { %v6703_v6 = vsel %vm366_vm1, %v2436_v30, %v6698_v17  ;;  %v2442_v44 = vshll.u32 %v6579_v33, 16  ;;  %v2600_v2 = vshrl.u32 %v6506_v3, 16  ;;  %v2603_v9 = vshll.u32 %v6506_v3, 16 }
 0x28e   : > { %v6729_v43 = vsel %vm582_vm4, %v6708_v20, %v6720_v45  ;;  %v2441_v29 = vrot.slane %v2439_v34, 3  ;;  %v6743_v33 = vsel %vm366_vm1, %v2427_v5, %v2436_v30  ;;  %v2607_v3 = vrot.slane %v6560_v57, 4 }
 0x28f   : > { %5158 = vmatpush3.bf16.msra.mxu1 %v5662_v16  ;;  %v5665_v16 = vld [vmem:[%s7219_s1 + $0x88] sm:$0xff]   ;;  %v2444_v59 = vrot.slane %v2442_v44, 4  ;;  %v2602_v12 = vrot.slane %v2600_v2, 4  ;;  %v2605_v14 = vrot.slane %v2603_v9, 5  ;;  %v2615_v9 = vrot.slane %v6591_v61, 4 }
 0x290   : > { %5159 = vmatprep.subr.bf16.mxu1 %v5663_v50 }
 0x291   : > { %v2445_v34 = vor.u32 %v2444_v59, %v2441_v29  ;;  %v2606_v44 = vor.u32 %v2605_v14, %v2602_v12  ;;  %v5670_v59 = vld [vmem:[%s7219_s1 + $0xb0] sm:$0xff]   ;;  %v5671_v29 = vld [vmem:[%s7219_s1 + $0xb8] sm:$0xff]   ;;  %v5672_v12 = vld [vmem:[%s7219_s1 + $0xc0] sm:$0xff]  }
 0x293   : > { %5160 = vmatpush3.bf16.msra.mxu1 %v5663_v50  ;;  %v5666_v50 = vld [vmem:[%s7219_s1 + $0x90] sm:$0xff]   ;;  %v2446_v57 = vsel %vm366_vm1, %v2436_v30, %v2445_v34  ;;  %v2612_v30 = vrot.slane %v6603_v24, 5  ;;  %v2619_v24 = vrot.slane %v6595_v19, 4  ;;  %v2783_v19 = vld [vmem:[#allocation5] sm:$0x80] }
 0x294   : > { %5173 = vmatprep.subr.bf16.mxu1 %v5664_v7  ;;  %v5674_v34 = vld [vmem:[%s7219_s1 + $0xd0] sm:$0xff]  }
 0x296   : > { %5162 = vmatmul.mubr.bf16.vlgmr.msra.gmra.mrb[0].mxu1 %v2410_v10  ;;  %v6739_v10 = vsel %vm366_vm1, %v2418_v8, %v2427_v5  ;;  %v5668_v8 = vld [vmem:[%s7219_s1 + $0xa0] sm:$0xff]   ;;  %v5669_v5 = vld [vmem:[%s7219_s1 + $0xa8] sm:$0xff]  }
 0x297   : > { %5165 = vmatprep.mubr.bf16.mxu1 %v6718_v62  ;;  %5174 = vmatpush3.bf16.msra.mxu1 %v5664_v7  ;;  %v5667_v7 = vld [vmem:[%s7219_s1 + $0x98] sm:$0xff]  }
 0x298   : > { %5175 = vmatprep.subr.bf16.mxu1 %v5665_v16 }
 0x29b   : > { %5176 = vmatpush3.bf16.msra.mxu1 %v5665_v16  ;;  %v2608_v16 = vrot.slane %v6563_v31, 5 }
 0x29c   : > { %5177 = vmatprep.subr.bf16.mxu1 %v5666_v50 }
 0x29d   : > { %v2609_v2 = vor.u32 %v2608_v16, %v2607_v3 }
 0x29e   : > { %5166 = vmatmul.mubr.bf16.gmra.mrb[4].mxu1 %v6739_v10 }
 0x29f   : > { %5169 = vmatprep.mubr.bf16.mxu1 %v6743_v33  ;;  %5178 = vmatpush3.bf16.msra.mxu1 %v5666_v50  ;;  %v2610_v31 = vsel %vm582_vm4, %v2606_v44, %v2609_v2  ;;  %v2611_v50 = vrot.slane %v6585_v54, 4  ;;  %v5673_v54 = vld [vmem:[%s7219_s1 + $0xc8] sm:$0xff]  }
 0x2a0   : > { %5179 = vmatprep.subr.bf16.mxu1 %v5667_v7 }
 0x2a1   : > { %v6769_v14 = vor.u32 %v2612_v30, %v2611_v50  ;;  %v2802_v50 = vshrl.u32 %v2783_v19, 16  ;;  %v5676_v30 = vld [vmem:[%s7219_s1 + $0xe0] sm:$0xff]   ;;  %v5690_v19 = vld [vmem:[%s7219_s1 + $0x150] sm:$0xff]  }
 0x2a3   : > { %5180 = vmatpush3.bf16.msra.mxu1 %v5667_v7  ;;  %v2616_v7 = vrot.slane %v6606_v38, 5  ;;  %v2614_v61 = vsel %vm582_vm4, %v2609_v2, %v6769_v14  ;;  %v2620_v38 = vrot.slane %v6613_v48, 5  ;;  %v5675_v48 = vld [vmem:[%s7219_s1 + $0xd8] sm:$0xff]  }
 0x2a4   : > { %5181 = vmatprep.subr.bf16.mxu1 %v5668_v8 }
 0x2a5   : > { %v2617_v3 = vor.u32 %v2616_v7, %v2615_v9  ;;  %v2621_v44 = vor.u32 %v2620_v38, %v2619_v24  ;;  %v2804_v7 = vrot.slane %v2802_v50, 7  ;;  %v5679_v24 = vld [vmem:[%s7219_s1 + $0xf8] sm:$0xff]   ;;  %v5682_v38 = vld [vmem:[%s7219_s1 + $0x110] sm:$0xff]  }
 0x2a6   : > { %5170 = vmatmul.mubr.bf16.gmra.mrb[8].mxu1 %v2446_v57  ;;  %v5698_v50 = vld [vmem:[%s7219_s1 + $0x190] sm:$0xff]  }
 0x2a7   : > { %5182 = vmatpush3.bf16.msra.mxu1 %v5668_v8  ;;  %5189 = vmatprep.mubr.bf16.mxu1 %v2610_v31  ;;  %v6780_v16 = vsel %vm582_vm4, %v6769_v14, %v2617_v3  ;;  %v2582_v8 = vld [vmem:[#allocation5 + $0x30] sm:$0x1f]  ;;  %v6790_v57 = vsel %vm582_vm4, %v2617_v3, %v2621_v44 }
 0x2a8   : > { %5183 = vmatprep.subr.bf16.mxu1 %v5669_v5  ;;  %v2628_v2 = vshrl.u32 %v2582_v8, 16 }
 0x2aa   : > { %v2630_v31 = vrot.slane %v2628_v2, 4  ;;  %v7288_v2 = vrot.slane %v6598_v60, 7  ;;  %v5688_v60 = vld [vmem:[%s7219_s1 + $0x140] sm:$0xff]  }
 0x2ab   : > { %5184 = vmatpush3.bf16.msra.mxu1 %v5669_v5  ;;  %v2631_v5 = vshll.u32 %v2582_v8, 16  ;;  %v5683_v8 = vld [vmem:[%s7219_s1 + $0x118] sm:$0xff]  }
 0x2ac   : > { %5185 = vmatprep.subr.bf16.mxu1 %v5670_v59 }
 0x2af   : > { %5186 = vmatpush3.bf16.msra.mxu1 %v5670_v59  ;;  %v2633_v59 = vrot.slane %v2631_v5, 5  ;;  %v5687_v5 = vld [vmem:[%s7219_s1 + $0x138] sm:$0xff]  }
 0x2b0   : > { %5187 = vmatprep.subr.bf16.mxu1 %v5671_v29 }
 0x2b1   : > { %v2634_v9 = vor.u32 %v2633_v59, %v2630_v31  ;;  %v5696_v31 = vld [vmem:[%s7219_s1 + $0x180] sm:$0xff]   ;;  %v3354_v59 = vld [vmem:[#allocation5 + $0x8] sm:$0xf8] }
 0x2b3   : > { %5188 = vmatpush3.bf16.msra.mxu1 %v5671_v29  ;;  %v6795_v29 = vsel %vm582_vm4, %v2621_v44, %v6708_v20  ;;  %v2635_v3 = vsel %vm582_vm4, %v6708_v20, %v2634_v9  ;;  %v5680_v20 = vld [vmem:[%s7219_s1 + $0x100] sm:$0xff]   ;;  %v5685_v44 = vld [vmem:[%s7219_s1 + $0x128] sm:$0xff]   ;;  %v3373_v9 = vshrl.u32 %v3354_v59, 16 }
 0x2b4   : > { %5201 = vmatprep.subr.bf16.mxu1 %v5672_v12 }
 0x2b6   : > { %5190 = vmatmul.mubr.bf16.vlgmr.msra.gmra.mrb[0].mxu1 %v2614_v61  ;;  %v5678_v61 = vld [vmem:[%s7219_s1 + $0xf0] sm:$0xff]  }
 0x2b7   : > { %5193 = vmatprep.mubr.bf16.mxu1 %v6780_v16  ;;  %5202 = vmatpush3.bf16.msra.mxu1 %v5672_v12  ;;  %v5677_v12 = vld [vmem:[%s7219_s1 + $0xe8] sm:$0xff]  }
 0x2b8   : > { %5203 = vmatprep.subr.bf16.mxu1 %v5673_v54 }
 0x2bb   : > { %5204 = vmatpush3.bf16.msra.mxu1 %v5673_v54  ;;  %v2807_v54 = vsel %vm786_vm2, %v2804_v7, %v6623_v18  ;;  %v5681_v18 = vld [vmem:[%s7219_s1 + $0x108] sm:$0xff]   ;;  %v3376_v7 = vshll.u32 %v3354_v59, 16 }
 0x2bc   : > { %5205 = vmatprep.subr.bf16.mxu1 %v5674_v34 }
 0x2be   : > { %5194 = vmatmul.mubr.bf16.gmra.mrb[4].mxu1 %v6790_v57 }
 0x2bf   : > { %5197 = vmatprep.mubr.bf16.mxu1 %v6795_v29  ;;  %5206 = vmatpush3.bf16.msra.mxu1 %v5674_v34  ;;  %v2823_v34 = vrot.slane %v6658_v23, 7 }
 0x2c0   : > { %5207 = vmatprep.subr.bf16.mxu1 %v5675_v48 }
 0x2c3   : > { %5208 = vmatpush3.bf16.msra.mxu1 %v5675_v48  ;;  %v5691_v48 = vld [vmem:[%s7219_s1 + $0x158] sm:$0xff]  }
 0x2c4   : > { %5209 = vmatprep.subr.bf16.mxu1 %v5676_v30 }
 0x2c6   : > { %5198 = vmatmul.mubr.bf16.gmra.mrb[8].mxu1 %v2635_v3 }
 0x2c7   : > { %5210 = vmatpush3.bf16.msra.mxu1 %v5676_v30  ;;  %5217 = vmatprep.mubr.bf16.mxu1 %v2807_v54  ;;  %v3138_v30 = vld [vmem:[#allocation5 + $0x38] sm:$0x1]  ;;  %v3375_v54 = vrot.slane %v3373_v9, 3 }
 0x2c8   : > { %5211 = vmatprep.subr.bf16.mxu1 %v5677_v12  ;;  %v3203_v3 = vshll.u32 %v3138_v30, 16 }
 0x2cb   : > { %5212 = vmatpush3.bf16.msra.mxu1 %v5677_v12  ;;  %v3197_v12 = vrot.slane %v6661_v46, 1 }
 0x2cc   : > { %5213 = vmatprep.subr.bf16.mxu1 %v5678_v61 }
 0x2cf   : > { %5214 = vmatpush3.bf16.msra.mxu1 %v5678_v61  ;;  %v3378_v61 = vrot.slane %v3376_v7, 4  ;;  %v5718_v7 = vld [vmem:[%s7219_s1 + $0x230] sm:$0xff]  }
 0x2d0   : > { %5215 = vmatprep.subr.bf16.mxu1 %v5679_v24 }
 0x2d3   : > { %5216 = vmatpush3.bf16.msra.mxu1 %v5679_v24  ;;  %v5700_v24 = vld [vmem:[%s7219_s1 + $0x1a0] sm:$0xff]  }
 0x2d4   : > { %5229 = vmatprep.subr.bf16.mxu1 %v5680_v20 }
 0x2d6   : > { %5218 = vmatmul.mubr.bf16.vlgmr.msra.gmra.mrb[0].mxu1 %v6640_v25  ;;  %v2826_v25 = vor.u32 %v6661_v46, %v2823_v34  ;;  %v3201_v46 = vor.u32 %v3197_v12, %v6658_v23  ;;  %v5702_v23 = vld [vmem:[%s7219_s1 + $0x1b0] sm:$0xff]   ;;  %v5704_v34 = vld [vmem:[%s7219_s1 + $0x1c0] sm:$0xff]  }
 0x2d7   : > { %5221 = vmatprep.mubr.bf16.mxu1 %v6643_v4  ;;  %5230 = vmatpush3.bf16.msra.mxu1 %v5680_v20  ;;  %v5684_v4 = vld [vmem:[%s7219_s1 + $0x120] sm:$0xff]   ;;  %v3205_v20 = vrot.slane %v3203_v3, 1 }
 0x2d8   : > { %5231 = vmatprep.subr.bf16.mxu1 %v5681_v18 }
 0x2db   : > { %5232 = vmatpush3.bf16.msra.mxu1 %v5681_v18  ;;  %v3379_v18 = vor.u32 %v3378_v61, %v3375_v54 }
 0x2dc   : > { %5233 = vmatprep.subr.bf16.mxu1 %v5682_v38 }
 0x2de   : > { %5222 = vmatmul.mubr.bf16.gmra.mrb[4].mxu1 %v6646_v27  ;;  %v2827_v27 = vsel %vm786_vm2, %v7288_v2, %v2826_v25  ;;  %v5706_v25 = vld [vmem:[%s7219_s1 + $0x1d0] sm:$0xff]  }
 0x2df   : > { %5225 = vmatprep.mubr.bf16.mxu1 %v6649_v28  ;;  %5234 = vmatpush3.bf16.msra.mxu1 %v5682_v38  ;;  %v5686_v28 = vld [vmem:[%s7219_s1 + $0x130] sm:$0xff]   ;;  %v3383_v38 = vsel %vm366_vm1, %v3379_v18, %v6696_v36  ;;  %v5705_v36 = vld [vmem:[%s7219_s1 + $0x1c8] sm:$0xff]  }
 0x2e0   : > { %5235 = vmatprep.subr.bf16.mxu1 %v5683_v8 }
 0x2e3   : > { %5236 = vmatpush3.bf16.msra.mxu1 %v5683_v8  ;;  %v5703_v8 = vld [vmem:[%s7219_s1 + $0x1b8] sm:$0xff]  }
 0x2e4   : > { %5237 = vmatprep.subr.bf16.mxu1 %v5684_v4 }
 0x2e6   : > { %5226 = vmatmul.mubr.bf16.gmra.mrb[8].mxu1 %v2827_v27 }
 0x2e7   : > { %5238 = vmatpush3.bf16.msra.mxu1 %v5684_v4  ;;  %5245 = vmatprep.mubr.bf16.mxu1 %v6518_v58  ;;  %v5689_v58 = vld [vmem:[%s7219_s1 + $0x148] sm:$0xff]   ;;  %v6919_v4 = vld [vmem:[#allocation5 + $0x38] sm:$0xf] }
 0x2e8   : > { %5239 = vmatprep.subr.bf16.mxu1 %v5685_v44  ;;  %v3404_v2 = vshll.u32 %v6919_v4, 16 }
 0x2eb   : > { %5240 = vmatpush3.bf16.msra.mxu1 %v5685_v44  ;;  %v3401_v44 = vshrl.u32 %v6919_v4, 16 }
 0x2ec   : > { %5241 = vmatprep.subr.bf16.mxu1 %v5686_v28 }
 0x2ed   : > { %v3403_v27 = vrot.slane %v3401_v44, 3 }
 0x2ef   : > { %5242 = vmatpush3.bf16.msra.mxu1 %v5686_v28  ;;  %v3406_v28 = vrot.slane %v3404_v2, 4 }
 0x2f0   : > { %5243 = vmatprep.subr.bf16.mxu1 %v5687_v5 }
 0x2f3   : > { %5244 = vmatpush3.bf16.msra.mxu1 %v5687_v5  ;;  %v5708_v5 = vld [vmem:[%s7219_s1 + $0x1e0] sm:$0xff]  }
 0x2f4   : > { %5257 = vmatprep.subr.bf16.mxu1 %v5688_v60 }
 0x2f6   : > { %5246 = vmatmul.mubr.bf16.vlgmr.msra.gmra.mrb[0].mxu1 %v6528_v47  ;;  %v5692_v47 = vld [vmem:[%s7219_s1 + $0x160] sm:$0xff]  }
 0x2f7   : > { %5249 = vmatprep.mubr.bf16.mxu1 %v6537_v63  ;;  %5258 = vmatpush3.bf16.msra.mxu1 %v5688_v60  ;;  %v5693_v63 = vld [vmem:[%s7219_s1 + $0x168] sm:$0xff]   ;;  %v3407_v60 = vor.u32 %v3406_v28, %v3403_v27 }
 0x2f8   : > { %5259 = vmatprep.subr.bf16.mxu1 %v5689_v58 }
 0x2fb   : > { %5260 = vmatpush3.bf16.msra.mxu1 %v5689_v58 }
 0x2fc   : > { %5261 = vmatprep.subr.bf16.mxu1 %v5690_v19 }
 0x2fe   : > { %5250 = vmatmul.mubr.bf16.gmra.mrb[4].mxu1 %v6547_v1  ;;  %v5695_v1 = vld [vmem:[%s7219_s1 + $0x178] sm:$0xff]  }
 0x2ff   : > { %5253 = vmatprep.mubr.bf16.mxu1 %v6520_v32  ;;  %5262 = vmatpush3.bf16.msra.mxu1 %v5690_v19  ;;  %v5694_v32 = vld [vmem:[%s7219_s1 + $0x170] sm:$0xff]   ;;  %v5709_v19 = vld [vmem:[%s7219_s1 + $0x1e8] sm:$0xff]  }
 0x300   : > { %5263 = vmatprep.subr.bf16.mxu1 %v5691_v48 }
 0x303   : > { %5264 = vmatpush3.bf16.msra.mxu1 %v5691_v48  ;;  %v5710_v48 = vld [vmem:[%s7219_s1 + $0x1f0] sm:$0xff]  }
 0x304   : > { %5265 = vmatprep.subr.bf16.mxu1 %v5692_v47 }
 0x306   : > { %5254 = vmatmul.mubr.bf16.gmra.mrb[8].mxu1 %v6532_v0 }
 0x307   : > { %5266 = vmatpush3.bf16.msra.mxu1 %v5692_v47  ;;  %5273 = vmatprep.mubr.bf16.mxu1 %v6676_v53  ;;  %v5697_v53 = vld [vmem:[%s7219_s1 + $0x188] sm:$0xff]   ;;  %v5711_v47 = vld [vmem:[%s7219_s1 + $0x1f8] sm:$0xff]  }
 0x308   : > { %5267 = vmatprep.subr.bf16.mxu1 %v5693_v63 }
 0x30b   : > { %5268 = vmatpush3.bf16.msra.mxu1 %v5693_v63  ;;  %v5714_v63 = vld [vmem:[%s7219_s1 + $0x210] sm:$0xff]  }
 0x30c   : > { %5269 = vmatprep.subr.bf16.mxu1 %v5694_v32 }
 0x30f   : > { %5270 = vmatpush3.bf16.msra.mxu1 %v5694_v32  ;;  %v3589_v32 = vrot.slane %v6532_v0, 4  ;;  %v5716_v0 = vld [vmem:[%s7219_s1 + $0x220] sm:$0xff]  }
 0x310   : > { %5271 = vmatprep.subr.bf16.mxu1 %v5695_v1 }
 0x313   : > { %5272 = vmatpush3.bf16.msra.mxu1 %v5695_v1 }
 0x314   : > { %5285 = vmatprep.subr.bf16.mxu1 %v5696_v31 }
 0x316   : > { %5274 = vmatmul.mubr.bf16.vlgmr.msra.gmra.mrb[0].mxu1 %v6679_v11  ;;  %v5699_v11 = vld [vmem:[%s7219_s1 + $0x198] sm:$0xff]  }
 0x317   : > { %5277 = vmatprep.mubr.bf16.mxu1 %v6684_v22  ;;  %5286 = vmatpush3.bf16.msra.mxu1 %v5696_v31  ;;  %v3198_v22 = vsel %vm1143_vm3, %v6671_v35, %v3197_v12  ;;  %v3206_v35 = vsel %vm1143_vm3, %v3201_v46, %v3205_v20  ;;  %v5719_v12 = vld [vmem:[%s7219_s1 + $0x238] sm:$0xff]  }
 0x318   : > { %5287 = vmatprep.subr.bf16.mxu1 %v5697_v53 }
 0x31b   : > { %5288 = vmatpush3.bf16.msra.mxu1 %v5697_v53  ;;  %v5715_v53 = vld [vmem:[%s7219_s1 + $0x218] sm:$0xff]  }
 0x31c   : > { %5289 = vmatprep.subr.bf16.mxu1 %v5698_v50 }
 0x31e   : > { %5278 = vmatmul.mubr.bf16.gmra.mrb[4].mxu1 %v6687_v13  ;;  %v5701_v13 = vld [vmem:[%s7219_s1 + $0x1a8] sm:$0xff]  }
 0x31f   : > { %5281 = vmatprep.mubr.bf16.mxu1 %v3198_v22  ;;  %5290 = vmatpush3.bf16.msra.mxu1 %v5698_v50  ;;  %v3591_v50 = vrot.slane %v6919_v4, 4 }
 0x320   : > { %5291 = vmatprep.subr.bf16.mxu1 %v5699_v11 }
 0x323   : > { %5292 = vmatpush3.bf16.msra.mxu1 %v5699_v11  ;;  %v3740_v11 = vld [vmem:[#allocation5 + $0x38] sm:$0x1f] }
 0x324   : > { %5293 = vmatprep.subr.bf16.mxu1 %v5700_v24  ;;  %v3789_v3 = vshll.u32 %v3740_v11, 16 }
 0x326   : > { %5282 = vmatmul.mubr.bf16.gmra.mrb[8].mxu1 %v3206_v35  ;;  %v3791_v54 = vrot.slane %v3789_v3, 5  ;;  %v7292_v3 = vld [vmem:[#allocation32_spill] sm:$0xff] }
 0x327   : > { %5294 = vmatpush3.bf16.msra.mxu1 %v5700_v24  ;;  %5301 = vmatprep.mubr.bf16.mxu1 %v3383_v38 }
 0x328   : > { %5295 = vmatprep.subr.bf16.mxu1 %v5701_v13 }
 0x32b   : > { %5296 = vmatpush3.bf16.msra.mxu1 %v5701_v13 }
 0x32c   : > { %5297 = vmatprep.subr.bf16.mxu1 %v5702_v23 }
 0x32f   : > { %5298 = vmatpush3.bf16.msra.mxu1 %v5702_v23 }
 0x330   : > { %5299 = vmatprep.subr.bf16.mxu1 %v5703_v8 }
 0x333   : > { %5300 = vmatpush3.bf16.msra.mxu1 %v5703_v8 }
 0x334   : > { %5313 = vmatprep.subr.bf16.mxu1 %v5704_v34 }
 0x336   : > { %5302 = vmatmul.mubr.bf16.vlgmr.msra.gmra.mrb[0].mxu1 %v6718_v62  ;;  %v5707_v62 = vld [vmem:[%s7219_s1 + $0x1d8] sm:$0xff]  }
 0x337   : > { %5305 = vmatprep.mubr.bf16.mxu1 %v6739_v10  ;;  %5314 = vmatpush3.bf16.msra.mxu1 %v5704_v34  ;;  %v3556_v10 = vld [vmem:[#allocation5 + $0x8] sm:$0xf0] }
 0x338   : > { %5315 = vmatprep.subr.bf16.mxu1 %v5705_v36  ;;  %v3580_v58 = vrot.slane %v3556_v10, 4  ;;  %v3758_v1 = vshrl.u32 %v3556_v10, 16  ;;  %v3761_v31 = vshll.u32 %v3556_v10, 16 }
 0x33a   : > { %v3763_v59 = vrot.slane %v3761_v31, 5 }
 0x33b   : > { %5316 = vmatpush3.bf16.msra.mxu1 %v5705_v36 }
 0x33c   : > { %5317 = vmatprep.subr.bf16.mxu1 %v5706_v25 }
 0x33e   : > { %5306 = vmatmul.mubr.bf16.gmra.mrb[4].mxu1 %v6743_v33  ;;  %v3408_v33 = vsel %vm366_vm1, %v6698_v17, %v3407_v60  ;;  %v5712_v17 = vld [vmem:[%s7219_s1 + $0x200] sm:$0xff]  }
 0x33f   : > { %5309 = vmatprep.mubr.bf16.mxu1 %v6703_v6  ;;  %5318 = vmatpush3.bf16.msra.mxu1 %v5706_v25  ;;  %v3582_v6 = vsel %vm217_vm0, %v3580_v58, %v6535_v26  ;;  %v5713_v26 = vld [vmem:[%s7219_s1 + $0x208] sm:$0xff]  }
 0x340   : > { %5319 = vmatprep.subr.bf16.mxu1 %v5707_v62 }
 0x343   : > { %5320 = vmatpush3.bf16.msra.mxu1 %v5707_v62 }
 0x344   : > { %5321 = vmatprep.subr.bf16.mxu1 %v5708_v5 }
 0x346   : > { %5310 = vmatmul.mubr.bf16.gmra.mrb[8].mxu1 %v3408_v33 }
 0x347   : > { %5322 = vmatpush3.bf16.msra.mxu1 %v5708_v5  ;;  %5329 = vmatprep.mubr.bf16.mxu1 %v3582_v6 }
 0x348   : > { %5323 = vmatprep.subr.bf16.mxu1 %v5709_v19 }
 0x34b   : > { %5324 = vmatpush3.bf16.msra.mxu1 %v5709_v19 }
 0x34c   : > { %5325 = vmatprep.subr.bf16.mxu1 %v5710_v48 }
 0x34f   : > { %5326 = vmatpush3.bf16.msra.mxu1 %v5710_v48 }
 0x350   : > { %5327 = vmatprep.subr.bf16.mxu1 %v5711_v47 }
 0x353   : > { %5328 = vmatpush3.bf16.msra.mxu1 %v5711_v47 }
 0x354   : > { %5341 = vmatprep.subr.bf16.mxu1 %v5712_v17 }
 0x356   : > { %5330 = vmatmul.mubr.bf16.vlgmr.msra.gmra.mrb[0].mxu1 %v6552_v55  ;;  %v3590_v55 = vsel %vm217_vm0, %v6566_v15, %v3589_v32  ;;  %v3592_v15 = vsel %vm217_vm0, %v3589_v32, %v3591_v50  ;;  %v7290_v50 = vld [vmem:[#allocation31_spill] sm:$0xff] }
 0x357   : > { %5333 = vmatprep.mubr.bf16.mxu1 %v6572_v41  ;;  %5342 = vmatpush3.bf16.msra.mxu1 %v5712_v17  ;;  %v3760_v41 = vrot.slane %v3758_v1, 4 }
 0x358   : > { %5343 = vmatprep.subr.bf16.mxu1 %v5713_v26 }
 0x359   : > { %v3764_v30 = vor.u32 %v3763_v59, %v3760_v41 }
 0x35b   : > { %5344 = vmatpush3.bf16.msra.mxu1 %v5713_v26  ;;  %v3768_v9 = vsel %vm582_vm4, %v3764_v30, %v6769_v14  ;;  %v3786_v14 = vshrl.u32 %v3740_v11, 16 }
 0x35c   : > { %5345 = vmatprep.subr.bf16.mxu1 %v5714_v63 }
 0x35d   : > { %v3788_v22 = vrot.slane %v3786_v14, 4 }
 0x35e   : > { %5334 = vmatmul.mubr.bf16.gmra.mrb[4].mxu1 %v6577_v37  ;;  %v5717_v37 = vld [vmem:[%s7219_s1 + $0x228] sm:$0xff]  }
 0x35f   : > { %5337 = vmatprep.mubr.bf16.mxu1 %v3590_v55  ;;  %5346 = vmatpush3.bf16.msra.mxu1 %v5714_v63  ;;  %v3792_v61 = vor.u32 %v3791_v54, %v3788_v22  ;;  %v7289_v55 = vld [vmem:[#allocation29_spill] sm:$0xff] }
 0x360   : > { %5347 = vmatprep.subr.bf16.mxu1 %v5715_v53 }
 0x361   : > { %v3793_v24 = vsel %vm582_vm4, %v6720_v45, %v3792_v61 }
 0x363   : > { %5348 = vmatpush3.bf16.msra.mxu1 %v5715_v53 }
 0x364   : > { %5349 = vmatprep.subr.bf16.mxu1 %v5716_v0 }
 0x366   : > { %5338 = vmatmul.mubr.bf16.gmra.mrb[8].mxu1 %v3592_v15 }
 0x367   : > { %5350 = vmatpush3.bf16.msra.mxu1 %v5716_v0  ;;  %5357 = vmatprep.mubr.bf16.mxu1 %v3768_v9 }
 0x368   : > { %5351 = vmatprep.subr.bf16.mxu1 %v5717_v37 }
 0x36b   : > { %5352 = vmatpush3.bf16.msra.mxu1 %v5717_v37 }
 0x36c   : > { %5353 = vmatprep.subr.bf16.mxu1 %v5718_v7 }
 0x36f   : > { %5354 = vmatpush3.bf16.msra.mxu1 %v5718_v7 }
 0x370   : > { %5355 = vmatprep.subr.bf16.mxu1 %v5719_v12 }
 0x373   : > { %5356 = vmatpush3.bf16.msra.mxu1 %v5719_v12  ;;  %v7291_v12 = vld [vmem:[#allocation30_spill] sm:$0xff] }
 0x376   : > { %5358 = vmatmul.mubr.bf16.vlgmr.msra.gmra.mrb[0].mxu1 %v6780_v16 }
 0x377   : > { %5361 = vmatprep.mubr.bf16.mxu1 %v6790_v57 }
 0x37e   : > { %5362 = vmatmul.mubr.bf16.gmra.mrb[4].mxu1 %v6795_v29 }
 0x37f   : > { %5365 = vmatprep.mubr.bf16.mxu1 %v6729_v43 }
 0x386   : > { %5366 = vmatmul.mubr.bf16.gmra.mrb[8].mxu1 %v3793_v24 }
 0x449   : > { %v6988_v46 = vpop.f32.mrb[0].mxu1 }
 0x44a   : > { %v6990_v20 = vpop.f32.mrb[1].mxu1  ;;  %v3943_v29 = vmul.f32 %v6988_v46, %v6423_v56 }
 0x44b   : > { %v3941_v16 = vmul.f32 %v6990_v20, %v6421_v51  ;;  %v6994_v57 = vpop.f32.mrb[2].mxu1 }
 0x44c   : > { %v6996_v18 = vpop.f32.mrb[3].mxu1  ;;  %v3944_v13 = vmul.f32 %v6994_v57, %v6427_v40  ;;  %v3972_v23 = vmul.f32 %v6988_v46, %v3943_v29 }
 0x44d   : > { %v3942_v43 = vmul.f32 %v6996_v18, %v6425_v49  ;;  %v3970_v45 = vmul.f32 %v3941_v16, %v6990_v20 }
 0x44e   : > { %v3973_v25 = vmul.f32 %v6994_v57, %v3944_v13 }
 0x44f   : > { %v3953_v35 = vadd.f32 %v3942_v43, %v3941_v16  ;;  %v3971_v38 = vmul.f32 %v3942_v43, %v6996_v18 }
 0x451   : > { %v3954_v8 = vadd.f32 %v3953_v35, %v3943_v29  ;;  %v3982_v34 = vadd.f32 %v3971_v38, %v3970_v45  ;;  %v7007_v36 = vpop.f32.mrb[4].mxu1 }
 0x452   : > { %v7009_v4 = vpop.f32.mrb[5].mxu1  ;;  %v3947_v28 = vmul.f32 %v7007_v36, %v6447_v21  ;;  %v4052_v21 = vld [vmem:[#allocation2 + $0x30] sm:$0xff] }
 0x453   : > { %v3983_v44 = vadd.f32 %v3982_v34, %v3972_v23  ;;  %v3945_v2 = vmul.f32 %v7009_v4, %v6429_v52  ;;  %v3955_v62 = vadd.f32 %v3954_v8, %v3944_v13  ;;  %v7014_v27 = vpop.f32.mrb[6].mxu1 }
 0x454   : > { %v7018_v10 = vpop.f32.mrb[7].mxu1  ;;  %v3948_v6 = vmul.f32 %v7014_v27, %v6456_v42  ;;  %v3976_v17 = vmul.f32 %v7007_v36, %v3947_v28 }
 0x455   : > { %v3956_v5 = vadd.f32 %v3955_v62, %v3945_v2  ;;  %v3974_v60 = vmul.f32 %v3945_v2, %v7009_v4  ;;  %v3984_v58 = vadd.f32 %v3983_v44, %v3973_v25  ;;  %v3946_v19 = vmul.f32 %v7018_v10, %v6439_v39 }
 0x456   : > { %v3977_v31 = vmul.f32 %v7014_v27, %v3948_v6 }
 0x457   : > { %v3985_v33 = vadd.f32 %v3984_v58, %v3974_v60  ;;  %v3957_v48 = vadd.f32 %v3956_v5, %v3946_v19  ;;  %v3975_v47 = vmul.f32 %v3946_v19, %v7018_v10 }
 0x459   : > { %v3958_v26 = vadd.f32 %v3957_v48, %v3947_v28  ;;  %v3986_v63 = vadd.f32 %v3985_v33, %v3975_v47  ;;  %v7027_v32 = vpop.f32.mrb[8].mxu1 }
 0x45a   : > { %v7029_v1 = vpop.f32.mrb[9].mxu1  ;;  %v3951_v30 = vmul.f32 %v7027_v32, %v7290_v50 }
 0x45b   : > { %v3987_v53 = vadd.f32 %v3986_v63, %v3976_v17  ;;  %v3949_v41 = vmul.f32 %v7029_v1, %v7289_v55  ;;  %v3959_v59 = vadd.f32 %v3958_v26, %v3948_v6  ;;  %v7034_v0 = vpop.f32.mrb[10].mxu1  ;;  %v4072_v17 = vld [vmem:[#allocation4 + $0x10] sm:$0xff]  ;;  %v4073_v26 = vld [vmem:[#allocation4 + $0x18] sm:$0xff]  ;;  %v4074_v63 = vld [vmem:[#allocation4 + $0x20] sm:$0xff] }
 0x45c   : > { %v7038_v37 = vpop.f32.mrb[11].mxu1  ;;  %v3952_v22 = vmul.f32 %v7034_v0, %v7292_v3  ;;  %v3980_v24 = vmul.f32 %v7027_v32, %v3951_v30 }
 0x45d   : > { %v3960_v15 = vadd.f32 %v3959_v59, %v3949_v41  ;;  %v3978_v9 = vmul.f32 %v3949_v41, %v7029_v1  ;;  %v3988_v7 = vadd.f32 %v3987_v53, %v3977_v31  ;;  %v3950_v11 = vmul.f32 %v7038_v37, %v7291_v12  ;;  %v4075_v53 = vld [vmem:[#allocation4 + $0x28] sm:$0xff]  ;;  %v4076_v41 = vld [vmem:[#allocation4 + $0x30] sm:$0xff]  ;;  %v4077_v59 = vld [vmem:[#allocation4 + $0x38] sm:$0xff] }
 0x45e   : > { %v3981_v43 = vmul.f32 %v7034_v0, %v3952_v22  ;;  %v4084_v31 = vstv %s4045_s23 }
 0x45f   : > { %v3989_v14 = vadd.f32 %v3988_v7, %v3978_v9  ;;  %v3961_v54 = vadd.f32 %v3960_v15, %v3950_v11  ;;  %v3979_v61 = vmul.f32 %v3950_v11, %v7038_v37  ;;  %v4079_v15 = vld [vmem:[#allocation4 + $0x48] sm:$0xff]  ;;  %v4080_v9 = vld [vmem:[#allocation4 + $0x50] sm:$0xff]  ;;  %v4081_v7 = vld [vmem:[#allocation4 + $0x58] sm:$0xff] }
 0x460   : > { %v4082_v11 = vld [vmem:[#allocation4 + $0x60] sm:$0xff] }
 0x461   : > { %v3962_v16 = vadd.f32 %v3961_v54, %v3951_v30  ;;  %v3990_v29 = vadd.f32 %v3989_v14, %v3979_v61  ;;  %v4078_v30 = vld [vmem:[#allocation4 + $0x40] sm:$0xff]  ;;  %v4083_v14 = vld [vmem:[#allocation4 + $0x68] sm:$0xff]  ;;  %v7052_v54 = vmul.f32 %v4084_v31, %v4073_v26 }
 0x463   : > { %v3963_v45 = vadd.f32 %v3962_v16, %v3952_v22  ;;  %v3991_v13 = vadd.f32 %v3990_v29, %v3980_v24  ;;  %v7050_v22 = vmul.f32 %v4084_v31, %v4072_v17  ;;  %v7054_v24 = vmul.f32 %v4084_v31, %v4074_v63 }
 0x464   : > { %v7056_v16 = vmul.f32 %v4084_v31, %v4075_v53  ;;  %v7058_v29 = vmul.f32 %v4084_v31, %v4076_v41 }
 0x465   : > { %v3964_v35 = vrot.slane %v3963_v45, 4  ;;  %v3992_v38 = vadd.f32 %v3991_v13, %v3981_v43  ;;  %v4109_v43 = vld [vmem:[%s7223_s0 + $0x10] sm:$0xff]  ;;  %v4111_v13 = vld [vmem:[%s7223_s0 + $0x20] sm:$0xff] }
 0x467   : > { %v3965_v23 = vadd.f32 %v3964_v35, %v3963_v45  ;;  %v3993_v8 = vrot.slane %v3992_v38, 4  ;;  %v4110_v45 = vld [vmem:[%s7223_s0 + $0x18] sm:$0xff]  ;;  %v4121_v35 = vstv %s4047_s24 }
 0x468   : > { %v7096_v17 = vmul.f32 %v4121_v35, %v4110_v45  ;;  %v7098_v26 = vmul.f32 %v4121_v35, %v4111_v13  ;;  %v4120_v45 = vld [vmem:[%s7223_s0 + $0x68] sm:$0xff] }
 0x469   : > { %v3966_v34 = vrot.slane %v3965_v23, 2  ;;  %v3994_v25 = vadd.f32 %v3993_v8, %v3992_v38  ;;  %v7293_v38 = vld [vmem:[#allocation19_spill] sm:$0xff]  ;;  %v7070_v8 = vmul.f32 %v4084_v31, %v4077_v59  ;;  %v7296_v59 = vld [vmem:[#allocation20_spill] sm:$0xff]  ;;  %v4133_v12 = vmul.f32 %v4121_v35, %v4120_v45 }
 0x46b   : > { %v3967_v44 = vadd.f32 %v3966_v34, %v3965_v23  ;;  %v3995_v2 = vrot.slane %v3994_v25, 2  ;;  %v7072_v34 = vmul.f32 %v4084_v31, %v4078_v30 }
 0x46d   : > { %v3968_v62 = vrot.slane %v3967_v44, 1  ;;  %v3996_v28 = vadd.f32 %v3995_v2, %v3994_v25  ;;  %v7074_v25 = vmul.f32 %v4084_v31, %v4079_v15  ;;  %v4113_v2 = vld [vmem:[%s7223_s0 + $0x30] sm:$0xff] }
 0x46e   : > { %v7102_v53 = vmul.f32 %v4121_v35, %v4113_v2  ;;  %v4048_v2 = vld [vmem:[#allocation2 + $0x10] sm:$0xff] }
 0x46f   : > { %v3969_v5 = vadd.f32 %v3968_v62, %v3967_v44  ;;  %v3997_v60 = vrot.slane %v3996_v28, 1  ;;  %v4112_v44 = vld [vmem:[%s7223_s0 + $0x28] sm:$0xff]  ;;  %v4114_v62 = vld [vmem:[%s7223_s0 + $0x38] sm:$0xff] }
 0x470   : > { %v7100_v63 = vmul.f32 %v4121_v35, %v4112_v44  ;;  %v7104_v41 = vmul.f32 %v4121_v35, %v4114_v62  ;;  %v4049_v62 = vld [vmem:[#allocation2 + $0x18] sm:$0xff] }
 0x471   : > { %v3998_v58 = vadd.f32 %v3997_v60, %v3996_v28  ;;  %v3999_v19 = vmul.f32 0.03125, %v3969_v5  ;;  %v7085_v28 = vmul.f32 %v4084_v31, %v4080_v9  ;;  %v7087_v5 = vmul.f32 %v4084_v31, %v4081_v7  ;;  %v4115_v9 = vld [vmem:[%s7223_s0 + $0x40] sm:$0xff]  ;;  %v4116_v7 = vld [vmem:[%s7223_s0 + $0x48] sm:$0xff] }
 0x472   : > { %v7089_v60 = vmul.f32 %v4084_v31, %v4082_v11  ;;  %v4117_v11 = vld [vmem:[%s7223_s0 + $0x50] sm:$0xff]  ;;  %v4129_v44 = vmul.f32 %v4121_v35, %v4116_v7 }
 0x473   : > { %v4000_v33 = vmul.f32 0.03125, %v3998_v58  ;;  %v4001_v6 = vmul.f32 %v3999_v19, %v3999_v19  ;;  %v7091_v58 = vmul.f32 %v4084_v31, %v4083_v14  ;;  %v4056_v7 = vld [vmem:[#allocation2 + $0x50] sm:$0xff] }
 0x475   : > { %v4002_v48 = vsub.f32 %v4000_v33, %v4001_v6  ;;  %v7294_v6 = vld [vmem:[#allocation33_spill] sm:$0xff] }
 0x476   : > { %7295 = vst [vmem:[#allocation33_spill] sm:$0xff] %v7104_v41 }
 0x477   : > { %v4003_v47 = vadd.f32 1e-05, %v4002_v48 }
 0x479   : > { %5722 = vrsqrt.f32 %v4003_v47  ;;  %v7094_v47 = vmul.f32 %v4121_v35, %v4109_v43  ;;  %v4119_v43 = vld [vmem:[%s7223_s0 + $0x60] sm:$0xff] }
 0x47a   : > { %v4132_v50 = vmul.f32 %v4121_v35, %v4119_v43  ;;  %v4057_v43 = vld [vmem:[#allocation2 + $0x58] sm:$0xff] }
 0x483   : > { %v5723_v61 = vpop.eup %5722 }
 0x484   : > { %v4005_v23 = vmul.f32 %v5723_v61, %v7293_v38  ;;  %v4118_v61 = vld [vmem:[%s7223_s0 + $0x58] sm:$0xff] }
 0x485   : > { %v4131_v3 = vmul.f32 %v4121_v35, %v4118_v61 }
 0x486   : > { %v4006_v33 = vmul.f32 %v4005_v23, %v3999_v19  ;;  %v4012_v48 = vrot.slane %v4005_v23, %v7294_v6  ;;  %v4128_v23 = vmul.f32 %v4121_v35, %v4115_v9  ;;  %v4055_v9 = vld [vmem:[#allocation2 + $0x48] sm:$0xff] }
 0x488   : > { %v4007_v30 = vsub.f32 %v7296_v59, %v4006_v33  ;;  %v4014_v31 = vmul.f32 %v4012_v48, %v6990_v20  ;;  %v4015_v19 = vmul.f32 %v4012_v48, %v6996_v18  ;;  %v4016_v15 = vmul.f32 %v6988_v46, %v4012_v48  ;;  %v4050_v33 = vld [vmem:[#allocation2 + $0x20] sm:$0xff] }
 0x489   : > { %v4017_v14 = vmul.f32 %v6994_v57, %v4012_v48  ;;  %v4018_v20 = vmul.f32 %v4012_v48, %v7009_v4  ;;  %v4019_v18 = vmul.f32 %v4012_v48, %v7018_v10  ;;  %v4020_v46 = vmul.f32 %v7007_v36, %v4012_v48 }
 0x48a   : > { %v4021_v57 = vmul.f32 %v7014_v27, %v4012_v48  ;;  %v4022_v4 = vmul.f32 %v4012_v48, %v7029_v1  ;;  %v4023_v10 = vmul.f32 %v4012_v48, %v7038_v37  ;;  %v4024_v36 = vmul.f32 %v7027_v32, %v4012_v48  ;;  %v4051_v37 = vld [vmem:[#allocation2 + $0x28] sm:$0xff]  ;;  %v4053_v32 = vld [vmem:[#allocation2 + $0x38] sm:$0xff] }
 0x48b   : > { %v4025_v13 = vmul.f32 %v7034_v0, %v4012_v48  ;;  %v4030_v38 = vrot.slane %v4007_v30, %v7294_v6  ;;  %v4130_v59 = vmul.f32 %v4121_v35, %v4117_v11  ;;  %v4054_v30 = vld [vmem:[#allocation2 + $0x40] sm:$0xff] }
 0x48c   : > { %v4058_v35 = vld [vmem:[#allocation2 + $0x60] sm:$0xff] }
 0x48d   : > { %v4032_v27 = vadd.f32 %v4030_v38, %v4014_v31  ;;  %v4033_v55 = vadd.f32 %v4030_v38, %v4015_v19  ;;  %v4034_v1 = vadd.f32 %v4030_v38, %v4016_v15  ;;  %v4035_v42 = vadd.f32 %v4030_v38, %v4017_v14  ;;  %v4059_v31 = vld [vmem:[#allocation2 + $0x68] sm:$0xff] }
 0x48e   : > { %v4036_v39 = vadd.f32 %v4030_v38, %v4018_v20  ;;  %v4037_v0 = vadd.f32 %v4030_v38, %v4019_v18  ;;  %v4038_v48 = vadd.f32 %v4030_v38, %v4020_v46  ;;  %v4039_v6 = vadd.f32 %v4030_v38, %v4021_v57 }
 0x48f   : > { %v4040_v52 = vadd.f32 %v4030_v38, %v4022_v4  ;;  %v4041_v40 = vadd.f32 %v4030_v38, %v4023_v10  ;;  %v4042_v11 = vadd.f32 %v4030_v38, %v4024_v36  ;;  %v4043_v61 = vadd.f32 %v4030_v38, %v4025_v13 }
 0x490   : > { %v4060_v19 = vadd.f32 %v4048_v2, %v4032_v27  ;;  %v4061_v15 = vadd.f32 %v4049_v62, %v4033_v55  ;;  %v4062_v14 = vadd.f32 %v4050_v33, %v4034_v1  ;;  %v4063_v45 = vadd.f32 %v4051_v37, %v4035_v42  ;;  %v7300_v62 = vld [vmem:[#allocation22_spill] sm:$0xff]  ;;  %v7301_v33 = vld [vmem:[#allocation24_spill] sm:$0xff]  ;;  %v7302_v27 = vld [vmem:[#allocation25_spill] sm:$0xff] }
 0x491   : > { %v4064_v56 = vadd.f32 %v4052_v21, %v4036_v39  ;;  %v4065_v49 = vadd.f32 %v4053_v32, %v4037_v0  ;;  %v4066_v20 = vadd.f32 %v4054_v30, %v4038_v48  ;;  %v4067_v18 = vadd.f32 %v4055_v9, %v4039_v6  ;;  %v7303_v1 = vld [vmem:[#allocation26_spill] sm:$0xff]  ;;  %v7304_v37 = vld [vmem:[#allocation27_spill] sm:$0xff]  ;;  %v7309_v6 = vld [vmem:[#allocation32_spill] sm:$0xff] }
 0x492   : > { %v4068_v46 = vadd.f32 %v4056_v7, %v4040_v52  ;;  %v4069_v57 = vadd.f32 %v4057_v43, %v4041_v40  ;;  %v4070_v51 = vadd.f32 %v4058_v35, %v4042_v11  ;;  %v4071_v41 = vadd.f32 %v4059_v31, %v4043_v61  ;;  %v7308_v0 = vld [vmem:[#allocation31_spill] sm:$0xff]  ;;  %v4171_v7 = vld [vmem:[#allocation2 + $0x8] sm:$0xff] (%p90_p4) }
 0x493   : > { %v4097_v4 = vadd.f32 %v7050_v22, %v4060_v19  ;;  %v4098_v10 = vadd.f32 %v7052_v54, %v4061_v15  ;;  %v4099_v36 = vadd.f32 %v7054_v24, %v4062_v14  ;;  %v4100_v13 = vadd.f32 %v7056_v16, %v4063_v45  ;;  %v4170_v9 = vld [vmem:[#allocation2] sm:$0xff] (%p90_p4)  ;;  %4187 = vst [vmem:[%s7222_s6 + $0x8] sm:$0xff] (%p90_p4), %v4171_v7 }
 0x494   : > { %v4101_v55 = vadd.f32 %v7058_v29, %v4064_v56  ;;  %v4102_v42 = vadd.f32 %v7070_v8, %v4065_v49  ;;  %v4103_v39 = vadd.f32 %v7072_v34, %v4066_v20  ;;  %v4104_v21 = vadd.f32 %v7074_v25, %v4067_v18  ;;  %v7297_v8 = vld [vmem:[#allocation33_spill] sm:$0xff]  ;;  %4186 = vst [vmem:[%s7222_s6] sm:$0xff] (%p90_p4), %v4170_v9 }
 0x495   : > { %v4105_v40 = vadd.f32 %v7085_v28, %v4068_v46  ;;  %v4106_v52 = vadd.f32 %v7087_v5, %v4069_v57  ;;  %v4107_v22 = vadd.f32 %v7089_v60, %v4070_v51  ;;  %v4108_v54 = vadd.f32 %v7091_v58, %v4071_v41  ;;  %v7298_v60 = vld [vmem:[#allocation21_spill] sm:$0xff]  ;;  %v7299_v41 = vld [vmem:[#allocation23_spill] sm:$0xff] }
 0x496   : > { %v4134_v24 = vadd.f32 %v7094_v47, %v4097_v4  ;;  %v4135_v16 = vadd.f32 %v7096_v17, %v4098_v10  ;;  %v4136_v56 = vadd.f32 %v7098_v26, %v4099_v36  ;;  %v4137_v49 = vadd.f32 %v7100_v63, %v4100_v13  ;;  %v4184_v57 = vld [vmem:[#allocation2 + $0x70] sm:$0xff] (%p90_p4)  ;;  %v4185_v4 = vld [vmem:[#allocation2 + $0x78] sm:$0xff] (%p90_p4) }
 0x497   : > { %v4138_v29 = vadd.f32 %v7102_v53, %v4101_v55  ;;  %v4139_v34 = vadd.f32 %v7297_v8, %v4102_v42  ;;  %v4140_v25 = vadd.f32 %v4128_v23, %v4103_v39  ;;  %v4141_v28 = vadd.f32 %v4129_v44, %v4104_v21  ;;  %v7305_v23 = vld [vmem:[#allocation28_spill] sm:$0xff]  ;;  %4200 = vst [vmem:[%s7222_s6 + $0x70] sm:$0xff] (%p90_p4), %v4184_v57 }
 0x498   : > { %v4142_v38 = vadd.f32 %v4130_v59, %v4105_v40  ;;  %v4143_v5 = vadd.f32 %v4131_v3, %v4106_v52  ;;  %v4144_v2 = vadd.f32 %v4132_v50, %v4107_v22  ;;  %v4145_v51 = vadd.f32 %v4133_v12, %v4108_v54  ;;  %v7306_v59 = vld [vmem:[#allocation29_spill] sm:$0xff]  ;;  %v7307_v50 = vld [vmem:[#allocation30_spill] sm:$0xff]  ;;  %4201 = vst [vmem:[%s7222_s6 + $0x78] sm:$0xff] (%p90_p4), %v4185_v4 }
 0x499   : > { %v4146_v58 = vmul.f32 %v4134_v24, %v7298_v60  ;;  %v4147_v47 = vmul.f32 %v4135_v16, %v7299_v41  ;;  %v4148_v17 = vmul.f32 %v4136_v56, %v7300_v62  ;;  %v4149_v26 = vmul.f32 %v4137_v49, %v7301_v33 }
 0x49a   : > { %v4150_v63 = vmul.f32 %v4138_v29, %v7302_v27  ;;  %v4151_v53 = vmul.f32 %v4139_v34, %v7303_v1  ;;  %v4152_v32 = vmul.f32 %v4140_v25, %v7304_v37  ;;  %v4153_v44 = vmul.f32 %v4141_v28, %v7305_v23 }
 0x49b   : > { %v4154_v3 = vmul.f32 %v4142_v38, %v7306_v59  ;;  %v4155_v12 = vmul.f32 %v4143_v5, %v7307_v50  ;;  %v4156_v48 = vmul.f32 %v4144_v2, %v7308_v0  ;;  %v4157_v30 = vmul.f32 %v4145_v51, %v7309_v6  ;;  %4158 = vst [vmem:[#allocation2 + $0x10] sm:$0xff] %v4146_v58  ;;  %92 = sbr.rel (!%p90_p4) target bundleno = 19 (0x13), region = 63 }
 0x49c   : > { %4159 = vst [vmem:[#allocation2 + $0x18] sm:$0xff] %v4147_v47  ;;  %4160 = vst [vmem:[#allocation2 + $0x20] sm:$0xff] %v4148_v17 }
 0x49d   : > { %4161 = vst [vmem:[#allocation2 + $0x28] sm:$0xff] %v4149_v26  ;;  %4162 = vst [vmem:[#allocation2 + $0x30] sm:$0xff] %v4150_v63 }
 0x49e   : > { %4163 = vst [vmem:[#allocation2 + $0x38] sm:$0xff] %v4151_v53  ;;  %4164 = vst [vmem:[#allocation2 + $0x40] sm:$0xff] %v4152_v32 }
 0x49f   : > { %4165 = vst [vmem:[#allocation2 + $0x48] sm:$0xff] %v4153_v44  ;;  %4166 = vst [vmem:[#allocation2 + $0x50] sm:$0xff] %v4154_v3 }
 0x4a0   : > { %4167 = vst [vmem:[#allocation2 + $0x58] sm:$0xff] %v4155_v12  ;;  %4168 = vst [vmem:[#allocation2 + $0x60] sm:$0xff] %v4156_v48 }
 0x4a1   : > { %4169 = vst [vmem:[#allocation2 + $0x68] sm:$0xff] %v4157_v30 }
 0x4a2   :  { %v4172_v11 = vld [vmem:[#allocation2 + $0x10] sm:$0xff] }
 0x4a3   :  { %4188 = vst [vmem:[%s7222_s6 + $0x10] sm:$0xff] %v4172_v11  ;;  %v4173_v61 = vld [vmem:[#allocation2 + $0x18] sm:$0xff]  ;;  %v4174_v43 = vld [vmem:[#allocation2 + $0x20] sm:$0xff] }
 0x4a4   :  { %v4175_v35 = vld [vmem:[#allocation2 + $0x28] sm:$0xff]  ;;  %4189 = vst [vmem:[%s7222_s6 + $0x18] sm:$0xff] %v4173_v61  ;;  %4190 = vst [vmem:[%s7222_s6 + $0x20] sm:$0xff] %v4174_v43  ;;  %v4176_v31 = vld [vmem:[#allocation2 + $0x30] sm:$0xff] }
 0x4a5   :  { %4191 = vst [vmem:[%s7222_s6 + $0x28] sm:$0xff] %v4175_v35  ;;  %v4177_v19 = vld [vmem:[#allocation2 + $0x38] sm:$0xff]  ;;  %v4178_v15 = vld [vmem:[#allocation2 + $0x40] sm:$0xff]  ;;  %4192 = vst [vmem:[%s7222_s6 + $0x30] sm:$0xff] %v4176_v31 }
 0x4a6   :  { %4193 = vst [vmem:[%s7222_s6 + $0x38] sm:$0xff] %v4177_v19  ;;  %4194 = vst [vmem:[%s7222_s6 + $0x40] sm:$0xff] %v4178_v15  ;;  %v4179_v14 = vld [vmem:[#allocation2 + $0x48] sm:$0xff]  ;;  %v4180_v45 = vld [vmem:[#allocation2 + $0x50] sm:$0xff] }
 0x4a7   :  { %v4181_v20 = vld [vmem:[#allocation2 + $0x58] sm:$0xff]  ;;  %4195 = vst [vmem:[%s7222_s6 + $0x48] sm:$0xff] %v4179_v14  ;;  %4196 = vst [vmem:[%s7222_s6 + $0x50] sm:$0xff] %v4180_v45  ;;  %v4182_v18 = vld [vmem:[#allocation2 + $0x60] sm:$0xff] }
 0x4a8   :  { %4197 = vst [vmem:[%s7222_s6 + $0x58] sm:$0xff] %v4181_v20  ;;  %v4183_v46 = vld [vmem:[#allocation2 + $0x68] sm:$0xff]  ;;  %4198 = vst [vmem:[%s7222_s6 + $0x60] sm:$0xff] %v4182_v18 }
 0x4a9   :  { %4199 = vst [vmem:[%s7222_s6 + $0x68] sm:$0xff] %v4183_v46 }

// kernel: encoder_forward.7
= control target key start
LH: loop header
LB: loop body
LE: loop exit
PB: predicated region body
PF: predicated region fallthrough
CT: control target
= control target key end

     0   :  { %vm3035_vm0 = vmmov 0   ;;  %s3714_s1 = inlined_call_operand.vmem [shape: bf16[3200,128], index: 1, kind: input, shape index: {}]   ;;  %s3715_s4 = inlined_call_operand.<no memory space> [shape: f32[1], index: 4, kind: input, shape index: {}]   ;;  %s3716_s0 = inlined_call_operand.vmem [shape: bf16[8,3200], index: 0, kind: input, shape index: {}]   ;;  %s3717_s2 = inlined_call_operand.vmem [shape: f32[1,128], index: 2, kind: input, shape index: {}]   ;;  %s3718_s3 = inlined_call_operand.vmem [shape: f32[1,128], index: 3, kind: input, shape index: {}]   ;;  %s3719_s5 = inlined_call_operand.vmem [shape: f32[8,128], index: 5, kind: output, shape index: {}]  }
   0x1   :  { %v2807_v0 = vld [vmem:[%s3714_s1 + $0x40] sm:$0xff]   ;;  %v2811_v4 = vld [vmem:[%s3714_s1 + $0x48] sm:$0xff]   ;;  %v2815_v8 = vld [vmem:[%s3714_s1 + $0x50] sm:$0xff]  }
   0x2   :  { %v2808_v1 = vld [vmem:[%s3714_s1 + $0xc0] sm:$0xff]   ;;  %2512 = vmatprep.subr.bf16.mxu0 %v2807_v0  ;;  %v2812_v5 = vld [vmem:[%s3714_s1 + $0xc8] sm:$0xff]   ;;  %v2816_v9 = vld [vmem:[%s3714_s1 + $0xd0] sm:$0xff]  }
   0x3   :  { %v2809_v2 = vld [vmem:[%s3714_s1] sm:$0xff]   ;;  %2534 = vmatprep.subr.bf16.mxu1 %v2808_v1  ;;  %v2813_v6 = vld [vmem:[%s3714_s1 + $0x8] sm:$0xff]   ;;  %v2817_v10 = vld [vmem:[%s3714_s1 + $0x10] sm:$0xff]  }
   0x4   :  { %v2810_v3 = vld [vmem:[%s3714_s1 + $0x80] sm:$0xff]   ;;  %2513 = vmatpush3.bf16.msra.mxu0 %v2809_v2  ;;  %v2814_v7 = vld [vmem:[%s3714_s1 + $0x88] sm:$0xff]   ;;  %v2818_v11 = vld [vmem:[%s3714_s1 + $0x90] sm:$0xff]  }
   0x5   :  { %2535 = vmatpush3.bf16.msra.mxu1 %v2810_v3  ;;  %2514 = vmatprep.subr.bf16.mxu0 %v2811_v4  ;;  %v2819_v12 = vld [vmem:[%s3714_s1 + $0x58] sm:$0xff]   ;;  %v2823_v16 = vld [vmem:[%s3714_s1 + $0x60] sm:$0xff]   ;;  %v2827_v20 = vld [vmem:[%s3714_s1 + $0x68] sm:$0xff]  }
   0x6   :  { %2536 = vmatprep.subr.bf16.mxu1 %v2812_v5  ;;  %v2820_v13 = vld [vmem:[%s3714_s1 + $0xd8] sm:$0xff]   ;;  %v2824_v17 = vld [vmem:[%s3714_s1 + $0xe0] sm:$0xff]   ;;  %v2828_v21 = vld [vmem:[%s3714_s1 + $0xe8] sm:$0xff]  }
   0x7   :  { %v2821_v14 = vld [vmem:[%s3714_s1 + $0x18] sm:$0xff]   ;;  %v2825_v18 = vld [vmem:[%s3714_s1 + $0x20] sm:$0xff]   ;;  %v2829_v22 = vld [vmem:[%s3714_s1 + $0x28] sm:$0xff]  }
   0x8   :  { %2515 = vmatpush3.bf16.msra.mxu0 %v2813_v6  ;;  %v2822_v15 = vld [vmem:[%s3714_s1 + $0x98] sm:$0xff]   ;;  %v2826_v19 = vld [vmem:[%s3714_s1 + $0xa0] sm:$0xff]   ;;  %v2830_v23 = vld [vmem:[%s3714_s1 + $0xa8] sm:$0xff]  }
   0x9   :  { %2537 = vmatpush3.bf16.msra.mxu1 %v2814_v7  ;;  %2516 = vmatprep.subr.bf16.mxu0 %v2815_v8  ;;  %v2831_v24 = vld [vmem:[%s3714_s1 + $0x70] sm:$0xff]   ;;  %v2835_v28 = vld [vmem:[%s3714_s1 + $0x78] sm:$0xff]   ;;  %v22_v32 = vld [vmem:[%s3716_s0] sm:$0xff] }
   0xa   :  { %2538 = vmatprep.subr.bf16.mxu1 %v2816_v9  ;;  %v2832_v25 = vld [vmem:[%s3714_s1 + $0xf0] sm:$0xff]   ;;  %v2836_v29 = vld [vmem:[%s3714_s1 + $0xf8] sm:$0xff]   ;;  %v23_v33 = vld [vmem:[%s3716_s0 + $0x8] sm:$0xff]  ;;  %v2287_v34 = vcombine.low %v22_v32, %v22_v32  ;;  %v2288_v35 = vcombine.high %v22_v32, %v22_v32 }
   0xb   :  { %v2833_v26 = vld [vmem:[%s3714_s1 + $0x30] sm:$0xff]   ;;  %v2837_v30 = vld [vmem:[%s3714_s1 + $0x38] sm:$0xff]   ;;  %v2289_v36 = vcombine.low %v23_v33, %v23_v33  ;;  %v2290_v37 = vcombine.high %v23_v33, %v23_v33  ;;  %v2843_v38 = vld [vmem:[%s3714_s1 + $0x140] sm:$0xff]  }
   0xc   :  { %2517 = vmatpush3.bf16.msra.mxu0 %v2817_v10  ;;  %v2834_v27 = vld [vmem:[%s3714_s1 + $0xb0] sm:$0xff]   ;;  %v2838_v31 = vld [vmem:[%s3714_s1 + $0xb8] sm:$0xff]   ;;  %v2844_v39 = vld [vmem:[%s3714_s1 + $0x100] sm:$0xff]   ;;  %1755 = vmatprep.mubr.bf16.mxu0 %v2288_v35 }
   0xd   :  { %2539 = vmatpush3.bf16.msra.mxu1 %v2818_v11  ;;  %2518 = vmatprep.subr.bf16.mxu0 %v2819_v12  ;;  %v2845_v40 = vld [vmem:[%s3714_s1 + $0x1c0] sm:$0xff]   ;;  %v2847_v42 = vld [vmem:[%s3714_s1 + $0x148] sm:$0xff]   ;;  %v2851_v46 = vld [vmem:[%s3714_s1 + $0x150] sm:$0xff]  }
   0xe   :  { %2540 = vmatprep.subr.bf16.mxu1 %v2820_v13  ;;  %1795 = vmatprep.mubr.bf16.mxu1 %v2290_v37  ;;  %v2846_v41 = vld [vmem:[%s3714_s1 + $0x180] sm:$0xff]   ;;  %v2848_v43 = vld [vmem:[%s3714_s1 + $0x108] sm:$0xff]   ;;  %v2852_v47 = vld [vmem:[%s3714_s1 + $0x110] sm:$0xff]  }
   0xf   :  { %v2849_v44 = vld [vmem:[%s3714_s1 + $0x1c8] sm:$0xff]   ;;  %v2853_v48 = vld [vmem:[%s3714_s1 + $0x1d0] sm:$0xff]   ;;  %v2855_v50 = vld [vmem:[%s3714_s1 + $0x158] sm:$0xff]  }
  0x10   :  { %2519 = vmatpush3.bf16.msra.mxu0 %v2821_v14  ;;  %v2850_v45 = vld [vmem:[%s3714_s1 + $0x188] sm:$0xff]   ;;  %v2854_v49 = vld [vmem:[%s3714_s1 + $0x190] sm:$0xff]   ;;  %v2856_v51 = vld [vmem:[%s3714_s1 + $0x118] sm:$0xff]  }
  0x11   :  { %2541 = vmatpush3.bf16.msra.mxu1 %v2822_v15  ;;  %2520 = vmatprep.subr.bf16.mxu0 %v2823_v16  ;;  %v2857_v52 = vld [vmem:[%s3714_s1 + $0x1d8] sm:$0xff]   ;;  %v2859_v54 = vld [vmem:[%s3714_s1 + $0x160] sm:$0xff]   ;;  %v2863_v58 = vld [vmem:[%s3714_s1 + $0x168] sm:$0xff]  }
  0x12   :  { %2542 = vmatprep.subr.bf16.mxu1 %v2824_v17  ;;  %v2858_v53 = vld [vmem:[%s3714_s1 + $0x198] sm:$0xff]   ;;  %v2860_v55 = vld [vmem:[%s3714_s1 + $0x120] sm:$0xff]   ;;  %v2864_v59 = vld [vmem:[%s3714_s1 + $0x128] sm:$0xff]  }
  0x13   :  { %v2861_v56 = vld [vmem:[%s3714_s1 + $0x1e0] sm:$0xff]   ;;  %v2865_v60 = vld [vmem:[%s3714_s1 + $0x1e8] sm:$0xff]   ;;  %v2867_v62 = vld [vmem:[%s3714_s1 + $0x170] sm:$0xff]  }
  0x14   :  { %2521 = vmatpush3.bf16.msra.mxu0 %v2825_v18  ;;  %v2862_v57 = vld [vmem:[%s3714_s1 + $0x1a0] sm:$0xff]   ;;  %v2866_v61 = vld [vmem:[%s3714_s1 + $0x1a8] sm:$0xff]   ;;  %v2868_v63 = vld [vmem:[%s3714_s1 + $0x130] sm:$0xff]  }
  0x15   :  { %2543 = vmatpush3.bf16.msra.mxu1 %v2826_v19  ;;  %2522 = vmatprep.subr.bf16.mxu0 %v2827_v20  ;;  %v2869_v0 = vld [vmem:[%s3714_s1 + $0x1f0] sm:$0xff]   ;;  %v2871_v2 = vld [vmem:[%s3714_s1 + $0x178] sm:$0xff]   ;;  %v2877_v9 = vld [vmem:[%s3714_s1 + $0x240] sm:$0xff]  }
  0x16   :  { %2544 = vmatprep.subr.bf16.mxu1 %v2828_v21  ;;  %v2870_v1 = vld [vmem:[%s3714_s1 + $0x1b0] sm:$0xff]   ;;  %v2872_v3 = vld [vmem:[%s3714_s1 + $0x138] sm:$0xff]   ;;  %v2880_v13 = vld [vmem:[%s3714_s1 + $0x200] sm:$0xff]  }
  0x17   :  { %v2873_v4 = vld [vmem:[%s3714_s1 + $0x1f8] sm:$0xff]   ;;  %v24_v5 = vld [vmem:[%s3716_s0 + $0x10] sm:$0xff]  ;;  %v2881_v14 = vld [vmem:[%s3714_s1 + $0x2c0] sm:$0xff]  }
  0x18   :  { %2523 = vmatpush3.bf16.msra.mxu0 %v2829_v22  ;;  %v2292_v6 = vcombine.high %v24_v5, %v24_v5  ;;  %v2876_v7 = vld [vmem:[%s3714_s1 + $0x1b8] sm:$0xff]   ;;  %v2291_v8 = vcombine.low %v24_v5, %v24_v5  ;;  %v2882_v15 = vld [vmem:[%s3714_s1 + $0x280] sm:$0xff]   ;;  %v2883_v16 = vld [vmem:[%s3714_s1 + $0x248] sm:$0xff]  }
  0x19   :  { %2545 = vmatpush3.bf16.msra.mxu1 %v2830_v23  ;;  %2524 = vmatprep.subr.bf16.mxu0 %v2831_v24  ;;  %v25_v10 = vld [vmem:[%s3716_s0 + $0x18] sm:$0xff]  ;;  %v2884_v17 = vld [vmem:[%s3714_s1 + $0x208] sm:$0xff]   ;;  %v2887_v20 = vld [vmem:[%s3714_s1 + $0x250] sm:$0xff]  }
  0x1a   :  { %2546 = vmatprep.subr.bf16.mxu1 %v2832_v25  ;;  %v2293_v11 = vcombine.low %v25_v10, %v25_v10  ;;  %v2294_v12 = vcombine.high %v25_v10, %v25_v10  ;;  %v2885_v18 = vld [vmem:[%s3714_s1 + $0x2c8] sm:$0xff]   ;;  %v2888_v21 = vld [vmem:[%s3714_s1 + $0x210] sm:$0xff]   ;;  %v2891_v24 = vld [vmem:[%s3714_s1 + $0x258] sm:$0xff]  }
  0x1b   :  { %v2886_v19 = vld [vmem:[%s3714_s1 + $0x288] sm:$0xff]   ;;  %v2889_v22 = vld [vmem:[%s3714_s1 + $0x2d0] sm:$0xff]   ;;  %v2892_v25 = vld [vmem:[%s3714_s1 + $0x218] sm:$0xff]  }
  0x1c   :  { %2525 = vmatpush3.bf16.msra.mxu0 %v2833_v26  ;;  %v2890_v23 = vld [vmem:[%s3714_s1 + $0x290] sm:$0xff]   ;;  %v2893_v26 = vld [vmem:[%s3714_s1 + $0x2d8] sm:$0xff]   ;;  %v2899_v32 = vld [vmem:[%s3714_s1 + $0x268] sm:$0xff]  }
  0x1d   :  { %2547 = vmatpush3.bf16.msra.mxu1 %v2834_v27  ;;  %2526 = vmatprep.subr.bf16.mxu0 %v2835_v28  ;;  %v2894_v27 = vld [vmem:[%s3714_s1 + $0x298] sm:$0xff]   ;;  %v2895_v28 = vld [vmem:[%s3714_s1 + $0x260] sm:$0xff]   ;;  %v2900_v33 = vld [vmem:[%s3714_s1 + $0x228] sm:$0xff]  }
  0x1e   :  { %2548 = vmatprep.subr.bf16.mxu1 %v2836_v29  ;;  %v2896_v29 = vld [vmem:[%s3714_s1 + $0x220] sm:$0xff]   ;;  %v2902_v35 = vld [vmem:[%s3714_s1 + $0x2a8] sm:$0xff]   ;;  %v2904_v37 = vld [vmem:[%s3714_s1 + $0x230] sm:$0xff]  }
  0x1f   :  { %v2934_v5 = vld [vmem:[%s3714_s1 + $0x3a0] sm:$0xff]   ;;  %v2939_v10 = vld [vmem:[%s3714_s1 + $0x370] sm:$0xff]  }
  0x20   :  { %2527 = vmatpush3.bf16.msra.mxu0 %v2837_v30  ;;  %v2897_v30 = vld [vmem:[%s3714_s1 + $0x2e0] sm:$0xff]  }
  0x21   :  { %2549 = vmatpush3.bf16.msra.mxu1 %v2838_v31  ;;  %2556 = vmatprep.subr.bf16.mxu0 %v2843_v38  ;;  %v2898_v31 = vld [vmem:[%s3714_s1 + $0x2a0] sm:$0xff]   ;;  %v2905_v38 = vld [vmem:[%s3714_s1 + $0x2f0] sm:$0xff]  }
  0x22   :  { %2578 = vmatprep.subr.bf16.mxu1 %v2845_v40  ;;  %v2907_v40 = vld [vmem:[%s3714_s1 + $0x278] sm:$0xff]  }
  0x23   :  { %1756 = vmatmul.mubr.bf16.vlgmr.msra.gmra.mrb[0].mxu0 %v2287_v34  ;;  %v2901_v34 = vld [vmem:[%s3714_s1 + $0x2e8] sm:$0xff]  }
  0x24   :  { %1796 = vmatmul.mubr.bf16.vlgmr.msra.gmra.mrb[0].mxu1 %v2289_v36  ;;  %2557 = vmatpush3.bf16.msra.mxu0 %v2844_v39  ;;  %v2903_v36 = vld [vmem:[%s3714_s1 + $0x270] sm:$0xff]  }
  0x25   :  { %2579 = vmatpush3.bf16.msra.mxu1 %v2846_v41  ;;  %2558 = vmatprep.subr.bf16.mxu0 %v2847_v42  ;;  %v2906_v39 = vld [vmem:[%s3714_s1 + $0x2b0] sm:$0xff]   ;;  %v2908_v41 = vld [vmem:[%s3714_s1 + $0x238] sm:$0xff]  }
  0x26   :  { %2580 = vmatprep.subr.bf16.mxu1 %v2849_v44  ;;  %1835 = vmatprep.mubr.bf16.mxu0 %v2292_v6  ;;  %v2909_v42 = vld [vmem:[%s3714_s1 + $0x2f8] sm:$0xff]   ;;  %v2935_v6 = vld [vmem:[%s3714_s1 + $0x368] sm:$0xff]  }
  0x27   :  { %1875 = vmatprep.mubr.bf16.mxu1 %v2294_v12  ;;  %v2941_v12 = vld [vmem:[%s3714_s1 + $0x3f0] sm:$0xff]  }
  0x28   :  { %2559 = vmatpush3.bf16.msra.mxu0 %v2848_v43  ;;  %v26_v43 = vld [vmem:[%s3716_s0 + $0x20] sm:$0xff] }
  0x29   :  { %2581 = vmatpush3.bf16.msra.mxu1 %v2850_v45  ;;  %2560 = vmatprep.subr.bf16.mxu0 %v2851_v46  ;;  %v2295_v44 = vcombine.low %v26_v43, %v26_v43  ;;  %v2296_v45 = vcombine.high %v26_v43, %v26_v43  ;;  %v2912_v46 = vld [vmem:[%s3714_s1 + $0x2b8] sm:$0xff]   ;;  %v2970_v43 = vld [vmem:[%s3714_s1 + $0x4a0] sm:$0xff]  }
  0x2a   :  { %2582 = vmatprep.subr.bf16.mxu1 %v2853_v48  ;;  %v27_v48 = vld [vmem:[%s3716_s0 + $0x28] sm:$0xff] }
  0x2c   :  { %2561 = vmatpush3.bf16.msra.mxu0 %v2852_v47  ;;  %v2913_v47 = vld [vmem:[%s3714_s1 + $0x340] sm:$0xff]  }
  0x2d   :  { %2583 = vmatpush3.bf16.msra.mxu1 %v2854_v49  ;;  %2562 = vmatprep.subr.bf16.mxu0 %v2855_v50  ;;  %v2297_v49 = vcombine.low %v27_v48, %v27_v48  ;;  %v2298_v50 = vcombine.high %v27_v48, %v27_v48  ;;  %v2975_v48 = vld [vmem:[%s3714_s1 + $0x470] sm:$0xff]  }
  0x2e   :  { %2584 = vmatprep.subr.bf16.mxu1 %v2857_v52  ;;  %v2917_v52 = vld [vmem:[%s3714_s1 + $0x3c0] sm:$0xff]  }
  0x30   :  { %2563 = vmatpush3.bf16.msra.mxu0 %v2856_v51  ;;  %v2916_v51 = vld [vmem:[%s3714_s1 + $0x300] sm:$0xff]  }
  0x31   :  { %2585 = vmatpush3.bf16.msra.mxu1 %v2858_v53  ;;  %2564 = vmatprep.subr.bf16.mxu0 %v2859_v54  ;;  %v2918_v53 = vld [vmem:[%s3714_s1 + $0x380] sm:$0xff]   ;;  %v2919_v54 = vld [vmem:[%s3714_s1 + $0x348] sm:$0xff]  }
  0x32   :  { %2586 = vmatprep.subr.bf16.mxu1 %v2861_v56  ;;  %v2921_v56 = vld [vmem:[%s3714_s1 + $0x3c8] sm:$0xff]  }
  0x34   :  { %2565 = vmatpush3.bf16.msra.mxu0 %v2860_v55  ;;  %v2920_v55 = vld [vmem:[%s3714_s1 + $0x308] sm:$0xff]  }
  0x35   :  { %2587 = vmatpush3.bf16.msra.mxu1 %v2862_v57  ;;  %2566 = vmatprep.subr.bf16.mxu0 %v2863_v58  ;;  %v2922_v57 = vld [vmem:[%s3714_s1 + $0x388] sm:$0xff]   ;;  %v2923_v58 = vld [vmem:[%s3714_s1 + $0x350] sm:$0xff]  }
  0x36   :  { %2588 = vmatprep.subr.bf16.mxu1 %v2865_v60  ;;  %v2925_v60 = vld [vmem:[%s3714_s1 + $0x3d0] sm:$0xff]  }
  0x38   :  { %2567 = vmatpush3.bf16.msra.mxu0 %v2864_v59  ;;  %v2924_v59 = vld [vmem:[%s3714_s1 + $0x310] sm:$0xff]  }
  0x39   :  { %2589 = vmatpush3.bf16.msra.mxu1 %v2866_v61  ;;  %2568 = vmatprep.subr.bf16.mxu0 %v2867_v62  ;;  %v2926_v61 = vld [vmem:[%s3714_s1 + $0x390] sm:$0xff]   ;;  %v2927_v62 = vld [vmem:[%s3714_s1 + $0x358] sm:$0xff]  }
  0x3a   :  { %2590 = vmatprep.subr.bf16.mxu1 %v2869_v0  ;;  %v2929_v0 = vld [vmem:[%s3714_s1 + $0x3d8] sm:$0xff]  }
  0x3c   :  { %2569 = vmatpush3.bf16.msra.mxu0 %v2868_v63  ;;  %v2928_v63 = vld [vmem:[%s3714_s1 + $0x318] sm:$0xff]  }
  0x3d   :  { %2591 = vmatpush3.bf16.msra.mxu1 %v2870_v1  ;;  %2570 = vmatprep.subr.bf16.mxu0 %v2871_v2  ;;  %v2930_v1 = vld [vmem:[%s3714_s1 + $0x398] sm:$0xff]   ;;  %v2931_v2 = vld [vmem:[%s3714_s1 + $0x360] sm:$0xff]  }
  0x3e   :  { %2592 = vmatprep.subr.bf16.mxu1 %v2873_v4  ;;  %v2933_v4 = vld [vmem:[%s3714_s1 + $0x3e0] sm:$0xff]  }
  0x40   :  { %2571 = vmatpush3.bf16.msra.mxu0 %v2872_v3  ;;  %v2932_v3 = vld [vmem:[%s3714_s1 + $0x320] sm:$0xff]  }
  0x41   :  { %2593 = vmatpush3.bf16.msra.mxu1 %v2876_v7  ;;  %2600 = vmatprep.subr.bf16.mxu0 %v2877_v9  ;;  %v2936_v7 = vld [vmem:[%s3714_s1 + $0x328] sm:$0xff]  }
  0x42   :  { %2622 = vmatprep.subr.bf16.mxu1 %v2881_v14  ;;  %v2938_v9 = vld [vmem:[%s3714_s1 + $0x3a8] sm:$0xff]   ;;  %v2943_v14 = vld [vmem:[%s3714_s1 + $0x378] sm:$0xff]  }
  0x43   :  { %1836 = vmatmul.mubr.bf16.vlgmr.msra.gmra.mrb[4].mxu0 %v2291_v8  ;;  %v2937_v8 = vld [vmem:[%s3714_s1 + $0x3e8] sm:$0xff]  }
  0x44   :  { %2601 = vmatpush3.bf16.msra.mxu0 %v2880_v13  ;;  %1876 = vmatmul.mubr.bf16.vlgmr.msra.gmra.mrb[4].mxu1 %v2293_v11  ;;  %v2940_v11 = vld [vmem:[%s3714_s1 + $0x330] sm:$0xff]  }
  0x45   :  { %2623 = vmatpush3.bf16.msra.mxu1 %v2882_v15  ;;  %2602 = vmatprep.subr.bf16.mxu0 %v2883_v16  ;;  %v2942_v13 = vld [vmem:[%s3714_s1 + $0x3b0] sm:$0xff]   ;;  %v2944_v15 = vld [vmem:[%s3714_s1 + $0x338] sm:$0xff]  }
  0x46   :  { %2624 = vmatprep.subr.bf16.mxu1 %v2885_v18  ;;  %1915 = vmatprep.mubr.bf16.mxu0 %v2296_v45  ;;  %v2945_v16 = vld [vmem:[%s3714_s1 + $0x3f8] sm:$0xff]   ;;  %v2972_v45 = vld [vmem:[%s3714_s1 + $0x428] sm:$0xff]  }
  0x47   :  { %1955 = vmatprep.mubr.bf16.mxu1 %v2298_v50  ;;  %v2977_v50 = vld [vmem:[%s3714_s1 + $0x4f0] sm:$0xff]  }
  0x48   :  { %2603 = vmatpush3.bf16.msra.mxu0 %v2884_v17  ;;  %v28_v17 = vld [vmem:[%s3716_s0 + $0x30] sm:$0xff] }
  0x49   :  { %2625 = vmatpush3.bf16.msra.mxu1 %v2886_v19  ;;  %2604 = vmatprep.subr.bf16.mxu0 %v2887_v20  ;;  %v2299_v18 = vcombine.low %v28_v17, %v28_v17  ;;  %v2300_v19 = vcombine.high %v28_v17, %v28_v17  ;;  %v2948_v20 = vld [vmem:[%s3714_s1 + $0x3b8] sm:$0xff]   ;;  %v3006_v17 = vld [vmem:[%s3714_s1 + $0x5a0] sm:$0xff]  }
  0x4a   :  { %2626 = vmatprep.subr.bf16.mxu1 %v2889_v22  ;;  %v29_v22 = vld [vmem:[%s3716_s0 + $0x38] sm:$0xff] }
  0x4c   :  { %2605 = vmatpush3.bf16.msra.mxu0 %v2888_v21  ;;  %v2949_v21 = vld [vmem:[%s3714_s1 + $0x440] sm:$0xff]  }
  0x4d   :  { %2627 = vmatpush3.bf16.msra.mxu1 %v2890_v23  ;;  %2606 = vmatprep.subr.bf16.mxu0 %v2891_v24  ;;  %v2301_v23 = vcombine.low %v29_v22, %v29_v22  ;;  %v2302_v24 = vcombine.high %v29_v22, %v29_v22  ;;  %v3011_v22 = vld [vmem:[%s3714_s1 + $0x570] sm:$0xff]  }
  0x4e   :  { %2628 = vmatprep.subr.bf16.mxu1 %v2893_v26  ;;  %v2953_v26 = vld [vmem:[%s3714_s1 + $0x4c0] sm:$0xff]  }
  0x50   :  { %2607 = vmatpush3.bf16.msra.mxu0 %v2892_v25  ;;  %v2952_v25 = vld [vmem:[%s3714_s1 + $0x400] sm:$0xff]  }
  0x51   :  { %2629 = vmatpush3.bf16.msra.mxu1 %v2894_v27  ;;  %2608 = vmatprep.subr.bf16.mxu0 %v2895_v28  ;;  %v2954_v27 = vld [vmem:[%s3714_s1 + $0x480] sm:$0xff]   ;;  %v2955_v28 = vld [vmem:[%s3714_s1 + $0x448] sm:$0xff]  }
  0x52   :  { %2630 = vmatprep.subr.bf16.mxu1 %v2897_v30  ;;  %v2957_v30 = vld [vmem:[%s3714_s1 + $0x4c8] sm:$0xff]  }
  0x54   :  { %2609 = vmatpush3.bf16.msra.mxu0 %v2896_v29  ;;  %v2956_v29 = vld [vmem:[%s3714_s1 + $0x408] sm:$0xff]  }
  0x55   :  { %2631 = vmatpush3.bf16.msra.mxu1 %v2898_v31  ;;  %2610 = vmatprep.subr.bf16.mxu0 %v2899_v32  ;;  %v2958_v31 = vld [vmem:[%s3714_s1 + $0x488] sm:$0xff]   ;;  %v2959_v32 = vld [vmem:[%s3714_s1 + $0x450] sm:$0xff]  }
  0x56   :  { %2632 = vmatprep.subr.bf16.mxu1 %v2901_v34  ;;  %v2961_v34 = vld [vmem:[%s3714_s1 + $0x4d0] sm:$0xff]  }
  0x58   :  { %2611 = vmatpush3.bf16.msra.mxu0 %v2900_v33  ;;  %v2960_v33 = vld [vmem:[%s3714_s1 + $0x410] sm:$0xff]  }
  0x59   :  { %2633 = vmatpush3.bf16.msra.mxu1 %v2902_v35  ;;  %2612 = vmatprep.subr.bf16.mxu0 %v2903_v36  ;;  %v2962_v35 = vld [vmem:[%s3714_s1 + $0x490] sm:$0xff]   ;;  %v2963_v36 = vld [vmem:[%s3714_s1 + $0x458] sm:$0xff]  }
  0x5a   :  { %2634 = vmatprep.subr.bf16.mxu1 %v2905_v38  ;;  %v2965_v38 = vld [vmem:[%s3714_s1 + $0x4d8] sm:$0xff]  }
  0x5c   :  { %2613 = vmatpush3.bf16.msra.mxu0 %v2904_v37  ;;  %v2964_v37 = vld [vmem:[%s3714_s1 + $0x418] sm:$0xff]  }
  0x5d   :  { %2635 = vmatpush3.bf16.msra.mxu1 %v2906_v39  ;;  %2614 = vmatprep.subr.bf16.mxu0 %v2907_v40  ;;  %v2966_v39 = vld [vmem:[%s3714_s1 + $0x498] sm:$0xff]   ;;  %v2967_v40 = vld [vmem:[%s3714_s1 + $0x460] sm:$0xff]  }
  0x5e   :  { %2636 = vmatprep.subr.bf16.mxu1 %v2909_v42  ;;  %v2969_v42 = vld [vmem:[%s3714_s1 + $0x4e0] sm:$0xff]  }
  0x60   :  { %2615 = vmatpush3.bf16.msra.mxu0 %v2908_v41  ;;  %v2968_v41 = vld [vmem:[%s3714_s1 + $0x420] sm:$0xff]  }
  0x61   :  { %2637 = vmatpush3.bf16.msra.mxu1 %v2912_v46  ;;  %2644 = vmatprep.subr.bf16.mxu0 %v2913_v47  ;;  %v2973_v46 = vld [vmem:[%s3714_s1 + $0x4e8] sm:$0xff]  }
  0x62   :  { %2666 = vmatprep.subr.bf16.mxu1 %v2917_v52  ;;  %v2974_v47 = vld [vmem:[%s3714_s1 + $0x4a8] sm:$0xff]   ;;  %v2979_v52 = vld [vmem:[%s3714_s1 + $0x478] sm:$0xff]  }
  0x63   :  { %1916 = vmatmul.mubr.bf16.vlgmr.msra.gmra.mrb[8].mxu0 %v2295_v44  ;;  %v2971_v44 = vld [vmem:[%s3714_s1 + $0x468] sm:$0xff]  }
  0x64   :  { %2645 = vmatpush3.bf16.msra.mxu0 %v2916_v51  ;;  %1956 = vmatmul.mubr.bf16.vlgmr.msra.gmra.mrb[8].mxu1 %v2297_v49  ;;  %v2976_v49 = vld [vmem:[%s3714_s1 + $0x430] sm:$0xff]  }
  0x65   :  { %2667 = vmatpush3.bf16.msra.mxu1 %v2918_v53  ;;  %2646 = vmatprep.subr.bf16.mxu0 %v2919_v54  ;;  %v2978_v51 = vld [vmem:[%s3714_s1 + $0x4b0] sm:$0xff]   ;;  %v2980_v53 = vld [vmem:[%s3714_s1 + $0x438] sm:$0xff]  }
  0x66   :  { %2668 = vmatprep.subr.bf16.mxu1 %v2921_v56  ;;  %1995 = vmatprep.mubr.bf16.mxu0 %v2300_v19  ;;  %v2981_v54 = vld [vmem:[%s3714_s1 + $0x4f8] sm:$0xff]   ;;  %v3008_v19 = vld [vmem:[%s3714_s1 + $0x528] sm:$0xff]  }
  0x67   :  { %2035 = vmatprep.mubr.bf16.mxu1 %v2302_v24  ;;  %v3013_v24 = vld [vmem:[%s3714_s1 + $0x5f0] sm:$0xff]  }
  0x68   :  { %2647 = vmatpush3.bf16.msra.mxu0 %v2920_v55  ;;  %v30_v55 = vld [vmem:[%s3716_s0 + $0x40] sm:$0xff] }
  0x69   :  { %2669 = vmatpush3.bf16.msra.mxu1 %v2922_v57  ;;  %2648 = vmatprep.subr.bf16.mxu0 %v2923_v58  ;;  %v2303_v56 = vcombine.low %v30_v55, %v30_v55  ;;  %v2304_v57 = vcombine.high %v30_v55, %v30_v55  ;;  %v2984_v58 = vld [vmem:[%s3714_s1 + $0x4b8] sm:$0xff]  }
  0x6a   :  { %2670 = vmatprep.subr.bf16.mxu1 %v2925_v60  ;;  %v31_v60 = vld [vmem:[%s3716_s0 + $0x48] sm:$0xff] }
  0x6c   :  { %2649 = vmatpush3.bf16.msra.mxu0 %v2924_v59  ;;  %v2985_v59 = vld [vmem:[%s3714_s1 + $0x540] sm:$0xff]  }
  0x6d   :  { %2671 = vmatpush3.bf16.msra.mxu1 %v2926_v61  ;;  %2650 = vmatprep.subr.bf16.mxu0 %v2927_v62  ;;  %v2305_v61 = vcombine.low %v31_v60, %v31_v60  ;;  %v2306_v62 = vcombine.high %v31_v60, %v31_v60 }
  0x6e   :  { %2672 = vmatprep.subr.bf16.mxu1 %v2929_v0  ;;  %v2989_v0 = vld [vmem:[%s3714_s1 + $0x5c0] sm:$0xff]  }
  0x70   :  { %2651 = vmatpush3.bf16.msra.mxu0 %v2928_v63  ;;  %v2988_v63 = vld [vmem:[%s3714_s1 + $0x500] sm:$0xff]  }
  0x71   :  { %2673 = vmatpush3.bf16.msra.mxu1 %v2930_v1  ;;  %2652 = vmatprep.subr.bf16.mxu0 %v2931_v2  ;;  %v2990_v1 = vld [vmem:[%s3714_s1 + $0x580] sm:$0xff]   ;;  %v2991_v2 = vld [vmem:[%s3714_s1 + $0x548] sm:$0xff]  }
  0x72   :  { %2674 = vmatprep.subr.bf16.mxu1 %v2933_v4  ;;  %v2993_v4 = vld [vmem:[%s3714_s1 + $0x5c8] sm:$0xff]  }
  0x74   :  { %2653 = vmatpush3.bf16.msra.mxu0 %v2932_v3  ;;  %v2992_v3 = vld [vmem:[%s3714_s1 + $0x508] sm:$0xff]  }
  0x75   :  { %2675 = vmatpush3.bf16.msra.mxu1 %v2934_v5  ;;  %2654 = vmatprep.subr.bf16.mxu0 %v2935_v6  ;;  %v2994_v5 = vld [vmem:[%s3714_s1 + $0x588] sm:$0xff]   ;;  %v2995_v6 = vld [vmem:[%s3714_s1 + $0x550] sm:$0xff]  }
  0x76   :  { %2676 = vmatprep.subr.bf16.mxu1 %v2937_v8  ;;  %v2997_v8 = vld [vmem:[%s3714_s1 + $0x5d0] sm:$0xff]  }
  0x78   :  { %2655 = vmatpush3.bf16.msra.mxu0 %v2936_v7  ;;  %v2996_v7 = vld [vmem:[%s3714_s1 + $0x510] sm:$0xff]  }
  0x79   :  { %2677 = vmatpush3.bf16.msra.mxu1 %v2938_v9  ;;  %2656 = vmatprep.subr.bf16.mxu0 %v2939_v10  ;;  %v2998_v9 = vld [vmem:[%s3714_s1 + $0x590] sm:$0xff]   ;;  %v2999_v10 = vld [vmem:[%s3714_s1 + $0x558] sm:$0xff]  }
  0x7a   :  { %2678 = vmatprep.subr.bf16.mxu1 %v2941_v12  ;;  %v3001_v12 = vld [vmem:[%s3714_s1 + $0x5d8] sm:$0xff]  }
  0x7c   :  { %2657 = vmatpush3.bf16.msra.mxu0 %v2940_v11  ;;  %v3000_v11 = vld [vmem:[%s3714_s1 + $0x518] sm:$0xff]  }
  0x7d   :  { %2679 = vmatpush3.bf16.msra.mxu1 %v2942_v13  ;;  %2658 = vmatprep.subr.bf16.mxu0 %v2943_v14  ;;  %v3002_v13 = vld [vmem:[%s3714_s1 + $0x598] sm:$0xff]   ;;  %v3003_v14 = vld [vmem:[%s3714_s1 + $0x560] sm:$0xff]  }
  0x7e   :  { %2680 = vmatprep.subr.bf16.mxu1 %v2945_v16  ;;  %v3005_v16 = vld [vmem:[%s3714_s1 + $0x5e0] sm:$0xff]  }
  0x80   :  { %2659 = vmatpush3.bf16.msra.mxu0 %v2944_v15  ;;  %v3004_v15 = vld [vmem:[%s3714_s1 + $0x520] sm:$0xff]  }
  0x81   :  { %2681 = vmatpush3.bf16.msra.mxu1 %v2948_v20  ;;  %2688 = vmatprep.subr.bf16.mxu0 %v2949_v21  ;;  %v3009_v20 = vld [vmem:[%s3714_s1 + $0x5e8] sm:$0xff]  }
  0x82   :  { %2710 = vmatprep.subr.bf16.mxu1 %v2953_v26  ;;  %v3010_v21 = vld [vmem:[%s3714_s1 + $0x5a8] sm:$0xff]   ;;  %v3015_v26 = vld [vmem:[%s3714_s1 + $0x578] sm:$0xff]  }
  0x83   :  { %1996 = vmatmul.mubr.bf16.vlgmr.msra.gmra.mrb[12].mxu0 %v2299_v18  ;;  %v3007_v18 = vld [vmem:[%s3714_s1 + $0x568] sm:$0xff]  }
  0x84   :  { %2689 = vmatpush3.bf16.msra.mxu0 %v2952_v25  ;;  %2036 = vmatmul.mubr.bf16.vlgmr.msra.gmra.mrb[12].mxu1 %v2301_v23  ;;  %v3012_v23 = vld [vmem:[%s3714_s1 + $0x530] sm:$0xff]  }
  0x85   :  { %2711 = vmatpush3.bf16.msra.mxu1 %v2954_v27  ;;  %2690 = vmatprep.subr.bf16.mxu0 %v2955_v28  ;;  %v3014_v25 = vld [vmem:[%s3714_s1 + $0x5b0] sm:$0xff]   ;;  %v3016_v27 = vld [vmem:[%s3714_s1 + $0x538] sm:$0xff]  }
  0x86   :  { %2712 = vmatprep.subr.bf16.mxu1 %v2957_v30  ;;  %2075 = vmatprep.mubr.bf16.mxu0 %v2304_v57  ;;  %v3017_v28 = vld [vmem:[%s3714_s1 + $0x5f8] sm:$0xff]  }
  0x87   :  { %2115 = vmatprep.mubr.bf16.mxu1 %v2306_v62 }
  0x88   :  { %2691 = vmatpush3.bf16.msra.mxu0 %v2956_v29  ;;  %v32_v29 = vld [vmem:[%s3716_s0 + $0x50] sm:$0xff] }
  0x89   :  { %2713 = vmatpush3.bf16.msra.mxu1 %v2958_v31  ;;  %2692 = vmatprep.subr.bf16.mxu0 %v2959_v32  ;;  %v2307_v30 = vcombine.low %v32_v29, %v32_v29  ;;  %v2308_v31 = vcombine.high %v32_v29, %v32_v29  ;;  %v3020_v32 = vld [vmem:[%s3714_s1 + $0x5b8] sm:$0xff]  }
  0x8a   :  { %2714 = vmatprep.subr.bf16.mxu1 %v2961_v34  ;;  %v3034_v34 = vmov 0.0  }
  0x8c   :  { %2693 = vmatpush3.bf16.msra.mxu0 %v2960_v33  ;;  %v33_v33 = vld [vmem:[%s3716_s0 + $0x58] sm:$0xff] }
  0x8d   :  { %2715 = vmatpush3.bf16.msra.mxu1 %v2962_v35  ;;  %2694 = vmatprep.subr.bf16.mxu0 %v2963_v36  ;;  %v2309_v35 = vcombine.low %v33_v33, %v33_v33  ;;  %v2310_v36 = vcombine.high %v33_v33, %v33_v33 }
  0x8e   :  { %2716 = vmatprep.subr.bf16.mxu1 %v2965_v38  ;;  %v3024_v38 = vld [vmem:[%s3714_s1 + $0x608] sm:$0xff]  }
  0x90   :  { %2695 = vmatpush3.bf16.msra.mxu0 %v2964_v37  ;;  %v3023_v37 = vld [vmem:[%s3714_s1 + $0x600] sm:$0xff]  }
  0x91   :  { %2717 = vmatpush3.bf16.msra.mxu1 %v2966_v39  ;;  %2696 = vmatprep.subr.bf16.mxu0 %v2967_v40  ;;  %v3025_v39 = vld [vmem:[%s3714_s1 + $0x610] sm:$0xff]   ;;  %v3026_v40 = vld [vmem:[%s3714_s1 + $0x618] sm:$0xff]  }
  0x92   :  { %2718 = vmatprep.subr.bf16.mxu1 %v2969_v42  ;;  %v3028_v42 = vld [vmem:[%s3714_s1 + $0x628] sm:$0xff]  }
  0x94   :  { %2697 = vmatpush3.bf16.msra.mxu0 %v2968_v41  ;;  %v3027_v41 = vld [vmem:[%s3714_s1 + $0x620] sm:$0xff]  }
  0x95   :  { %2719 = vmatpush3.bf16.msra.mxu1 %v2970_v43  ;;  %2698 = vmatprep.subr.bf16.mxu0 %v2971_v44  ;;  %v3029_v43 = vld [vmem:[%s3714_s1 + $0x630] sm:$0xff]   ;;  %v3030_v44 = vld [vmem:[%s3714_s1 + $0x638] sm:$0xff]  }
  0x96   :  { %2720 = vmatprep.subr.bf16.mxu1 %v2973_v46 }
  0x98   :  { %2699 = vmatpush3.bf16.msra.mxu0 %v2972_v45  ;;  %v3031_v45 = vld [vmem:[%s3716_s0 + $0x60] ss:$0 sps:$4 sm:$0xff]  }
  0x99   :  { %2721 = vmatpush3.bf16.msra.mxu1 %v2974_v47  ;;  %2700 = vmatprep.subr.bf16.mxu0 %v2975_v48 }
  0x9a   :  { %2722 = vmatprep.subr.bf16.mxu1 %v2977_v50 }
  0x9c   :  { %2701 = vmatpush3.bf16.msra.mxu0 %v2976_v49 }
  0x9d   :  { %2723 = vmatpush3.bf16.msra.mxu1 %v2978_v51  ;;  %2702 = vmatprep.subr.bf16.mxu0 %v2979_v52 }
  0x9e   :  { %2724 = vmatprep.subr.bf16.mxu1 %v2981_v54 }
  0xa0   :  { %2703 = vmatpush3.bf16.msra.mxu0 %v2980_v53 }
  0xa1   :  { %2725 = vmatpush3.bf16.msra.mxu1 %v2984_v58  ;;  %2732 = vmatprep.subr.bf16.mxu0 %v2985_v59 }
  0xa2   :  { %2754 = vmatprep.subr.bf16.mxu1 %v2989_v0 }
  0xa3   :  { %2076 = vmatmul.mubr.bf16.vlgmr.msra.gmra.mrb[16].mxu0 %v2303_v56 }
  0xa4   :  { %2733 = vmatpush3.bf16.msra.mxu0 %v2988_v63  ;;  %2116 = vmatmul.mubr.bf16.vlgmr.msra.gmra.mrb[16].mxu1 %v2305_v61 }
  0xa5   :  { %2755 = vmatpush3.bf16.msra.mxu1 %v2990_v1  ;;  %2734 = vmatprep.subr.bf16.mxu0 %v2991_v2 }
  0xa6   :  { %2756 = vmatprep.subr.bf16.mxu1 %v2993_v4  ;;  %2155 = vmatprep.mubr.bf16.mxu0 %v2308_v31 }
  0xa7   :  { %2195 = vmatprep.mubr.bf16.mxu1 %v2310_v36 }
  0xa8   :  { %2735 = vmatpush3.bf16.msra.mxu0 %v2992_v3 }
  0xa9   :  { %2757 = vmatpush3.bf16.msra.mxu1 %v2994_v5  ;;  %2736 = vmatprep.subr.bf16.mxu0 %v2995_v6 }
  0xaa   :  { %2758 = vmatprep.subr.bf16.mxu1 %v2997_v8 }
  0xac   :  { %2737 = vmatpush3.bf16.msra.mxu0 %v2996_v7 }
  0xad   :  { %2759 = vmatpush3.bf16.msra.mxu1 %v2998_v9  ;;  %2738 = vmatprep.subr.bf16.mxu0 %v2999_v10 }
  0xae   :  { %2760 = vmatprep.subr.bf16.mxu1 %v3001_v12 }
  0xb0   :  { %2739 = vmatpush3.bf16.msra.mxu0 %v3000_v11 }
  0xb1   :  { %2761 = vmatpush3.bf16.msra.mxu1 %v3002_v13  ;;  %2740 = vmatprep.subr.bf16.mxu0 %v3003_v14 }
  0xb2   :  { %2762 = vmatprep.subr.bf16.mxu1 %v3005_v16 }
  0xb4   :  { %2741 = vmatpush3.bf16.msra.mxu0 %v3004_v15 }
  0xb5   :  { %2763 = vmatpush3.bf16.msra.mxu1 %v3006_v17  ;;  %2742 = vmatprep.subr.bf16.mxu0 %v3007_v18 }
  0xb6   :  { %2764 = vmatprep.subr.bf16.mxu1 %v3009_v20 }
  0xb8   :  { %2743 = vmatpush3.bf16.msra.mxu0 %v3008_v19 }
  0xb9   :  { %2765 = vmatpush3.bf16.msra.mxu1 %v3010_v21  ;;  %2744 = vmatprep.subr.bf16.mxu0 %v3011_v22 }
  0xba   :  { %2766 = vmatprep.subr.bf16.mxu1 %v3013_v24 }
  0xbc   :  { %2745 = vmatpush3.bf16.msra.mxu0 %v3012_v23 }
  0xbd   :  { %2767 = vmatpush3.bf16.msra.mxu1 %v3014_v25  ;;  %2746 = vmatprep.subr.bf16.mxu0 %v3015_v26 }
  0xbe   :  { %2768 = vmatprep.subr.bf16.mxu1 %v3017_v28 }
  0xc0   :  { %2747 = vmatpush3.bf16.msra.mxu0 %v3016_v27 }
  0xc1   :  { %2785 = vmatprep.subr.bf16.mxu0 %v3034_v34  ;;  %2769 = vmatpush3.bf16.msra.mxu1 %v3020_v32 }
  0xc3   :  { %2156 = vmatmul.mubr.bf16.vlgmr.msra.gmra.mrb[20].mxu0 %v2307_v30 }
  0xc4   :  { %2786 = vmatpush3.bf16.msra.mxu0 %v3023_v37  ;;  %2801 = vmatprep.mubr.msk.bf16.mxu0 %vm3035_vm0, %v3034_v34 }
  0xc5   :  { %2196 = vmatmul.mubr.bf16.vlgmr.msra.gmra.mrb[20].mxu1 %v2309_v35  ;;  %2787 = vmatprep.subr.bf16.mxu0 %v3034_v34 }
  0xc8   :  { %2788 = vmatpush3.bf16.msra.mxu0 %v3024_v38 }
  0xc9   :  { %2789 = vmatprep.subr.bf16.mxu0 %v3034_v34 }
  0xcc   :  { %2790 = vmatpush3.bf16.msra.mxu0 %v3025_v39 }
  0xcd   :  { %2791 = vmatprep.subr.bf16.mxu0 %v3034_v34 }
  0xd0   :  { %2792 = vmatpush3.bf16.msra.mxu0 %v3026_v40 }
  0xd1   :  { %2793 = vmatprep.subr.bf16.mxu0 %v3034_v34 }
  0xd4   :  { %2794 = vmatpush3.bf16.msra.mxu0 %v3027_v41 }
  0xd5   :  { %2795 = vmatprep.subr.bf16.mxu0 %v3034_v34 }
  0xd8   :  { %2796 = vmatpush3.bf16.msra.mxu0 %v3028_v42 }
  0xd9   :  { %2797 = vmatprep.subr.bf16.mxu0 %v3034_v34 }
  0xdc   :  { %2798 = vmatpush3.bf16.msra.mxu0 %v3029_v43 }
  0xdd   :  { %2799 = vmatprep.subr.bf16.mxu0 %v3034_v34 }
  0xe0   :  { %2800 = vmatpush3.bf16.msra.mxu0 %v3030_v44 }
  0xe3   :  { %2802 = vmatmul.mubr.bf16.vlgmr.msra.gmra.mrb[24].mxu0 %v3031_v45 }
  0xf6   :  { %v2528_v46 = vpop.f32.mrb[0].mxu0 }
  0xf7   :  { %v2550_v47 = vpop.f32.mrb[0].mxu1  ;;  %v2529_v48 = vpop.f32.mrb[1].mxu0 }
  0xf8   :  { %v2551_v49 = vpop.f32.mrb[1].mxu1  ;;  %v2530_v50 = vadd.f32 %v2529_v48, %v2528_v46  ;;  %v2531_v52 = vpop.f32.mrb[2].mxu0 }
  0xf9   :  { %v2552_v51 = vadd.f32 %v2551_v49, %v2550_v47  ;;  %v2553_v53 = vpop.f32.mrb[2].mxu1  ;;  %v2532_v54 = vpop.f32.mrb[3].mxu0 }
  0xfa   :  { %v2554_v55 = vpop.f32.mrb[3].mxu1 }
  0xfb   :  { %v1798_v56 = vadd.f32 %v2552_v51, %v2530_v50 }
 0x116   :  { %v2572_v57 = vpop.f32.mrb[4].mxu0 }
 0x117   :  { %v2573_v58 = vpop.f32.mrb[5].mxu0  ;;  %v2594_v59 = vpop.f32.mrb[4].mxu1 }
 0x118   :  { %v2574_v60 = vadd.f32 %v2573_v58, %v2572_v57  ;;  %v2575_v61 = vpop.f32.mrb[6].mxu0  ;;  %v2595_v62 = vpop.f32.mrb[5].mxu1 }
 0x119   :  { %v2576_v63 = vpop.f32.mrb[7].mxu0  ;;  %v2596_v0 = vadd.f32 %v2595_v62, %v2594_v59  ;;  %v2597_v1 = vpop.f32.mrb[6].mxu1 }
 0x11a   :  { %v1838_v2 = vadd.f32 %v2574_v60, %v1798_v56  ;;  %v2598_v3 = vpop.f32.mrb[7].mxu1 }
 0x11c   :  { %v1878_v4 = vadd.f32 %v2596_v0, %v1838_v2 }
 0x136   :  { %v2616_v5 = vpop.f32.mrb[8].mxu0 }
 0x137   :  { %v2617_v6 = vpop.f32.mrb[9].mxu0  ;;  %v2638_v9 = vpop.f32.mrb[8].mxu1 }
 0x138   :  { %v2618_v7 = vadd.f32 %v2617_v6, %v2616_v5  ;;  %v2619_v8 = vpop.f32.mrb[10].mxu0  ;;  %v2639_v11 = vpop.f32.mrb[9].mxu1 }
 0x139   :  { %v2620_v10 = vpop.f32.mrb[11].mxu0  ;;  %v2640_v13 = vadd.f32 %v2639_v11, %v2638_v9  ;;  %v2641_v14 = vpop.f32.mrb[10].mxu1 }
 0x13a   :  { %v1918_v12 = vadd.f32 %v2618_v7, %v1878_v4  ;;  %v2642_v15 = vpop.f32.mrb[11].mxu1  ;;  %v2261_v14 = vld [vmem:[%s3717_s2] sm:$0x1] }
 0x13c   :  { %v1958_v16 = vadd.f32 %v2640_v13, %v1918_v12  ;;  %v2269_v12 = vlaneseq }
 0x13e   :  { %v2270_v13 = vshrl.u32 %v2269_v12, 7 }
 0x140   :  { %v2271_v15 = vsub.s32 0, %v2270_v13 }
 0x156   :  { %v2660_v17 = vpop.f32.mrb[12].mxu0 }
 0x157   :  { %v2661_v18 = vpop.f32.mrb[13].mxu0  ;;  %v2682_v21 = vpop.f32.mrb[12].mxu1 }
 0x158   :  { %v2662_v19 = vadd.f32 %v2661_v18, %v2660_v17  ;;  %v2663_v20 = vpop.f32.mrb[14].mxu0  ;;  %v2683_v23 = vpop.f32.mrb[13].mxu1  ;;  %v2265_v18 = vld [vmem:[%s3718_s3] sm:$0x1] }
 0x159   :  { %v2664_v22 = vpop.f32.mrb[15].mxu0  ;;  %v2684_v25 = vadd.f32 %v2683_v23, %v2682_v21  ;;  %v2685_v26 = vpop.f32.mrb[14].mxu1 }
 0x15a   :  { %v1998_v24 = vadd.f32 %v2662_v19, %v1958_v16  ;;  %v2686_v27 = vpop.f32.mrb[15].mxu1 }
 0x15c   :  { %v2038_v28 = vadd.f32 %v2684_v25, %v1998_v24 }
 0x176   :  { %v2704_v29 = vpop.f32.mrb[16].mxu0 }
 0x177   :  { %v2705_v30 = vpop.f32.mrb[17].mxu0  ;;  %v2726_v33 = vpop.f32.mrb[16].mxu1 }
 0x178   :  { %v2706_v31 = vadd.f32 %v2705_v30, %v2704_v29  ;;  %v2707_v32 = vpop.f32.mrb[18].mxu0  ;;  %v2727_v36 = vpop.f32.mrb[17].mxu1 }
 0x179   :  { %v2708_v34 = vpop.f32.mrb[19].mxu0  ;;  %v2728_v37 = vadd.f32 %v2727_v36, %v2726_v33  ;;  %v2729_v38 = vpop.f32.mrb[18].mxu1 }
 0x17a   :  { %v2078_v35 = vadd.f32 %v2706_v31, %v2038_v28  ;;  %v2730_v39 = vpop.f32.mrb[19].mxu1 }
 0x17c   :  { %v2118_v40 = vadd.f32 %v2728_v37, %v2078_v35 }
 0x196   :  { %v2748_v41 = vpop.f32.mrb[20].mxu0 }
 0x197   :  { %v2749_v42 = vpop.f32.mrb[21].mxu0 }
 0x198   :  { %v2750_v43 = vadd.f32 %v2749_v42, %v2748_v41  ;;  %v2751_v44 = vpop.f32.mrb[22].mxu0  ;;  %v2770_v45 = vpop.f32.mrb[20].mxu1 }
 0x199   :  { %v2752_v46 = vpop.f32.mrb[23].mxu0  ;;  %v2771_v47 = vpop.f32.mrb[21].mxu1 }
 0x19a   :  { %v2158_v48 = vadd.f32 %v2750_v43, %v2118_v40  ;;  %v2772_v49 = vadd.f32 %v2771_v47, %v2770_v45  ;;  %v2773_v50 = vpop.f32.mrb[22].mxu1 }
 0x19b   :  { %v2774_v51 = vpop.f32.mrb[23].mxu1 }
 0x19c   :  { %v2198_v52 = vadd.f32 %v2772_v49, %v2158_v48 }
 0x1b6   :  { %v2237_v53 = vpop.f32.mrb[24].mxu0 }
 0x1b7   :  { %v2238_v54 = vadd.f32 %v2237_v53, %v2198_v52  ;;  %v2803_v55 = vpop.f32.mrb[25].mxu0 }
 0x1b8   :  { %v2240_v56 = vpop.f32.mrb[26].mxu0 }
 0x1b9   :  { %v2243_v57 = vrot.slane %v2238_v54, 4  ;;  %v2249_v58 = vmul.f32 %v2238_v54, %v2238_v54  ;;  %v2804_v59 = vpop.f32.mrb[27].mxu0 }
 0x1bb   :  { %v2244_v60 = vadd.f32 %v2243_v57, %v2238_v54  ;;  %v2250_v61 = vrot.slane %v2249_v58, 4 }
 0x1bd   :  { %v2245_v62 = vrot.slane %v2244_v60, 2  ;;  %v2251_v63 = vadd.f32 %v2250_v61, %v2249_v58 }
 0x1bf   :  { %v2246_v0 = vadd.f32 %v2245_v62, %v2244_v60  ;;  %v2252_v1 = vrot.slane %v2251_v63, 2 }
 0x1c1   :  { %v2247_v2 = vrot.slane %v2246_v0, 1  ;;  %v2253_v3 = vadd.f32 %v2252_v1, %v2251_v63 }
 0x1c3   :  { %v2248_v4 = vadd.f32 %v2247_v2, %v2246_v0  ;;  %v2254_v5 = vrot.slane %v2253_v3, 1 }
 0x1c5   :  { %v2255_v6 = vadd.f32 %v2254_v5, %v2253_v3  ;;  %v2257_v7 = vmul.f32 0.125, %v2248_v4 }
 0x1c7   :  { %v2258_v8 = vmul.f32 0.125, %v2255_v6  ;;  %v2259_v9 = vmul.f32 %v2257_v7, %v2257_v7 }
 0x1c9   :  { %v2260_v10 = vsub.f32 %v2258_v8, %v2259_v9 }
 0x1cb   :  { %v2262_v11 = vadd.f32 1e-05, %v2260_v10 }
 0x1cd   :  { %3032 = vrsqrt.f32 %v2262_v11 }
 0x1d7   :  { %v3033_v16 = vpop.eup %3032 }
 0x1d8   :  { %v2264_v17 = vmul.f32 %v3033_v16, %v2261_v14 }
 0x1da   :  { %v2266_v19 = vmul.f32 %v2264_v17, %v2257_v7  ;;  %v2272_v20 = vrot.slane %v2264_v17, %v2271_v15 }
 0x1dc   :  { %v2267_v21 = vsub.f32 %v2265_v18, %v2266_v19  ;;  %v2274_v22 = vmul.f32 %v2272_v20, %v2238_v54 }
 0x1de   :  { %v2279_v23 = vrot.slane %v2267_v21, %v2271_v15 }
 0x1e0   :  { %v2281_v24 = vadd.f32 %v2279_v23, %v2274_v22 }
 0x1e2   :  { %2282 = vst [vmem:[%s3719_s5] sm:$0xff] %v2281_v24 }

</bundles_post_ra>
